<compile_context>
chip_gen: v6e
topology: v6e:2x2x1
jax: 0.10.0
libtpu: 0.0.40
codegen_flags: <defaults>
</compile_context>

<pallas_src>
import functools

import jax
import jax.numpy as jnp
from jax.experimental import pallas as pl
from jax.experimental.pallas import tpu as pltpu


# ------------------------------ fused kernel -------------------------------- #

def _nfn_lstm_fused_kernel(*refs, num_layers, T, B, H, has_redux):
    """Fused forward: hoisted layer-0 projection + wavefronted LSTM + NFN head.

    Input refs (in order):
      ant_ref   [K_pad, F]   raw antecedent rows (zero padded); row r == ant[r]
      per layer: wih_ref [Fin, 4H], whh_ref [H, 4H], b_ref [1, 4H]
                 (PyTorch gate order i,f,g,o; g block pre-scaled by 2;
                  bias = b_ih + b_hh, g block pre-scaled by 2)
      redux_ref [H, S]       theta_redux weight^T          (only if has_redux)
      theta_ref [1, S]
      bias_ref  [1, 1]       bias_model scalar (SMEM)
    Output:
      out_ref   [B, 1]
    Scratch:
      gx0_scr   [K_pad, 4H]  hoisted layer-0 projection (+ bias)
    """
    pos = 0
    ant_ref = refs[pos]; pos += 1
    layer_refs = []
    for _ in range(num_layers):
        layer_refs.append((refs[pos], refs[pos + 1], refs[pos + 2]))
        pos += 3
    redux_ref = None
    if has_redux:
        redux_ref = refs[pos]; pos += 1
    theta_ref = refs[pos]; pos += 1
    bias_ref = refs[pos]; pos += 1
    out_ref = refs[pos]; pos += 1
    gx0_scr = refs[pos]

    # Hoisted layer-0 input projection (+ bias) over the un-duplicated ant rows:
    # one [K_pad, F] @ [F, 4H] MXU matmul, written once to VMEM scratch.
    gx0_scr[...] = (jnp.dot(ant_ref[...], layer_refs[0][0][...],
                            preferred_element_type=jnp.float32)
                    + layer_refs[0][2][...])

    whh0 = layer_refs[0][1][...]                                   # [H, 4H]
    upper = [(layer_refs[L][0][...], layer_refs[L][1][...], layer_refs[L][2][...])
             for L in range(1, num_layers)]                       # [H,4H]x2 + [1,4H]

    def cell(gates, c_prev):
        # One EUP sigmoid over all 4 gate blocks (g columns were pre-scaled by 2).
        s = jax.nn.sigmoid(gates)                                  # i | f | 2g | o
        g = 2.0 * s[:, 2 * H:3 * H] - 1.0                          # == tanh(g_pre)
        c_new = s[:, H:2 * H] * c_prev + s[:, :H] * g
        h_new = s[:, 3 * H:] * jnp.tanh(c_new)
        return h_new, c_new

    h = [jnp.zeros((B, H), jnp.float32) for _ in range(num_layers)]
    c = [jnp.zeros((B, H), jnp.float32) for _ in range(num_layers)]

    # Wavefront (skewed) schedule: wavefront w runs layer L at time t = w - L.
    # Layers are processed top-down so h[L-1] still holds its value from
    # wavefront w-1, i.e. exactly layer L-1's output at time t = w - L.
    # Serial chain length: T + num_layers - 1 instead of num_layers * T.
    for w in range(T + num_layers - 1):
        for L in range(num_layers - 1, -1, -1):
            t = w - L
            if t < 0 or t >= T:
                continue
            if L == 0:
                # Per-step gate block is just a contiguous VMEM row window.
                gates = gx0_scr[t:t + B, :] + jnp.dot(
                    h[0], whh0, preferred_element_type=jnp.float32)
            else:
                wih, whh, b = upper[L - 1]
                # Two dots instead of a lane-concat fusion: the first dot's
                # operand h[L-1] was produced one wavefront earlier, so the
                # scheduler issues it off the serial chain.
                gates = (jnp.dot(h[L - 1], wih, preferred_element_type=jnp.float32)
                         + jnp.dot(h[L], whh, preferred_element_type=jnp.float32)
                         + b)
            h[L], c[L] = cell(gates, c[L])

    # NFN head on the last layer's final hidden state.
    h_last = h[num_layers - 1]
    if has_redux:
        lstm_i = jnp.dot(h_last, redux_ref[...],
                         preferred_element_type=jnp.float32)       # [B, S]
    else:
        lstm_i = h_last                                            # Identity()
    # antecedent[steps-1:, :] is just rows T-1 .. T-2+B of the same ant buffer.
    individual = ant_ref[T - 1:T - 1 + B, :] * (lstm_i * theta_ref[...])
    # TODO(synk): lane-dense [1, B] output layout once B is production-sized.
    out_ref[...] = jnp.sum(individual, axis=1, keepdims=True) + bias_ref[0, 0]


# ------------------------------ Python wrapper ------------------------------ #

def _prep_layer(wih, whh, bih, bhh, H):
    """Fold biases, pre-scale the g-gate block by 2 (tanh via sigmoid trick),
    transpose to [Fin, 4H] / [H, 4H] for right-multiplication on the MXU."""
    scale = jnp.ones((4 * H, 1), jnp.float32).at[2 * H:3 * H].set(2.0)
    wih_t = (wih.astype(jnp.float32) * scale).T                    # [Fin, 4H]
    whh_t = (whh.astype(jnp.float32) * scale).T                    # [H, 4H]
    b = ((bih + bhh).astype(jnp.float32) * scale[:, 0]).reshape(1, -1)
    return wih_t, whh_t, b


def nfn_lstm_forward(params, ant, bias_model, *, steps, hidden_dim):
    """Equivalent of NFN_LSTM.forward(ant_train). ant: [K, n] -> [K-steps+1, 1]."""
    K, n = ant.shape
    T = steps
    B = K - steps + 1
    H = hidden_dim
    B_pad = ((B + 7) // 8) * 8                     # full sublane groups
    # ant rows needed: t + b for t < T, b < B_pad  ->  T - 1 + B_pad rows.
    K_pad = (((T - 1 + B_pad) + 7) // 8) * 8
    num_layers = len(params["lstm"])
    has_redux = params["theta_redux"] is not None

    ant_p = jnp.pad(ant.astype(jnp.float32), ((0, K_pad - K), (0, 0)))

    vmem = pl.BlockSpec(memory_space=pltpu.MemorySpace.VMEM)
    smem = pl.BlockSpec(memory_space=pltpu.MemorySpace.SMEM)

    inputs = [ant_p]
    in_specs = [vmem]
    for (wih, whh, bih, bhh) in params["lstm"]:
        wih_t, whh_t, b = _prep_layer(wih, whh, bih, bhh, H)
        inputs += [wih_t, whh_t, b]
        in_specs += [vmem, vmem, vmem]
    if has_redux:
        inputs.append(params["theta_redux"].T.astype(jnp.float32))  # [H, S]
        in_specs.append(vmem)
    inputs.append(params["theta"].astype(jnp.float32))               # [1, S]
    in_specs.append(vmem)
    inputs.append(jnp.full((1, 1), bias_model, jnp.float32))          # runtime scalar
    in_specs.append(smem)

    kernel = functools.partial(_nfn_lstm_fused_kernel, num_layers=num_layers,
                               T=T, B=B_pad, H=H, has_redux=has_redux)

    # TODO(synk): add a "parallel" batch grid axis + vmem_limit_bytes once K is
    # production-sized (v7x: 2 TCs, 64 MiB VMEM); at B=33 a single tile suffices.
    out = pl.pallas_call(
        kernel,
        out_shape=jax.ShapeDtypeStruct((B_pad, 1), jnp.float32),
        in_specs=in_specs,
        out_specs=pl.BlockSpec(memory_space=pltpu.MemorySpace.VMEM),
        scratch_shapes=[pltpu.VMEM((K_pad, 4 * H), jnp.float32)],
    )(*inputs)
    return out[:B]


# --------------------------- parameter construction ------------------------- #

def init_params(key, input_dim, mf_dim, hidden_dim, layer_dim):
    theta_size = input_dim * mf_dim
    bound = 1.0 / (hidden_dim ** 0.5)   # PyTorch LSTM/Linear default uniform bound
    params = {"lstm": []}
    in_f = theta_size
    for _ in range(layer_dim):
        key, k1, k2, k3, k4 = jax.random.split(key, 5)
        wih = jax.random.uniform(k1, (4 * hidden_dim, in_f), jnp.float32, -bound, bound)
        whh = jax.random.uniform(k2, (4 * hidden_dim, hidden_dim), jnp.float32, -bound, bound)
        bih = jax.random.uniform(k3, (4 * hidden_dim,), jnp.float32, -bound, bound)
        bhh = jax.random.uniform(k4, (4 * hidden_dim,), jnp.float32, -bound, bound)
        params["lstm"].append((wih, whh, bih, bhh))
        in_f = hidden_dim
    key, kt, kr = jax.random.split(key, 3)
    # Module __init__ zero-initializes theta; use small deterministic random
    # values instead so the kernel output is non-trivial.
    params["theta"] = jax.random.normal(kt, (1, theta_size), jnp.float32) * 0.1
    if hidden_dim != theta_size:
        params["theta_redux"] = jax.random.uniform(
            kr, (theta_size, hidden_dim), jnp.float32, -bound, bound)
    else:
        params["theta_redux"] = None                               # Identity()
    return params


# ------------------------------ pure-JAX reference -------------------------- #

def reference_forward(params, ant, bias_model, *, steps, hidden_dim):
    K, n = ant.shape
    B = K - steps + 1
    H = hidden_dim
    idx = jnp.arange(steps)[:, None] + jnp.arange(B)[None, :]
    x = ant[idx]                                                   # [T, B, n]
    for (wih, whh, bih, bhh) in params["lstm"]:
        def step(carry, x_t):
            h, c = carry
            gates = x_t @ wih.T + h @ whh.T + bih + bhh
            i = jax.nn.sigmoid(gates[:, :H])
            f = jax.nn.sigmoid(gates[:, H:2 * H])
            g = jnp.tanh(gates[:, 2 * H:3 * H])
            o = jax.nn.sigmoid(gates[:, 3 * H:])
            c = f * c + i * g
            h = o * jnp.tanh(c)
            return (h, c), h
        h0 = jnp.zeros((B, H), jnp.float32)
        c0 = jnp.zeros((B, H), jnp.float32)
        _, x = jax.lax.scan(step, (h0, c0), x)
    h_last = x[-1]
    lstm_i = (h_last @ params["theta_redux"].T
              if params["theta_redux"] is not None else h_last)
    yi = lstm_i * params["theta"]
    individual = ant[steps - 1:, :] * yi
    return (individual.sum(1) + bias_model)[:, None]


# ----------------------------------- main ----------------------------------- #

if __name__ == "__main__":
    input_dim, mf_dim = 4, 8            # theta_size = 32
    steps, bias_model = 8, 0.5
    K = 40                              # ant_train rows; batch B = K - steps + 1 = 33

    key = jax.random.PRNGKey(0)
    key, k_ant = jax.random.split(key)
    ant_train = jax.random.uniform(k_ant, (K, input_dim * mf_dim), jnp.float32)

    # Config 1: hidden_dim != theta_size -> Linear theta_redux, 2-layer LSTM.
    hidden_dim, layer_dim = 16, 2
    params = init_params(key, input_dim, mf_dim, hidden_dim, layer_dim)
    fwd = jax.jit(functools.partial(nfn_lstm_forward,
                                    steps=steps, hidden_dim=hidden_dim))
    out = jax.block_until_ready(fwd(params, ant_train, bias_model))
    ref = reference_forward(params, ant_train, bias_model,
                            steps=steps, hidden_dim=hidden_dim)
    assert out.shape == (K - steps + 1, 1), out.shape
    err = float(jnp.max(jnp.abs(out - ref)))
    assert err < 1e-4, f"mismatch (redux path) vs pure-JAX reference: {err}"

    # Config 2: hidden_dim == theta_size -> Identity theta_redux, 1-layer LSTM.
    hidden_dim2, layer_dim2 = input_dim * mf_dim, 1
    key, k2 = jax.random.split(key)
    params2 = init_params(k2, input_dim, mf_dim, hidden_dim2, layer_dim2)
    fwd2 = jax.jit(functools.partial(nfn_lstm_forward,
                                     steps=steps, hidden_dim=hidden_dim2))
    out2 = jax.block_until_ready(fwd2(params2, ant_train, bias_model))
    ref2 = reference_forward(params2, ant_train, bias_model,
                             steps=steps, hidden_dim=hidden_dim2)
    err2 = float(jnp.max(jnp.abs(out2 - ref2)))
    assert err2 < 1e-4, f"mismatch (identity path) vs pure-JAX reference: {err2}"

    print("KERNEL_OK")
</pallas_src>

<mosaic_0001>
module attributes {stable_mosaic.version = 11 : i64} {
  func.func @_nfn_lstm_fused_kernel(%arg0: memref<48x32xf32, #tpu.memory_space<vmem>>, %arg1: memref<32x64xf32, #tpu.memory_space<vmem>>, %arg2: memref<16x64xf32, #tpu.memory_space<vmem>>, %arg3: memref<1x64xf32, #tpu.memory_space<vmem>>, %arg4: memref<16x64xf32, #tpu.memory_space<vmem>>, %arg5: memref<16x64xf32, #tpu.memory_space<vmem>>, %arg6: memref<1x64xf32, #tpu.memory_space<vmem>>, %arg7: memref<16x32xf32, #tpu.memory_space<vmem>>, %arg8: memref<1x32xf32, #tpu.memory_space<vmem>>, %arg9: memref<1x1xf32, #tpu.memory_space<smem>>, %arg10: memref<40x1xf32, #tpu.memory_space<vmem>>, %arg11: memref<48x64xf32, #tpu.memory_space<vmem>>) attributes {dimension_semantics = [], scalar_prefetch = 0 : i64, scratch_operands = 1 : i64, tpu.core_type = #tpu.core_type<tc>} {
    %c0 = arith.constant 0 : index
    %c0_0 = arith.constant 0 : index
    %0 = vector.load %arg0[%c0, %c0_0] : memref<48x32xf32, #tpu.memory_space<vmem>>, vector<48x32xf32>
    %c0_1 = arith.constant 0 : index
    %c0_2 = arith.constant 0 : index
    %1 = vector.load %arg1[%c0_1, %c0_2] : memref<32x64xf32, #tpu.memory_space<vmem>>, vector<32x64xf32>
    %cst = arith.constant dense<0.000000e+00> : vector<48x64xf32>
    %2 = tpu.matmul %0, %1, %cst {dimension_numbers = #tpu.dot_dimension_numbers<[1], [0], [0], [1], [0, 0, 1, 1], [], []>} : vector<48x32xf32>, vector<32x64xf32>, vector<48x64xf32> -> vector<48x64xf32>
    %c0_3 = arith.constant 0 : index
    %c0_4 = arith.constant 0 : index
    %3 = vector.load %arg3[%c0_3, %c0_4] : memref<1x64xf32, #tpu.memory_space<vmem>>, vector<1x64xf32>
    %4 = vector.broadcast %3 : vector<1x64xf32> to vector<48x64xf32>
    %5 = arith.addf %2, %4 : vector<48x64xf32>
    %c0_5 = arith.constant 0 : index
    %c0_6 = arith.constant 0 : index
    %6 = vector.load %arg11[%c0_5, %c0_6] : memref<48x64xf32, #tpu.memory_space<vmem>>, vector<48x64xf32>
    tpu.vector_store %arg11[%c0_5, %c0_6], %5 {strides = array<i32>} : memref<48x64xf32, #tpu.memory_space<vmem>>, vector<48x64xf32>,
    %c0_7 = arith.constant 0 : index
    %c0_8 = arith.constant 0 : index
    %7 = vector.load %arg2[%c0_7, %c0_8] : memref<16x64xf32, #tpu.memory_space<vmem>>, vector<16x64xf32>
    %c0_9 = arith.constant 0 : index
    %c0_10 = arith.constant 0 : index
    %8 = vector.load %arg4[%c0_9, %c0_10] : memref<16x64xf32, #tpu.memory_space<vmem>>, vector<16x64xf32>
    %c0_11 = arith.constant 0 : index
    %c0_12 = arith.constant 0 : index
    %9 = vector.load %arg5[%c0_11, %c0_12] : memref<16x64xf32, #tpu.memory_space<vmem>>, vector<16x64xf32>
    %c0_13 = arith.constant 0 : index
    %c0_14 = arith.constant 0 : index
    %10 = vector.load %arg6[%c0_13, %c0_14] : memref<1x64xf32, #tpu.memory_space<vmem>>, vector<1x64xf32>
    %cst_15 = arith.constant 0.000000e+00 : f32
    %11 = vector.broadcast %cst_15 : f32 to vector<40x16xf32>
    %cst_16 = arith.constant 0.000000e+00 : f32
    %12 = vector.broadcast %cst_16 : f32 to vector<40x16xf32>
    %cst_17 = arith.constant 0.000000e+00 : f32
    %13 = vector.broadcast %cst_17 : f32 to vector<40x16xf32>
    %cst_18 = arith.constant 0.000000e+00 : f32
    %14 = vector.broadcast %cst_18 : f32 to vector<40x16xf32>
    %c0_19 = arith.constant 0 : index
    %c0_20 = arith.constant 0 : index
    %15 = vector.load %arg11[%c0_19, %c0_20] : memref<48x64xf32, #tpu.memory_space<vmem>>, vector<40x64xf32>
    %cst_21 = arith.constant dense<0.000000e+00> : vector<40x64xf32>
    %16 = tpu.matmul %11, %7, %cst_21 {dimension_numbers = #tpu.dot_dimension_numbers<[1], [0], [0], [1], [0, 0, 1, 1], [], []>} : vector<40x16xf32>, vector<16x64xf32>, vector<40x64xf32> -> vector<40x64xf32>
    %17 = arith.addf %15, %16 : vector<40x64xf32>
    %18 = arith.negf %17 : vector<40x64xf32>
    %19 = math.exp %18 : vector<40x64xf32>
    %cst_22 = arith.constant 1.000000e+00 : f32
    %20 = vector.broadcast %cst_22 : f32 to vector<40x64xf32>
    %21 = arith.addf %20, %19 : vector<40x64xf32>
    %22 = arith.divf %20, %21 : vector<40x64xf32>
    %23 = vector.extract_strided_slice %22 {offsets = [0, 32], sizes = [40, 16], strides = [1, 1]} : vector<40x64xf32> to vector<40x16xf32>
    %cst_23 = arith.constant 2.000000e+00 : f32
    %24 = vector.broadcast %cst_23 : f32 to vector<40x16xf32>
    %25 = arith.mulf %24, %23 : vector<40x16xf32>
    %cst_24 = arith.constant 1.000000e+00 : f32
    %26 = vector.broadcast %cst_24 : f32 to vector<40x16xf32>
    %27 = arith.subf %25, %26 : vector<40x16xf32>
    %28 = vector.extract_strided_slice %22 {offsets = [0, 16], sizes = [40, 16], strides = [1, 1]} : vector<40x64xf32> to vector<40x16xf32>
    %29 = arith.mulf %28, %13 : vector<40x16xf32>
    %30 = vector.extract_strided_slice %22 {offsets = [0, 0], sizes = [40, 16], strides = [1, 1]} : vector<40x64xf32> to vector<40x16xf32>
    %31 = arith.mulf %30, %27 : vector<40x16xf32>
    %32 = arith.addf %29, %31 : vector<40x16xf32>
    %33 = vector.extract_strided_slice %22 {offsets = [0, 48], sizes = [40, 16], strides = [1, 1]} : vector<40x64xf32> to vector<40x16xf32>
    %34 = math.tanh %32 : vector<40x16xf32>
    %35 = arith.mulf %33, %34 : vector<40x16xf32>
    %cst_25 = arith.constant dense<0.000000e+00> : vector<40x64xf32>
    %36 = tpu.matmul %35, %8, %cst_25 {dimension_numbers = #tpu.dot_dimension_numbers<[1], [0], [0], [1], [0, 0, 1, 1], [], []>} : vector<40x16xf32>, vector<16x64xf32>, vector<40x64xf32> -> vector<40x64xf32>
    %cst_26 = arith.constant dense<0.000000e+00> : vector<40x64xf32>
    %37 = tpu.matmul %12, %9, %cst_26 {dimension_numbers = #tpu.dot_dimension_numbers<[1], [0], [0], [1], [0, 0, 1, 1], [], []>} : vector<40x16xf32>, vector<16x64xf32>, vector<40x64xf32> -> vector<40x64xf32>
    %38 = arith.addf %36, %37 : vector<40x64xf32>
    %39 = vector.broadcast %10 : vector<1x64xf32> to vector<40x64xf32>
    %40 = arith.addf %38, %39 : vector<40x64xf32>
    %41 = arith.negf %40 : vector<40x64xf32>
    %42 = math.exp %41 : vector<40x64xf32>
    %cst_27 = arith.constant 1.000000e+00 : f32
    %43 = vector.broadcast %cst_27 : f32 to vector<40x64xf32>
    %44 = arith.addf %43, %42 : vector<40x64xf32>
    %45 = arith.divf %43, %44 : vector<40x64xf32>
    %46 = vector.extract_strided_slice %45 {offsets = [0, 32], sizes = [40, 16], strides = [1, 1]} : vector<40x64xf32> to vector<40x16xf32>
    %cst_28 = arith.constant 2.000000e+00 : f32
    %47 = vector.broadcast %cst_28 : f32 to vector<40x16xf32>
    %48 = arith.mulf %47, %46 : vector<40x16xf32>
    %cst_29 = arith.constant 1.000000e+00 : f32
    %49 = vector.broadcast %cst_29 : f32 to vector<40x16xf32>
    %50 = arith.subf %48, %49 : vector<40x16xf32>
    %51 = vector.extract_strided_slice %45 {offsets = [0, 16], sizes = [40, 16], strides = [1, 1]} : vector<40x64xf32> to vector<40x16xf32>
    %52 = arith.mulf %51, %14 : vector<40x16xf32>
    %53 = vector.extract_strided_slice %45 {offsets = [0, 0], sizes = [40, 16], strides = [1, 1]} : vector<40x64xf32> to vector<40x16xf32>
    %54 = arith.mulf %53, %50 : vector<40x16xf32>
    %55 = arith.addf %52, %54 : vector<40x16xf32>
    %56 = vector.extract_strided_slice %45 {offsets = [0, 48], sizes = [40, 16], strides = [1, 1]} : vector<40x64xf32> to vector<40x16xf32>
    %57 = math.tanh %55 : vector<40x16xf32>
    %58 = arith.mulf %56, %57 : vector<40x16xf32>
    %c1 = arith.constant 1 : index
    %c0_30 = arith.constant 0 : index
    %59 = vector.load %arg11[%c1, %c0_30] : memref<48x64xf32, #tpu.memory_space<vmem>>, vector<40x64xf32>
    %cst_31 = arith.constant dense<0.000000e+00> : vector<40x64xf32>
    %60 = tpu.matmul %35, %7, %cst_31 {dimension_numbers = #tpu.dot_dimension_numbers<[1], [0], [0], [1], [0, 0, 1, 1], [], []>} : vector<40x16xf32>, vector<16x64xf32>, vector<40x64xf32> -> vector<40x64xf32>
    %61 = arith.addf %59, %60 : vector<40x64xf32>
    %62 = arith.negf %61 : vector<40x64xf32>
    %63 = math.exp %62 : vector<40x64xf32>
    %cst_32 = arith.constant 1.000000e+00 : f32
    %64 = vector.broadcast %cst_32 : f32 to vector<40x64xf32>
    %65 = arith.addf %64, %63 : vector<40x64xf32>
    %66 = arith.divf %64, %65 : vector<40x64xf32>
    %67 = vector.extract_strided_slice %66 {offsets = [0, 32], sizes = [40, 16], strides = [1, 1]} : vector<40x64xf32> to vector<40x16xf32>
    %cst_33 = arith.constant 2.000000e+00 : f32
    %68 = vector.broadcast %cst_33 : f32 to vector<40x16xf32>
    %69 = arith.mulf %68, %67 : vector<40x16xf32>
    %cst_34 = arith.constant 1.000000e+00 : f32
    %70 = vector.broadcast %cst_34 : f32 to vector<40x16xf32>
    %71 = arith.subf %69, %70 : vector<40x16xf32>
    %72 = vector.extract_strided_slice %66 {offsets = [0, 16], sizes = [40, 16], strides = [1, 1]} : vector<40x64xf32> to vector<40x16xf32>
    %73 = arith.mulf %72, %32 : vector<40x16xf32>
    %74 = vector.extract_strided_slice %66 {offsets = [0, 0], sizes = [40, 16], strides = [1, 1]} : vector<40x64xf32> to vector<40x16xf32>
    %75 = arith.mulf %74, %71 : vector<40x16xf32>
    %76 = arith.addf %73, %75 : vector<40x16xf32>
    %77 = vector.extract_strided_slice %66 {offsets = [0, 48], sizes = [40, 16], strides = [1, 1]} : vector<40x64xf32> to vector<40x16xf32>
    %78 = math.tanh %76 : vector<40x16xf32>
    %79 = arith.mulf %77, %78 : vector<40x16xf32>
    %cst_35 = arith.constant dense<0.000000e+00> : vector<40x64xf32>
    %80 = tpu.matmul %79, %8, %cst_35 {dimension_numbers = #tpu.dot_dimension_numbers<[1], [0], [0], [1], [0, 0, 1, 1], [], []>} : vector<40x16xf32>, vector<16x64xf32>, vector<40x64xf32> -> vector<40x64xf32>
    %cst_36 = arith.constant dense<0.000000e+00> : vector<40x64xf32>
    %81 = tpu.matmul %58, %9, %cst_36 {dimension_numbers = #tpu.dot_dimension_numbers<[1], [0], [0], [1], [0, 0, 1, 1], [], []>} : vector<40x16xf32>, vector<16x64xf32>, vector<40x64xf32> -> vector<40x64xf32>
    %82 = arith.addf %80, %81 : vector<40x64xf32>
    %83 = vector.broadcast %10 : vector<1x64xf32> to vector<40x64xf32>
    %84 = arith.addf %82, %83 : vector<40x64xf32>
    %85 = arith.negf %84 : vector<40x64xf32>
    %86 = math.exp %85 : vector<40x64xf32>
    %cst_37 = arith.constant 1.000000e+00 : f32
    %87 = vector.broadcast %cst_37 : f32 to vector<40x64xf32>
    %88 = arith.addf %87, %86 : vector<40x64xf32>
    %89 = arith.divf %87, %88 : vector<40x64xf32>
    %90 = vector.extract_strided_slice %89 {offsets = [0, 32], sizes = [40, 16], strides = [1, 1]} : vector<40x64xf32> to vector<40x16xf32>
    %cst_38 = arith.constant 2.000000e+00 : f32
    %91 = vector.broadcast %cst_38 : f32 to vector<40x16xf32>
    %92 = arith.mulf %91, %90 : vector<40x16xf32>
    %cst_39 = arith.constant 1.000000e+00 : f32
    %93 = vector.broadcast %cst_39 : f32 to vector<40x16xf32>
    %94 = arith.subf %92, %93 : vector<40x16xf32>
    %95 = vector.extract_strided_slice %89 {offsets = [0, 16], sizes = [40, 16], strides = [1, 1]} : vector<40x64xf32> to vector<40x16xf32>
    %96 = arith.mulf %95, %55 : vector<40x16xf32>
    %97 = vector.extract_strided_slice %89 {offsets = [0, 0], sizes = [40, 16], strides = [1, 1]} : vector<40x64xf32> to vector<40x16xf32>
    %98 = arith.mulf %97, %94 : vector<40x16xf32>
    %99 = arith.addf %96, %98 : vector<40x16xf32>
    %100 = vector.extract_strided_slice %89 {offsets = [0, 48], sizes = [40, 16], strides = [1, 1]} : vector<40x64xf32> to vector<40x16xf32>
    %101 = math.tanh %99 : vector<40x16xf32>
    %102 = arith.mulf %100, %101 : vector<40x16xf32>
    %c2 = arith.constant 2 : index
    %c0_40 = arith.constant 0 : index
    %103 = vector.load %arg11[%c2, %c0_40] : memref<48x64xf32, #tpu.memory_space<vmem>>, vector<40x64xf32>
    %cst_41 = arith.constant dense<0.000000e+00> : vector<40x64xf32>
    %104 = tpu.matmul %79, %7, %cst_41 {dimension_numbers = #tpu.dot_dimension_numbers<[1], [0], [0], [1], [0, 0, 1, 1], [], []>} : vector<40x16xf32>, vector<16x64xf32>, vector<40x64xf32> -> vector<40x64xf32>
    %105 = arith.addf %103, %104 : vector<40x64xf32>
    %106 = arith.negf %105 : vector<40x64xf32>
    %107 = math.exp %106 : vector<40x64xf32>
    %cst_42 = arith.constant 1.000000e+00 : f32
    %108 = vector.broadcast %cst_42 : f32 to vector<40x64xf32>
    %109 = arith.addf %108, %107 : vector<40x64xf32>
    %110 = arith.divf %108, %109 : vector<40x64xf32>
    %111 = vector.extract_strided_slice %110 {offsets = [0, 32], sizes = [40, 16], strides = [1, 1]} : vector<40x64xf32> to vector<40x16xf32>
    %cst_43 = arith.constant 2.000000e+00 : f32
    %112 = vector.broadcast %cst_43 : f32 to vector<40x16xf32>
    %113 = arith.mulf %112, %111 : vector<40x16xf32>
    %cst_44 = arith.constant 1.000000e+00 : f32
    %114 = vector.broadcast %cst_44 : f32 to vector<40x16xf32>
    %115 = arith.subf %113, %114 : vector<40x16xf32>
    %116 = vector.extract_strided_slice %110 {offsets = [0, 16], sizes = [40, 16], strides = [1, 1]} : vector<40x64xf32> to vector<40x16xf32>
    %117 = arith.mulf %116, %76 : vector<40x16xf32>
    %118 = vector.extract_strided_slice %110 {offsets = [0, 0], sizes = [40, 16], strides = [1, 1]} : vector<40x64xf32> to vector<40x16xf32>
    %119 = arith.mulf %118, %115 : vector<40x16xf32>
    %120 = arith.addf %117, %119 : vector<40x16xf32>
    %121 = vector.extract_strided_slice %110 {offsets = [0, 48], sizes = [40, 16], strides = [1, 1]} : vector<40x64xf32> to vector<40x16xf32>
    %122 = math.tanh %120 : vector<40x16xf32>
    %123 = arith.mulf %121, %122 : vector<40x16xf32>
    %cst_45 = arith.constant dense<0.000000e+00> : vector<40x64xf32>
    %124 = tpu.matmul %123, %8, %cst_45 {dimension_numbers = #tpu.dot_dimension_numbers<[1], [0], [0], [1], [0, 0, 1, 1], [], []>} : vector<40x16xf32>, vector<16x64xf32>, vector<40x64xf32> -> vector<40x64xf32>
    %cst_46 = arith.constant dense<0.000000e+00> : vector<40x64xf32>
    %125 = tpu.matmul %102, %9, %cst_46 {dimension_numbers = #tpu.dot_dimension_numbers<[1], [0], [0], [1], [0, 0, 1, 1], [], []>} : vector<40x16xf32>, vector<16x64xf32>, vector<40x64xf32> -> vector<40x64xf32>
    %126 = arith.addf %124, %125 : vector<40x64xf32>
    %127 = vector.broadcast %10 : vector<1x64xf32> to vector<40x64xf32>
    %128 = arith.addf %126, %127 : vector<40x64xf32>
    %129 = arith.negf %128 : vector<40x64xf32>
    %130 = math.exp %129 : vector<40x64xf32>
    %cst_47 = arith.constant 1.000000e+00 : f32
    %131 = vector.broadcast %cst_47 : f32 to vector<40x64xf32>
    %132 = arith.addf %131, %130 : vector<40x64xf32>
    %133 = arith.divf %131, %132 : vector<40x64xf32>
    %134 = vector.extract_strided_slice %133 {offsets = [0, 32], sizes = [40, 16], strides = [1, 1]} : vector<40x64xf32> to vector<40x16xf32>
    %cst_48 = arith.constant 2.000000e+00 : f32
    %135 = vector.broadcast %cst_48 : f32 to vector<40x16xf32>
    %136 = arith.mulf %135, %134 : vector<40x16xf32>
    %cst_49 = arith.constant 1.000000e+00 : f32
    %137 = vector.broadcast %cst_49 : f32 to vector<40x16xf32>
    %138 = arith.subf %136, %137 : vector<40x16xf32>
    %139 = vector.extract_strided_slice %133 {offsets = [0, 16], sizes = [40, 16], strides = [1, 1]} : vector<40x64xf32> to vector<40x16xf32>
    %140 = arith.mulf %139, %99 : vector<40x16xf32>
    %141 = vector.extract_strided_slice %133 {offsets = [0, 0], sizes = [40, 16], strides = [1, 1]} : vector<40x64xf32> to vector<40x16xf32>
    %142 = arith.mulf %141, %138 : vector<40x16xf32>
    %143 = arith.addf %140, %142 : vector<40x16xf32>
    %144 = vector.extract_strided_slice %133 {offsets = [0, 48], sizes = [40, 16], strides = [1, 1]} : vector<40x64xf32> to vector<40x16xf32>
    %145 = math.tanh %143 : vector<40x16xf32>
    %146 = arith.mulf %144, %145 : vector<40x16xf32>
    %c3 = arith.constant 3 : index
    %c0_50 = arith.constant 0 : index
    %147 = vector.load %arg11[%c3, %c0_50] : memref<48x64xf32, #tpu.memory_space<vmem>>, vector<40x64xf32>
    %cst_51 = arith.constant dense<0.000000e+00> : vector<40x64xf32>
    %148 = tpu.matmul %123, %7, %cst_51 {dimension_numbers = #tpu.dot_dimension_numbers<[1], [0], [0], [1], [0, 0, 1, 1], [], []>} : vector<40x16xf32>, vector<16x64xf32>, vector<40x64xf32> -> vector<40x64xf32>
    %149 = arith.addf %147, %148 : vector<40x64xf32>
    %150 = arith.negf %149 : vector<40x64xf32>
    %151 = math.exp %150 : vector<40x64xf32>
    %cst_52 = arith.constant 1.000000e+00 : f32
    %152 = vector.broadcast %cst_52 : f32 to vector<40x64xf32>
    %153 = arith.addf %152, %151 : vector<40x64xf32>
    %154 = arith.divf %152, %153 : vector<40x64xf32>
    %155 = vector.extract_strided_slice %154 {offsets = [0, 32], sizes = [40, 16], strides = [1, 1]} : vector<40x64xf32> to vector<40x16xf32>
    %cst_53 = arith.constant 2.000000e+00 : f32
    %156 = vector.broadcast %cst_53 : f32 to vector<40x16xf32>
    %157 = arith.mulf %156, %155 : vector<40x16xf32>
    %cst_54 = arith.constant 1.000000e+00 : f32
    %158 = vector.broadcast %cst_54 : f32 to vector<40x16xf32>
    %159 = arith.subf %157, %158 : vector<40x16xf32>
    %160 = vector.extract_strided_slice %154 {offsets = [0, 16], sizes = [40, 16], strides = [1, 1]} : vector<40x64xf32> to vector<40x16xf32>
    %161 = arith.mulf %160, %120 : vector<40x16xf32>
    %162 = vector.extract_strided_slice %154 {offsets = [0, 0], sizes = [40, 16], strides = [1, 1]} : vector<40x64xf32> to vector<40x16xf32>
    %163 = arith.mulf %162, %159 : vector<40x16xf32>
    %164 = arith.addf %161, %163 : vector<40x16xf32>
    %165 = vector.extract_strided_slice %154 {offsets = [0, 48], sizes = [40, 16], strides = [1, 1]} : vector<40x64xf32> to vector<40x16xf32>
    %166 = math.tanh %164 : vector<40x16xf32>
    %167 = arith.mulf %165, %166 : vector<40x16xf32>
    %cst_55 = arith.constant dense<0.000000e+00> : vector<40x64xf32>
    %168 = tpu.matmul %167, %8, %cst_55 {dimension_numbers = #tpu.dot_dimension_numbers<[1], [0], [0], [1], [0, 0, 1, 1], [], []>} : vector<40x16xf32>, vector<16x64xf32>, vector<40x64xf32> -> vector<40x64xf32>
    %cst_56 = arith.constant dense<0.000000e+00> : vector<40x64xf32>
    %169 = tpu.matmul %146, %9, %cst_56 {dimension_numbers = #tpu.dot_dimension_numbers<[1], [0], [0], [1], [0, 0, 1, 1], [], []>} : vector<40x16xf32>, vector<16x64xf32>, vector<40x64xf32> -> vector<40x64xf32>
    %170 = arith.addf %168, %169 : vector<40x64xf32>
    %171 = vector.broadcast %10 : vector<1x64xf32> to vector<40x64xf32>
    %172 = arith.addf %170, %171 : vector<40x64xf32>
    %173 = arith.negf %172 : vector<40x64xf32>
    %174 = math.exp %173 : vector<40x64xf32>
    %cst_57 = arith.constant 1.000000e+00 : f32
    %175 = vector.broadcast %cst_57 : f32 to vector<40x64xf32>
    %176 = arith.addf %175, %174 : vector<40x64xf32>
    %177 = arith.divf %175, %176 : vector<40x64xf32>
    %178 = vector.extract_strided_slice %177 {offsets = [0, 32], sizes = [40, 16], strides = [1, 1]} : vector<40x64xf32> to vector<40x16xf32>
    %cst_58 = arith.constant 2.000000e+00 : f32
    %179 = vector.broadcast %cst_58 : f32 to vector<40x16xf32>
    %180 = arith.mulf %179, %178 : vector<40x16xf32>
    %cst_59 = arith.constant 1.000000e+00 : f32
    %181 = vector.broadcast %cst_59 : f32 to vector<40x16xf32>
    %182 = arith.subf %180, %181 : vector<40x16xf32>
    %183 = vector.extract_strided_slice %177 {offsets = [0, 16], sizes = [40, 16], strides = [1, 1]} : vector<40x64xf32> to vector<40x16xf32>
    %184 = arith.mulf %183, %143 : vector<40x16xf32>
    %185 = vector.extract_strided_slice %177 {offsets = [0, 0], sizes = [40, 16], strides = [1, 1]} : vector<40x64xf32> to vector<40x16xf32>
    %186 = arith.mulf %185, %182 : vector<40x16xf32>
    %187 = arith.addf %184, %186 : vector<40x16xf32>
    %188 = vector.extract_strided_slice %177 {offsets = [0, 48], sizes = [40, 16], strides = [1, 1]} : vector<40x64xf32> to vector<40x16xf32>
    %189 = math.tanh %187 : vector<40x16xf32>
    %190 = arith.mulf %188, %189 : vector<40x16xf32>
    %c4 = arith.constant 4 : index
    %c0_60 = arith.constant 0 : index
    %191 = vector.load %arg11[%c4, %c0_60] : memref<48x64xf32, #tpu.memory_space<vmem>>, vector<40x64xf32>
    %cst_61 = arith.constant dense<0.000000e+00> : vector<40x64xf32>
    %192 = tpu.matmul %167, %7, %cst_61 {dimension_numbers = #tpu.dot_dimension_numbers<[1], [0], [0], [1], [0, 0, 1, 1], [], []>} : vector<40x16xf32>, vector<16x64xf32>, vector<40x64xf32> -> vector<40x64xf32>
    %193 = arith.addf %191, %192 : vector<40x64xf32>
    %194 = arith.negf %193 : vector<40x64xf32>
    %195 = math.exp %194 : vector<40x64xf32>
    %cst_62 = arith.constant 1.000000e+00 : f32
    %196 = vector.broadcast %cst_62 : f32 to vector<40x64xf32>
    %197 = arith.addf %196, %195 : vector<40x64xf32>
    %198 = arith.divf %196, %197 : vector<40x64xf32>
    %199 = vector.extract_strided_slice %198 {offsets = [0, 32], sizes = [40, 16], strides = [1, 1]} : vector<40x64xf32> to vector<40x16xf32>
    %cst_63 = arith.constant 2.000000e+00 : f32
    %200 = vector.broadcast %cst_63 : f32 to vector<40x16xf32>
    %201 = arith.mulf %200, %199 : vector<40x16xf32>
    %cst_64 = arith.constant 1.000000e+00 : f32
    %202 = vector.broadcast %cst_64 : f32 to vector<40x16xf32>
    %203 = arith.subf %201, %202 : vector<40x16xf32>
    %204 = vector.extract_strided_slice %198 {offsets = [0, 16], sizes = [40, 16], strides = [1, 1]} : vector<40x64xf32> to vector<40x16xf32>
    %205 = arith.mulf %204, %164 : vector<40x16xf32>
    %206 = vector.extract_strided_slice %198 {offsets = [0, 0], sizes = [40, 16], strides = [1, 1]} : vector<40x64xf32> to vector<40x16xf32>
    %207 = arith.mulf %206, %203 : vector<40x16xf32>
    %208 = arith.addf %205, %207 : vector<40x16xf32>
    %209 = vector.extract_strided_slice %198 {offsets = [0, 48], sizes = [40, 16], strides = [1, 1]} : vector<40x64xf32> to vector<40x16xf32>
    %210 = math.tanh %208 : vector<40x16xf32>
    %211 = arith.mulf %209, %210 : vector<40x16xf32>
    %cst_65 = arith.constant dense<0.000000e+00> : vector<40x64xf32>
    %212 = tpu.matmul %211, %8, %cst_65 {dimension_numbers = #tpu.dot_dimension_numbers<[1], [0], [0], [1], [0, 0, 1, 1], [], []>} : vector<40x16xf32>, vector<16x64xf32>, vector<40x64xf32> -> vector<40x64xf32>
    %cst_66 = arith.constant dense<0.000000e+00> : vector<40x64xf32>
    %213 = tpu.matmul %190, %9, %cst_66 {dimension_numbers = #tpu.dot_dimension_numbers<[1], [0], [0], [1], [0, 0, 1, 1], [], []>} : vector<40x16xf32>, vector<16x64xf32>, vector<40x64xf32> -> vector<40x64xf32>
    %214 = arith.addf %212, %213 : vector<40x64xf32>
    %215 = vector.broadcast %10 : vector<1x64xf32> to vector<40x64xf32>
    %216 = arith.addf %214, %215 : vector<40x64xf32>
    %217 = arith.negf %216 : vector<40x64xf32>
    %218 = math.exp %217 : vector<40x64xf32>
    %cst_67 = arith.constant 1.000000e+00 : f32
    %219 = vector.broadcast %cst_67 : f32 to vector<40x64xf32>
    %220 = arith.addf %219, %218 : vector<40x64xf32>
    %221 = arith.divf %219, %220 : vector<40x64xf32>
    %222 = vector.extract_strided_slice %221 {offsets = [0, 32], sizes = [40, 16], strides = [1, 1]} : vector<40x64xf32> to vector<40x16xf32>
    %cst_68 = arith.constant 2.000000e+00 : f32
    %223 = vector.broadcast %cst_68 : f32 to vector<40x16xf32>
    %224 = arith.mulf %223, %222 : vector<40x16xf32>
    %cst_69 = arith.constant 1.000000e+00 : f32
    %225 = vector.broadcast %cst_69 : f32 to vector<40x16xf32>
    %226 = arith.subf %224, %225 : vector<40x16xf32>
    %227 = vector.extract_strided_slice %221 {offsets = [0, 16], sizes = [40, 16], strides = [1, 1]} : vector<40x64xf32> to vector<40x16xf32>
    %228 = arith.mulf %227, %187 : vector<40x16xf32>
    %229 = vector.extract_strided_slice %221 {offsets = [0, 0], sizes = [40, 16], strides = [1, 1]} : vector<40x64xf32> to vector<40x16xf32>
    %230 = arith.mulf %229, %226 : vector<40x16xf32>
    %231 = arith.addf %228, %230 : vector<40x16xf32>
    %232 = vector.extract_strided_slice %221 {offsets = [0, 48], sizes = [40, 16], strides = [1, 1]} : vector<40x64xf32> to vector<40x16xf32>
    %233 = math.tanh %231 : vector<40x16xf32>
    %234 = arith.mulf %232, %233 : vector<40x16xf32>
    %c5 = arith.constant 5 : index
    %c0_70 = arith.constant 0 : index
    %235 = vector.load %arg11[%c5, %c0_70] : memref<48x64xf32, #tpu.memory_space<vmem>>, vector<40x64xf32>
    %cst_71 = arith.constant dense<0.000000e+00> : vector<40x64xf32>
    %236 = tpu.matmul %211, %7, %cst_71 {dimension_numbers = #tpu.dot_dimension_numbers<[1], [0], [0], [1], [0, 0, 1, 1], [], []>} : vector<40x16xf32>, vector<16x64xf32>, vector<40x64xf32> -> vector<40x64xf32>
    %237 = arith.addf %235, %236 : vector<40x64xf32>
    %238 = arith.negf %237 : vector<40x64xf32>
    %239 = math.exp %238 : vector<40x64xf32>
    %cst_72 = arith.constant 1.000000e+00 : f32
    %240 = vector.broadcast %cst_72 : f32 to vector<40x64xf32>
    %241 = arith.addf %240, %239 : vector<40x64xf32>
    %242 = arith.divf %240, %241 : vector<40x64xf32>
    %243 = vector.extract_strided_slice %242 {offsets = [0, 32], sizes = [40, 16], strides = [1, 1]} : vector<40x64xf32> to vector<40x16xf32>
    %cst_73 = arith.constant 2.000000e+00 : f32
    %244 = vector.broadcast %cst_73 : f32 to vector<40x16xf32>
    %245 = arith.mulf %244, %243 : vector<40x16xf32>
    %cst_74 = arith.constant 1.000000e+00 : f32
    %246 = vector.broadcast %cst_74 : f32 to vector<40x16xf32>
    %247 = arith.subf %245, %246 : vector<40x16xf32>
    %248 = vector.extract_strided_slice %242 {offsets = [0, 16], sizes = [40, 16], strides = [1, 1]} : vector<40x64xf32> to vector<40x16xf32>
    %249 = arith.mulf %248, %208 : vector<40x16xf32>
    %250 = vector.extract_strided_slice %242 {offsets = [0, 0], sizes = [40, 16], strides = [1, 1]} : vector<40x64xf32> to vector<40x16xf32>
    %251 = arith.mulf %250, %247 : vector<40x16xf32>
    %252 = arith.addf %249, %251 : vector<40x16xf32>
    %253 = vector.extract_strided_slice %242 {offsets = [0, 48], sizes = [40, 16], strides = [1, 1]} : vector<40x64xf32> to vector<40x16xf32>
    %254 = math.tanh %252 : vector<40x16xf32>
    %255 = arith.mulf %253, %254 : vector<40x16xf32>
    %cst_75 = arith.constant dense<0.000000e+00> : vector<40x64xf32>
    %256 = tpu.matmul %255, %8, %cst_75 {dimension_numbers = #tpu.dot_dimension_numbers<[1], [0], [0], [1], [0, 0, 1, 1], [], []>} : vector<40x16xf32>, vector<16x64xf32>, vector<40x64xf32> -> vector<40x64xf32>
    %cst_76 = arith.constant dense<0.000000e+00> : vector<40x64xf32>
    %257 = tpu.matmul %234, %9, %cst_76 {dimension_numbers = #tpu.dot_dimension_numbers<[1], [0], [0], [1], [0, 0, 1, 1], [], []>} : vector<40x16xf32>, vector<16x64xf32>, vector<40x64xf32> -> vector<40x64xf32>
    %258 = arith.addf %256, %257 : vector<40x64xf32>
    %259 = vector.broadcast %10 : vector<1x64xf32> to vector<40x64xf32>
    %260 = arith.addf %258, %259 : vector<40x64xf32>
    %261 = arith.negf %260 : vector<40x64xf32>
    %262 = math.exp %261 : vector<40x64xf32>
    %cst_77 = arith.constant 1.000000e+00 : f32
    %263 = vector.broadcast %cst_77 : f32 to vector<40x64xf32>
    %264 = arith.addf %263, %262 : vector<40x64xf32>
    %265 = arith.divf %263, %264 : vector<40x64xf32>
    %266 = vector.extract_strided_slice %265 {offsets = [0, 32], sizes = [40, 16], strides = [1, 1]} : vector<40x64xf32> to vector<40x16xf32>
    %cst_78 = arith.constant 2.000000e+00 : f32
    %267 = vector.broadcast %cst_78 : f32 to vector<40x16xf32>
    %268 = arith.mulf %267, %266 : vector<40x16xf32>
    %cst_79 = arith.constant 1.000000e+00 : f32
    %269 = vector.broadcast %cst_79 : f32 to vector<40x16xf32>
    %270 = arith.subf %268, %269 : vector<40x16xf32>
    %271 = vector.extract_strided_slice %265 {offsets = [0, 16], sizes = [40, 16], strides = [1, 1]} : vector<40x64xf32> to vector<40x16xf32>
    %272 = arith.mulf %271, %231 : vector<40x16xf32>
    %273 = vector.extract_strided_slice %265 {offsets = [0, 0], sizes = [40, 16], strides = [1, 1]} : vector<40x64xf32> to vector<40x16xf32>
    %274 = arith.mulf %273, %270 : vector<40x16xf32>
    %275 = arith.addf %272, %274 : vector<40x16xf32>
    %276 = vector.extract_strided_slice %265 {offsets = [0, 48], sizes = [40, 16], strides = [1, 1]} : vector<40x64xf32> to vector<40x16xf32>
    %277 = math.tanh %275 : vector<40x16xf32>
    %278 = arith.mulf %276, %277 : vector<40x16xf32>
    %c6 = arith.constant 6 : index
    %c0_80 = arith.constant 0 : index
    %279 = vector.load %arg11[%c6, %c0_80] : memref<48x64xf32, #tpu.memory_space<vmem>>, vector<40x64xf32>
    %cst_81 = arith.constant dense<0.000000e+00> : vector<40x64xf32>
    %280 = tpu.matmul %255, %7, %cst_81 {dimension_numbers = #tpu.dot_dimension_numbers<[1], [0], [0], [1], [0, 0, 1, 1], [], []>} : vector<40x16xf32>, vector<16x64xf32>, vector<40x64xf32> -> vector<40x64xf32>
    %281 = arith.addf %279, %280 : vector<40x64xf32>
    %282 = arith.negf %281 : vector<40x64xf32>
    %283 = math.exp %282 : vector<40x64xf32>
    %cst_82 = arith.constant 1.000000e+00 : f32
    %284 = vector.broadcast %cst_82 : f32 to vector<40x64xf32>
    %285 = arith.addf %284, %283 : vector<40x64xf32>
    %286 = arith.divf %284, %285 : vector<40x64xf32>
    %287 = vector.extract_strided_slice %286 {offsets = [0, 32], sizes = [40, 16], strides = [1, 1]} : vector<40x64xf32> to vector<40x16xf32>
    %cst_83 = arith.constant 2.000000e+00 : f32
    %288 = vector.broadcast %cst_83 : f32 to vector<40x16xf32>
    %289 = arith.mulf %288, %287 : vector<40x16xf32>
    %cst_84 = arith.constant 1.000000e+00 : f32
    %290 = vector.broadcast %cst_84 : f32 to vector<40x16xf32>
    %291 = arith.subf %289, %290 : vector<40x16xf32>
    %292 = vector.extract_strided_slice %286 {offsets = [0, 16], sizes = [40, 16], strides = [1, 1]} : vector<40x64xf32> to vector<40x16xf32>
    %293 = arith.mulf %292, %252 : vector<40x16xf32>
    %294 = vector.extract_strided_slice %286 {offsets = [0, 0], sizes = [40, 16], strides = [1, 1]} : vector<40x64xf32> to vector<40x16xf32>
    %295 = arith.mulf %294, %291 : vector<40x16xf32>
    %296 = arith.addf %293, %295 : vector<40x16xf32>
    %297 = vector.extract_strided_slice %286 {offsets = [0, 48], sizes = [40, 16], strides = [1, 1]} : vector<40x64xf32> to vector<40x16xf32>
    %298 = math.tanh %296 : vector<40x16xf32>
    %299 = arith.mulf %297, %298 : vector<40x16xf32>
    %cst_85 = arith.constant dense<0.000000e+00> : vector<40x64xf32>
    %300 = tpu.matmul %299, %8, %cst_85 {dimension_numbers = #tpu.dot_dimension_numbers<[1], [0], [0], [1], [0, 0, 1, 1], [], []>} : vector<40x16xf32>, vector<16x64xf32>, vector<40x64xf32> -> vector<40x64xf32>
    %cst_86 = arith.constant dense<0.000000e+00> : vector<40x64xf32>
    %301 = tpu.matmul %278, %9, %cst_86 {dimension_numbers = #tpu.dot_dimension_numbers<[1], [0], [0], [1], [0, 0, 1, 1], [], []>} : vector<40x16xf32>, vector<16x64xf32>, vector<40x64xf32> -> vector<40x64xf32>
    %302 = arith.addf %300, %301 : vector<40x64xf32>
    %303 = vector.broadcast %10 : vector<1x64xf32> to vector<40x64xf32>
    %304 = arith.addf %302, %303 : vector<40x64xf32>
    %305 = arith.negf %304 : vector<40x64xf32>
    %306 = math.exp %305 : vector<40x64xf32>
    %cst_87 = arith.constant 1.000000e+00 : f32
    %307 = vector.broadcast %cst_87 : f32 to vector<40x64xf32>
    %308 = arith.addf %307, %306 : vector<40x64xf32>
    %309 = arith.divf %307, %308 : vector<40x64xf32>
    %310 = vector.extract_strided_slice %309 {offsets = [0, 32], sizes = [40, 16], strides = [1, 1]} : vector<40x64xf32> to vector<40x16xf32>
    %cst_88 = arith.constant 2.000000e+00 : f32
    %311 = vector.broadcast %cst_88 : f32 to vector<40x16xf32>
    %312 = arith.mulf %311, %310 : vector<40x16xf32>
    %cst_89 = arith.constant 1.000000e+00 : f32
    %313 = vector.broadcast %cst_89 : f32 to vector<40x16xf32>
    %314 = arith.subf %312, %313 : vector<40x16xf32>
    %315 = vector.extract_strided_slice %309 {offsets = [0, 16], sizes = [40, 16], strides = [1, 1]} : vector<40x64xf32> to vector<40x16xf32>
    %316 = arith.mulf %315, %275 : vector<40x16xf32>
    %317 = vector.extract_strided_slice %309 {offsets = [0, 0], sizes = [40, 16], strides = [1, 1]} : vector<40x64xf32> to vector<40x16xf32>
    %318 = arith.mulf %317, %314 : vector<40x16xf32>
    %319 = arith.addf %316, %318 : vector<40x16xf32>
    %320 = vector.extract_strided_slice %309 {offsets = [0, 48], sizes = [40, 16], strides = [1, 1]} : vector<40x64xf32> to vector<40x16xf32>
    %321 = math.tanh %319 : vector<40x16xf32>
    %322 = arith.mulf %320, %321 : vector<40x16xf32>
    %c7 = arith.constant 7 : index
    %c0_90 = arith.constant 0 : index
    %323 = vector.load %arg11[%c7, %c0_90] : memref<48x64xf32, #tpu.memory_space<vmem>>, vector<40x64xf32>
    %cst_91 = arith.constant dense<0.000000e+00> : vector<40x64xf32>
    %324 = tpu.matmul %299, %7, %cst_91 {dimension_numbers = #tpu.dot_dimension_numbers<[1], [0], [0], [1], [0, 0, 1, 1], [], []>} : vector<40x16xf32>, vector<16x64xf32>, vector<40x64xf32> -> vector<40x64xf32>
    %325 = arith.addf %323, %324 : vector<40x64xf32>
    %326 = arith.negf %325 : vector<40x64xf32>
    %327 = math.exp %326 : vector<40x64xf32>
    %cst_92 = arith.constant 1.000000e+00 : f32
    %328 = vector.broadcast %cst_92 : f32 to vector<40x64xf32>
    %329 = arith.addf %328, %327 : vector<40x64xf32>
    %330 = arith.divf %328, %329 : vector<40x64xf32>
    %331 = vector.extract_strided_slice %330 {offsets = [0, 32], sizes = [40, 16], strides = [1, 1]} : vector<40x64xf32> to vector<40x16xf32>
    %cst_93 = arith.constant 2.000000e+00 : f32
    %332 = vector.broadcast %cst_93 : f32 to vector<40x16xf32>
    %333 = arith.mulf %332, %331 : vector<40x16xf32>
    %cst_94 = arith.constant 1.000000e+00 : f32
    %334 = vector.broadcast %cst_94 : f32 to vector<40x16xf32>
    %335 = arith.subf %333, %334 : vector<40x16xf32>
    %336 = vector.extract_strided_slice %330 {offsets = [0, 16], sizes = [40, 16], strides = [1, 1]} : vector<40x64xf32> to vector<40x16xf32>
    %337 = arith.mulf %336, %296 : vector<40x16xf32>
    %338 = vector.extract_strided_slice %330 {offsets = [0, 0], sizes = [40, 16], strides = [1, 1]} : vector<40x64xf32> to vector<40x16xf32>
    %339 = arith.mulf %338, %335 : vector<40x16xf32>
    %340 = arith.addf %337, %339 : vector<40x16xf32>
    %341 = vector.extract_strided_slice %330 {offsets = [0, 48], sizes = [40, 16], strides = [1, 1]} : vector<40x64xf32> to vector<40x16xf32>
    %342 = math.tanh %340 : vector<40x16xf32>
    %343 = arith.mulf %341, %342 : vector<40x16xf32>
    %cst_95 = arith.constant dense<0.000000e+00> : vector<40x64xf32>
    %344 = tpu.matmul %343, %8, %cst_95 {dimension_numbers = #tpu.dot_dimension_numbers<[1], [0], [0], [1], [0, 0, 1, 1], [], []>} : vector<40x16xf32>, vector<16x64xf32>, vector<40x64xf32> -> vector<40x64xf32>
    %cst_96 = arith.constant dense<0.000000e+00> : vector<40x64xf32>
    %345 = tpu.matmul %322, %9, %cst_96 {dimension_numbers = #tpu.dot_dimension_numbers<[1], [0], [0], [1], [0, 0, 1, 1], [], []>} : vector<40x16xf32>, vector<16x64xf32>, vector<40x64xf32> -> vector<40x64xf32>
    %346 = arith.addf %344, %345 : vector<40x64xf32>
    %347 = vector.broadcast %10 : vector<1x64xf32> to vector<40x64xf32>
    %348 = arith.addf %346, %347 : vector<40x64xf32>
    %349 = arith.negf %348 : vector<40x64xf32>
    %350 = math.exp %349 : vector<40x64xf32>
    %cst_97 = arith.constant 1.000000e+00 : f32
    %351 = vector.broadcast %cst_97 : f32 to vector<40x64xf32>
    %352 = arith.addf %351, %350 : vector<40x64xf32>
    %353 = arith.divf %351, %352 : vector<40x64xf32>
    %354 = vector.extract_strided_slice %353 {offsets = [0, 32], sizes = [40, 16], strides = [1, 1]} : vector<40x64xf32> to vector<40x16xf32>
    %cst_98 = arith.constant 2.000000e+00 : f32
    %355 = vector.broadcast %cst_98 : f32 to vector<40x16xf32>
    %356 = arith.mulf %355, %354 : vector<40x16xf32>
    %cst_99 = arith.constant 1.000000e+00 : f32
    %357 = vector.broadcast %cst_99 : f32 to vector<40x16xf32>
    %358 = arith.subf %356, %357 : vector<40x16xf32>
    %359 = vector.extract_strided_slice %353 {offsets = [0, 16], sizes = [40, 16], strides = [1, 1]} : vector<40x64xf32> to vector<40x16xf32>
    %360 = arith.mulf %359, %319 : vector<40x16xf32>
    %361 = vector.extract_strided_slice %353 {offsets = [0, 0], sizes = [40, 16], strides = [1, 1]} : vector<40x64xf32> to vector<40x16xf32>
    %362 = arith.mulf %361, %358 : vector<40x16xf32>
    %363 = arith.addf %360, %362 : vector<40x16xf32>
    %364 = vector.extract_strided_slice %353 {offsets = [0, 48], sizes = [40, 16], strides = [1, 1]} : vector<40x64xf32> to vector<40x16xf32>
    %365 = math.tanh %363 : vector<40x16xf32>
    %366 = arith.mulf %364, %365 : vector<40x16xf32>
    %c0_100 = arith.constant 0 : index
    %c0_101 = arith.constant 0 : index
    %367 = vector.load %arg7[%c0_100, %c0_101] : memref<16x32xf32, #tpu.memory_space<vmem>>, vector<16x32xf32>
    %cst_102 = arith.constant dense<0.000000e+00> : vector<40x32xf32>
    %368 = tpu.matmul %366, %367, %cst_102 {dimension_numbers = #tpu.dot_dimension_numbers<[1], [0], [0], [1], [0, 0, 1, 1], [], []>} : vector<40x16xf32>, vector<16x32xf32>, vector<40x32xf32> -> vector<40x32xf32>
    %c7_103 = arith.constant 7 : index
    %c0_104 = arith.constant 0 : index
    %369 = vector.load %arg0[%c7_103, %c0_104] : memref<48x32xf32, #tpu.memory_space<vmem>>, vector<40x32xf32>
    %c0_105 = arith.constant 0 : index
    %c0_106 = arith.constant 0 : index
    %370 = vector.load %arg8[%c0_105, %c0_106] : memref<1x32xf32, #tpu.memory_space<vmem>>, vector<1x32xf32>
    %371 = vector.broadcast %370 : vector<1x32xf32> to vector<40x32xf32>
    %372 = arith.mulf %368, %371 : vector<40x32xf32>
    %373 = arith.mulf %369, %372 : vector<40x32xf32>
    %cst_107 = arith.constant dense<0.000000e+00> : vector<40xf32>
    %374 = vector.multi_reduction <add>, %373, %cst_107 [1] : vector<40x32xf32> to vector<40xf32>
    %375 = vector.shape_cast %374 : vector<40xf32> to vector<40x1xf32>
    %c0_108 = arith.constant 0 : index
    %c0_109 = arith.constant 0 : index
    %376 = memref.load %arg9[%c0_108, %c0_109] : memref<1x1xf32, #tpu.memory_space<smem>>
    %377 = vector.broadcast %376 : f32 to vector<40x1xf32>
    %378 = arith.addf %375, %377 : vector<40x1xf32>
    %c0_110 = arith.constant 0 : index
    %c0_111 = arith.constant 0 : index
    %379 = vector.load %arg10[%c0_110, %c0_111] : memref<40x1xf32, #tpu.memory_space<vmem>>, vector<40x1xf32>
    tpu.vector_store %arg10[%c0_110, %c0_111], %378 {strides = array<i32>} : memref<40x1xf32, #tpu.memory_space<vmem>>, vector<40x1xf32>,
    return
  }
}

</mosaic_0001>

<bundles_post_ra>
// kernel: nfn_lstm_forward.1
= control target key start
LH: loop header
LB: loop body
LE: loop exit
PB: predicated region body
PF: predicated region fallthrough
CT: control target
= control target key end

     0   :  { %vm53_vm0 = vcmask 261120   ;;  %v6485_v2 = vmov 0.0   ;;  %vm6486_vm1 = vmmov 0   ;;  %vm167_vm2 = vcmask 523264   ;;  %s6488_s18 = smov 16   ;;  %s6489_s25 = smov 32   ;;  %s8368_s1 = inlined_call_operand.vmem [shape: f32[32,64], index: 1, kind: input, shape index: {}]   ;;  %s8369_s0 = inlined_call_operand.vmem [shape: f32[48,32], index: 0, kind: input, shape index: {}]   ;;  %s8370_s2 = inlined_call_operand.vmem [shape: f32[16,64], index: 2, kind: input, shape index: {}]   ;;  %s8371_s3 = inlined_call_operand.vmem [shape: f32[1,64], index: 3, kind: input, shape index: {}]   ;;  %s8372_s5 = inlined_call_operand.vmem [shape: f32[16,64], index: 5, kind: input, shape index: {}]   ;;  %s8373_s4 = inlined_call_operand.vmem [shape: f32[16,64], index: 4, kind: input, shape index: {}]   ;;  %s8374_s6 = inlined_call_operand.vmem [shape: f32[1,64], index: 6, kind: input, shape index: {}]   ;;  %s8375_s7 = inlined_call_operand.vmem [shape: f32[16,32], index: 7, kind: input, shape index: {}]   ;;  %s8376_s8 = inlined_call_operand.vmem [shape: f32[1,32], index: 8, kind: input, shape index: {}]   ;;  %s8377_s9 = inlined_call_operand.<no memory space> [shape: f32[1,1], index: 9, kind: input, shape index: {}]   ;;  %s8378_s10 = inlined_call_operand.vmem [shape: f32[40,1], index: 10, kind: output, shape index: {}]  }
   0x1   :  { %v45_v0 = vld [vmem:[%s8368_s1 + $0x18] sm:$0xff]  ;;  %v44_v1 = vld [vmem:[%s8368_s1 + $0x10] sm:$0xff]  ;;  %5503 = vmatprep.subr.mxu1 %v6485_v2  ;;  %5507 = vmatprep.mubr.msk.f32.mxu1 %vm6486_vm1, %v6485_v2  ;;  %v36_v3 = vld [vmem:[%s8369_s0] sm:$0xff]  ;;  %s6490_s28 = smov 80   ;;  %vm186_vm3 = vcmask 130048   ;;  %vm5007_vm4 = vcmask 7168  }
   0x2   :  { %5486 = vmatprep.subr.mxu0 %v45_v0  ;;  %v43_v4 = vld [vmem:[%s8368_s1 + $0x8] sm:$0xff]  ;;  %5494 = vmatprep.mubr.msk.f32.mxu0 %vm53_vm0, %v36_v3  ;;  %v6570_v6 = vld [vmem:[%s8370_s2] sm:$0xff]  ;;  %v38_v9 = vld [vmem:[%s8369_s0 + $0x10] sm:$0xff] }
   0x3   :  { %5487 = vmatpush3.msra.mxu0 %v45_v0  ;;  %v6565_v5 = vld [vmem:[%s8370_s2 + $0x8] sm:$0xff]  ;;  %v42_v7 = vld [vmem:[%s8368_s1] sm:$0xff]  ;;  %v39_v10 = vld [vmem:[%s8369_s0 + $0x18] sm:$0xff] }
   0x4   :  { %5488 = vmatprep.subr.mxu0 %v44_v1  ;;  %5504 = vmatpush3.msra.mxu1 %v6565_v5  ;;  %v37_v8 = vld [vmem:[%s8369_s0 + $0x8] sm:$0xff]  ;;  %v40_v11 = vld [vmem:[%s8369_s0 + $0x20] sm:$0xff] }
   0x5   :  { %5489 = vmatpush3.msra.mxu0 %v44_v1  ;;  %5505 = vmatprep.subr.mxu1 %v6485_v2  ;;  %v41_v12 = vld [vmem:[%s8369_s0 + $0x28] sm:$0xff]  ;;  %v5017_v14 = vld [vmem:[%s8371_s3] ss:$0 sm:$0xff]  ;;  %s6487_s3 = smov 96  }
   0x6   :  { %5490 = vmatprep.subr.mxu0 %v43_v4  ;;  %5506 = vmatpush3.msra.mxu1 %v6570_v6 }
   0x7   :  { %5491 = vmatpush3.msra.mxu0 %v43_v4  ;;  %5508 = vmatmul.mubr.f32.vlgmr.msra.gmra.mxu1 %v6485_v2 }
   0x8   :  { %5492 = vmatprep.subr.mxu0 %v42_v7  ;;  %5510 = vmatprep.mubr.msk.f32.mxu1 %vm6486_vm1, %v6485_v2 }
   0x9   :  { %5493 = vmatpush3.msra.mxu0 %v42_v7  ;;  %5541 = vmatprep.subr.mxu1 %v6485_v2 }
   0xa   :  { %5495 = vmatmul.mubr.msk.f32.vlgmr.msra.gmra.mxu0 %vm53_vm0, %v37_v8  ;;  %5522 = vmatprep.subr.mxu0 %v6485_v2 }
   0xb   :  { %5497 = vmatprep.mubr.msk.f32.mxu0 %vm53_vm0, %v38_v9  ;;  %5511 = vmatmul.mubr.f32.gmra.mxu1 %v6485_v2 }
   0xc   :  { %5513 = vmatprep.mubr.msk.f32.mxu1 %vm6486_vm1, %v6485_v2 }
   0xe   :  { %5498 = vmatmul.mubr.msk.f32.gmra.mxu0 %vm53_vm0, %v39_v10 }
   0xf   :  { %5500 = vmatprep.mubr.msk.f32.mxu0 %vm53_vm0, %v40_v11  ;;  %5514 = vmatmul.mubr.f32.gmra.mxu1 %v6485_v2 }
  0x10   :  { %5516 = vmatprep.mubr.msk.f32.mxu1 %vm6486_vm1, %v6485_v2 }
  0x12   :  { %5501 = vmatmul.mubr.msk.f32.gmra.mxu0 %vm53_vm0, %v41_v12 }
  0x13   :  { %5517 = vmatmul.mubr.f32.gmra.mxu1 %v6485_v2  ;;  %5526 = vmatprep.mubr.msk.f32.mxu0 %vm6486_vm1, %v6485_v2 }
  0x14   :  { %5519 = vmatprep.mubr.msk.f32.mxu1 %vm6486_vm1, %v6485_v2 }
  0x17   :  { %5520 = vmatmul.mubr.f32.gmra.mxu1 %v6485_v2 }
  0x18   :  { %5545 = vmatprep.mubr.msk.f32.mxu1 %vm6486_vm1, %v6485_v2 }
  0xc7   :  { %v256_v13 = vpop.f32.mrf.mxu1 }
  0xc9   :  { %v5509_v15 = vpop.f32.mrf.mxu1 }
  0xca   :  { %v5496_v16 = vpop.f32.mrf.mxu0 }
  0xcb   :  { %v144_v17 = vadd.f32 %v5496_v16, %v5017_v14  ;;  %v261_v18 = vpop.f32.mrf.mxu1 }
  0xcc   :  { %v138_v19 = vpop.f32.mrf.mxu0 }
  0xcd   :  { %169 = vst.msk [vmem:[#allocation2 + $0x8] sm:$0xff] %vm167_vm2, %v144_v17  ;;  %v139_v20 = vadd.f32 %v5017_v14, %v138_v19  ;;  %v5512_v21 = vpop.f32.mrf.mxu1 }
  0xce   :  { %v5499_v22 = vpop.f32.mrf.mxu0 }
  0xcf   :  { %168 = vst.msk [vmem:[#allocation2] sm:$0xff] %vm167_vm2, %v139_v20  ;;  %v154_v23 = vadd.f32 %v5499_v22, %v5017_v14  ;;  %v266_v24 = vpop.f32.mrf.mxu1 }
  0xd0   :  { %v148_v25 = vpop.f32.mrf.mxu0 }
  0xd1   :  { %171 = vst.msk [vmem:[#allocation2 + $0x18] sm:$0xff] %vm167_vm2, %v154_v23  ;;  %v149_v26 = vadd.f32 %v5017_v14, %v148_v25  ;;  %v5515_v27 = vpop.f32.mrf.mxu1 }
  0xd2   :  { %v5502_v28 = vpop.f32.mrf.mxu0 }
  0xd3   :  { %170 = vst.msk [vmem:[#allocation2 + $0x10] sm:$0xff] %vm167_vm2, %v149_v26  ;;  %v164_v29 = vadd.f32 %v5502_v28, %v5017_v14  ;;  %v271_v30 = vpop.f32.mrf.mxu1 }
  0xd4   :  { %v182_v31 = vld [vmem:[#allocation2 + $0x8] sm:$0xff]  ;;  %v158_v32 = vpop.f32.mrf.mxu0 }
  0xd5   :  { %173 = vst.msk [vmem:[#allocation2 + $0x28] sm:$0xff] %vm167_vm2, %v164_v29  ;;  %v281_v33 = vadd.f32 %v261_v18, %v182_v31  ;;  %v159_v34 = vadd.f32 %v5017_v14, %v158_v32  ;;  %v5518_v35 = vpop.f32.mrf.mxu1 }
  0xd6   :  { %v181_v36 = vld [vmem:[#allocation2] sm:$0xff] }
  0xd7   :  { %v280_v37 = vadd.f32 %v256_v13, %v181_v36  ;;  %v5025_v38 = vmul.f32 -1.442695, %v281_v33  ;;  %172 = vst.msk [vmem:[#allocation2 + $0x20] sm:$0xff] %vm167_vm2, %v159_v34  ;;  %v276_v39 = vpop.f32.mrf.mxu1 }
  0xd8   :  { %v184_v40 = vld [vmem:[#allocation2 + $0x18] sm:$0xff] }
  0xd9   :  { %v5024_v41 = vmul.f32 -1.442695, %v280_v37  ;;  %5984 = vpow2.f32 %v5025_v38  ;;  %v283_v42 = vadd.f32 %v271_v30, %v184_v40  ;;  %v5521_v43 = vpop.f32.mrf.mxu1 }
  0xda   :  { %v183_v44 = vld [vmem:[#allocation2 + $0x10] sm:$0xff]  ;;  %v6689_v43 = vld [vmem:[%s8373_s4 + $0x8] sm:$0xff] }
  0xdb   :  { %5986 = vpow2.f32 %v5024_v41  ;;  %v282_v45 = vadd.f32 %v266_v24, %v183_v44  ;;  %v5027_v46 = vmul.f32 -1.442695, %v283_v42  ;;  %v6679_v41 = vld [vmem:[%s8372_s5 + $0x8] sm:$0xff]  ;;  %v6684_v42 = vld [vmem:[%s8372_s5] sm:$0xff]  ;;  %5542 = vmatpush3.msra.mxu1 %v6689_v43 }
  0xdc   :  { %5523 = vmatpush3.msra.mxu0 %v6679_v41  ;;  %5543 = vmatprep.subr.mxu1 %v6485_v2 }
  0xdd   :  { %v5026_v47 = vmul.f32 -1.442695, %v282_v45  ;;  %5988 = vpow2.f32 %v5027_v46  ;;  %5524 = vmatprep.subr.mxu0 %v6485_v2  ;;  %v6702_v45 = vld [vmem:[%s8373_s4] sm:$0xff] }
  0xde   :  { %v185_v48 = vld [vmem:[#allocation2 + $0x20] sm:$0xff]  ;;  %5525 = vmatpush3.msra.mxu0 %v6684_v42  ;;  %5544 = vmatpush3.msra.mxu1 %v6702_v45 }
  0xdf   :  { %5990 = vpow2.f32 %v5026_v47  ;;  %v284_v49 = vadd.f32 %v276_v39, %v185_v48  ;;  %5527 = vmatmul.mubr.f32.vlgmr.msra.gmra.mxu0 %v6485_v2  ;;  %5560 = vmatprep.subr.mxu0 %v6485_v2 }
  0xe0   :  { %5561 = vmatpush3.msra.mxu0 %v6565_v5  ;;  %5529 = vmatprep.mubr.msk.f32.mxu0 %vm6486_vm1, %v6485_v2 }
  0xe1   :  { %v5028_v50 = vmul.f32 -1.442695, %v284_v49  ;;  %5562 = vmatprep.subr.mxu0 %v6485_v2  ;;  %5579 = vmatprep.subr.mxu1 %v6485_v2 }
  0xe2   :  { %5563 = vmatpush3.msra.mxu0 %v6570_v6 }
  0xe3   :  { %5992 = vpow2.f32 %v5028_v50  ;;  %5530 = vmatmul.mubr.f32.gmra.mxu0 %v6485_v2  ;;  %5598 = vmatprep.subr.mxu0 %v6485_v2 }
  0xe4   :  { %5532 = vmatprep.mubr.msk.f32.mxu0 %vm6486_vm1, %v6485_v2 }
  0xe6   :  { %v5985_v51 = vpop.eup %5984 }
  0xe7   :  { %v301_v52 = vadd.f32 1.0, %v5985_v51  ;;  %5533 = vmatmul.mubr.f32.gmra.mxu0 %v6485_v2 }
  0xe8   :  { %v5987_v53 = vpop.eup %5986  ;;  %5535 = vmatprep.mubr.msk.f32.mxu0 %vm6486_vm1, %v6485_v2 }
  0xe9   :  { %v300_v54 = vadd.f32 1.0, %v5987_v53  ;;  %5994 = vrcp.f32 %v301_v52 }
  0xea   :  { %v5989_v55 = vpop.eup %5988 }
  0xeb   :  { %5996 = vrcp.f32 %v300_v54  ;;  %v303_v56 = vadd.f32 1.0, %v5989_v55  ;;  %5536 = vmatmul.mubr.f32.gmra.mxu0 %v6485_v2 }
  0xec   :  { %v5991_v57 = vpop.eup %5990  ;;  %5538 = vmatprep.mubr.msk.f32.mxu0 %vm6486_vm1, %v6485_v2 }
  0xed   :  { %v302_v58 = vadd.f32 1.0, %v5991_v57  ;;  %5998 = vrcp.f32 %v303_v56 }
  0xef   :  { %6000 = vrcp.f32 %v302_v58  ;;  %5539 = vmatmul.mubr.f32.gmra.mxu0 %v6485_v2 }
  0xf0   :  { %v5993_v59 = vpop.eup %5992  ;;  %5564 = vmatprep.mubr.msk.f32.mxu0 %vm6486_vm1, %v6485_v2 }
  0xf1   :  { %v304_v60 = vadd.f32 1.0, %v5993_v59 }
  0xf3   :  { %6002 = vrcp.f32 %v304_v60 }
  0xf6   :  { %v6626_v61 = vpop.eup %5994 }
  0xf7   :  { %v316_v3 = vmul.f32 2.0, %v6626_v61  ;;  %v326_v29 = vmul.f32 0.0, %v6626_v61 }
  0xf8   :  { %v6628_v62 = vpop.eup %5996 }
  0xf9   :  { %v315_v63 = vmul.f32 2.0, %v6628_v62  ;;  %v5030_v9 = vadd.f32 -1.0, %v316_v3  ;;  %v325_v25 = vmul.f32 0.0, %v6628_v62 }
  0xfa   :  { %v6631_v0 = vpop.eup %5998 }
  0xfb   :  { %v5029_v1 = vadd.f32 -1.0, %v315_v63  ;;  %v318_v10 = vmul.f32 2.0, %v6631_v0  ;;  %v328_v35 = vmul.f32 0.0, %v6631_v0 }
  0xfc   :  { %v6634_v4 = vpop.eup %6000 }
  0xfd   :  { %335 = vrot.lane.b32.xlu0 %v5029_v1, %s6487_s3  ;;  %v317_v7 = vmul.f32 2.0, %v6634_v4  ;;  %v5032_v13 = vadd.f32 -1.0, %v318_v10  ;;  %v327_v28 = vmul.f32 0.0, %v6634_v4 }
  0xff   :  { %v5031_v8 = vadd.f32 -1.0, %v317_v7 }
 0x100   :  { %v6639_v11 = vpop.eup %6002 }
 0x101   :  { %339 = vrot.lane.b32.xlu1 %v5031_v8, %s6487_s3  ;;  %337 = vrot.lane.b32.xlu0 %v5030_v9, %s6487_s3  ;;  %v319_v12 = vmul.f32 2.0, %v6639_v11  ;;  %v329_v34 = vmul.f32 0.0, %v6639_v11 }
 0x103   :  { %v5033_v14 = vadd.f32 -1.0, %v319_v12 }
 0x105   :  { %341 = vrot.lane.b32.xlu1 %v5032_v13, %s6487_s3  ;;  %343 = vrot.lane.b32.xlu0 %v5033_v14, %s6487_s3  ;;  %v751_v13 = vld [vmem:[#allocation2 + $0x1] sm:$0xff] }
 0x16f   :  { %v336_v15 = vpop.permute.xlu0 %335 }
 0x170   :  { %v350_v16 = vmul.f32 %v6628_v62, %v336_v15 }
 0x172   :  { %360 = vrot.lane.b32.xlu1 %v350_v16, %s6488_s18 }
 0x173   :  { %v340_v17 = vpop.permute.xlu1 %339  ;;  %v338_v18 = vpop.permute.xlu0 %337 }
 0x174   :  { %v352_v19 = vmul.f32 %v6634_v4, %v340_v17  ;;  %v351_v20 = vmul.f32 %v6626_v61, %v338_v18 }
 0x176   :  { %364 = vrot.lane.b32.xlu1 %v352_v19, %s6488_s18  ;;  %362 = vrot.lane.b32.xlu0 %v351_v20, %s6488_s18 }
 0x177   :  { %v342_v21 = vpop.permute.xlu1 %341  ;;  %v344_v22 = vpop.permute.xlu0 %343 }
 0x178   :  { %v353_v23 = vmul.f32 %v6631_v0, %v342_v21  ;;  %v354_v24 = vmul.f32 %v6639_v11, %v344_v22 }
 0x17a   :  { %366 = vrot.lane.b32.xlu0 %v353_v23, %s6488_s18  ;;  %368 = vrot.lane.b32.xlu1 %v354_v24, %s6488_s18  ;;  %v752_v23 = vld [vmem:[#allocation2 + $0x9] sm:$0xff] }
 0x19f   :  { %v476_v57 = vpop.f32.mrf.mxu0 }
 0x1a1   :  { %v5528_v58 = vpop.f32.mrf.mxu0 }
 0x1a3   :  { %v481_v59 = vpop.f32.mrf.mxu0 }
 0x1a5   :  { %v5531_v60 = vpop.f32.mrf.mxu0 }
 0x1e4   :  { %v361_v26 = vpop.permute.xlu1 %360 }
 0x1e5   :  { %v6657_v27 = vadd.f32 %v361_v26, %v325_v25 }
 0x1e7   :  { %6004 = vtanh.f32 %v6657_v27 }
 0x1e8   :  { %v365_v30 = vpop.permute.xlu1 %364  ;;  %v363_v31 = vpop.permute.xlu0 %362 }
 0x1e9   :  { %v6662_v32 = vadd.f32 %v365_v30, %v327_v28  ;;  %v6664_v33 = vadd.f32 %v363_v31, %v326_v29 }
 0x1eb   :  { %6006 = vtanh.f32 %v6662_v32 }
 0x1ec   :  { %6008 = vtanh.f32 %v6664_v33  ;;  %v369_v36 = vpop.permute.xlu1 %368  ;;  %v367_v37 = vpop.permute.xlu0 %366 }
 0x1ed   :  { %v6670_v38 = vadd.f32 %v369_v36, %v329_v34  ;;  %v6672_v39 = vadd.f32 %v367_v37, %v328_v35  ;;  %v753_v35 = vld [vmem:[#allocation2 + $0x11] sm:$0xff] }
 0x1ef   :  { %6010 = vtanh.f32 %v6670_v38 }
 0x1f0   :  { %6012 = vtanh.f32 %v6672_v39 }
 0x1f4   :  { %v6005_v40 = vpop.eup %6004 }
 0x1f5   :  { %390 = vrot.lane.b32.xlu0 %v6005_v40, %s6489_s25 }
 0x1f8   :  { %v6007_v44 = vpop.eup %6006 }
 0x1f9   :  { %v6009_v46 = vpop.eup %6008  ;;  %394 = vrot.lane.b32.xlu0 %v6007_v44, %s6489_s25 }
 0x1fa   :  { %392 = vrot.lane.b32.xlu1 %v6009_v46, %s6489_s25 }
 0x1fc   :  { %v6011_v47 = vpop.eup %6010 }
 0x1fd   :  { %v6013_v48 = vpop.eup %6012  ;;  %398 = vrot.lane.b32.xlu0 %v6011_v47, %s6489_s25 }
 0x1fe   :  { %396 = vrot.lane.b32.xlu1 %v6013_v48, %s6489_s25 }
 0x267   :  { %v391_v5 = vpop.permute.xlu0 %390 }
 0x268   :  { %v405_v6 = vmul.f32 %v6628_v62, %v391_v5  ;;  %v6738_v62 = vpop.f32.mrf.mxu0 }
 0x26a   :  { %505 = vrot.lane.b32.xlu1 %v405_v6, %s6490_s28 }
 0x26b   :  { %v395_v49 = vpop.permute.xlu0 %394 }
 0x26c   :  { %v393_v50 = vpop.permute.xlu1 %392  ;;  %v407_v51 = vmul.f32 %v6634_v4, %v395_v49  ;;  %v754_v49 = vld [vmem:[#allocation2 + $0x19] sm:$0xff] }
 0x26d   :  { %v406_v52 = vmul.f32 %v6626_v61, %v393_v50  ;;  %v5534_v61 = vpop.f32.mrf.mxu0 }
 0x26e   :  { %509 = vrot.lane.b32.xlu1 %v407_v51, %s6490_s28 }
 0x26f   :  { %507 = vrot.lane.b32.xlu0 %v406_v52, %s6490_s28  ;;  %v399_v53 = vpop.permute.xlu0 %398  ;;  %v6740_v63 = vpop.f32.mrf.mxu0 }
 0x270   :  { %v397_v54 = vpop.permute.xlu1 %396  ;;  %v409_v55 = vmul.f32 %v6639_v11, %v399_v53  ;;  %v6785_v11 = vld [vmem:[%s8374_s6] ss:$0 sm:$0xff] }
 0x271   :  { %v408_v56 = vmul.f32 %v6631_v0, %v397_v54  ;;  %v5537_v1 = vpop.f32.mrf.mxu0 }
 0x272   :  { %513 = vrot.lane.b32.xlu1 %v409_v55, %s6490_s28 }
 0x273   :  { %511 = vrot.lane.b32.xlu0 %v408_v56, %s6490_s28  ;;  %v6742_v3 = vpop.f32.mrf.mxu0 }
 0x275   :  { %v5540_v4 = vpop.f32.mrf.mxu0 }
 0x2dc   :  { %v506_v7 = vpop.permute.xlu1 %505 }
 0x2dd   :  { %5546 = vmatmul.mubr.msk.f32.vlgmr.msra.gmra.mxu1 %vm186_vm3, %v506_v7  ;;  %5565 = vmatmul.mubr.msk.f32.vlgmr.msra.gmra.mxu0 %vm186_vm3, %v506_v7 }
 0x2de   :  { %5548 = vmatprep.mubr.msk.f32.mxu1 %vm6486_vm1, %v6485_v2  ;;  %5567 = vmatprep.mubr.msk.f32.mxu0 %vm6486_vm1, %v6485_v2 }
 0x2df   :  { %5580 = vmatpush3.msra.mxu1 %v6679_v41  ;;  %5599 = vmatpush3.msra.mxu0 %v6689_v43 }
 0x2e0   :  { %5581 = vmatprep.subr.mxu1 %v6485_v2  ;;  %5600 = vmatprep.subr.mxu0 %v6485_v2  ;;  %v510_v8 = vpop.permute.xlu1 %509 }
 0x2e1   :  { %v508_v0 = vpop.permute.xlu0 %507  ;;  %5582 = vmatpush3.msra.mxu1 %v6684_v42  ;;  %5601 = vmatpush3.msra.mxu0 %v6702_v45 }
 0x2e2   :  { %5549 = vmatmul.mubr.msk.f32.gmra.mxu1 %vm186_vm3, %v508_v0  ;;  %5568 = vmatmul.mubr.msk.f32.gmra.mxu0 %vm186_vm3, %v508_v0 }
 0x2e3   :  { %5551 = vmatprep.mubr.msk.f32.mxu1 %vm6486_vm1, %v6485_v2  ;;  %5570 = vmatprep.mubr.msk.f32.mxu0 %vm6486_vm1, %v6485_v2 }
 0x2e4   :  { %5617 = vmatprep.subr.mxu1 %v6485_v2  ;;  %5636 = vmatprep.subr.mxu0 %v6485_v2  ;;  %v514_v10 = vpop.permute.xlu1 %513 }
 0x2e5   :  { %v512_v9 = vpop.permute.xlu0 %511 }
 0x2e6   :  { %5552 = vmatmul.mubr.msk.f32.gmra.mxu1 %vm186_vm3, %v510_v8  ;;  %5571 = vmatmul.mubr.msk.f32.gmra.mxu0 %vm186_vm3, %v510_v8 }
 0x2e7   :  { %5554 = vmatprep.mubr.msk.f32.mxu1 %vm6486_vm1, %v6485_v2  ;;  %5573 = vmatprep.mubr.msk.f32.mxu0 %vm6486_vm1, %v6485_v2 }
 0x2ea   :  { %5555 = vmatmul.mubr.msk.f32.gmra.mxu1 %vm186_vm3, %v512_v9  ;;  %5574 = vmatmul.mubr.msk.f32.gmra.mxu0 %vm186_vm3, %v512_v9 }
 0x2eb   :  { %5557 = vmatprep.mubr.msk.f32.mxu1 %vm6486_vm1, %v6485_v2  ;;  %5576 = vmatprep.mubr.msk.f32.mxu0 %vm6486_vm1, %v6485_v2 }
 0x2ee   :  { %5558 = vmatmul.mubr.msk.f32.gmra.mxu1 %vm186_vm3, %v514_v10  ;;  %5577 = vmatmul.mubr.msk.f32.gmra.mxu0 %vm186_vm3, %v514_v10 }
 0x2ef   :  { %5602 = vmatprep.mubr.msk.f32.mxu0 %vm6486_vm1, %v6485_v2  ;;  %5583 = vmatprep.mubr.msk.f32.mxu1 %vm6486_vm1, %v6485_v2 }
 0x39d   :  { %v591_v12 = vpop.f32.mrf.mxu1  ;;  %v822_v14 = vpop.f32.mrf.mxu0 }
 0x39e   :  { %v592_v15 = vadd.f32 %v591_v12, %v476_v57  ;;  %v846_v16 = vadd.f32 %v822_v14, %v751_v13 }
 0x39f   :  { %v5547_v17 = vpop.f32.mrf.mxu1  ;;  %v5566_v18 = vpop.f32.mrf.mxu0 }
 0x3a0   :  { %v621_v19 = vadd.f32 %v6785_v11, %v592_v15  ;;  %v5055_v20 = vmul.f32 -1.442695, %v846_v16 }
 0x3a2   :  { %v5040_v21 = vmul.f32 -1.442695, %v621_v19  ;;  %6014 = vpow2.f32 %v5055_v20  ;;  %v596_v22 = vpop.f32.mrf.mxu1  ;;  %v827_v24 = vpop.f32.mrf.mxu0 }
 0x3a3   :  { %v597_v25 = vadd.f32 %v596_v22, %v481_v59  ;;  %v847_v26 = vadd.f32 %v827_v24, %v752_v23  ;;  %v755_v59 = vld [vmem:[#allocation2 + $0x21] sm:$0xff] }
 0x3a4   :  { %6016 = vpow2.f32 %v5040_v21  ;;  %v5550_v28 = vpop.f32.mrf.mxu1  ;;  %v5569_v29 = vpop.f32.mrf.mxu0 }
 0x3a5   :  { %v622_v30 = vadd.f32 %v6785_v11, %v597_v25  ;;  %v5056_v31 = vmul.f32 -1.442695, %v847_v26 }
 0x3a6   :  { %v601_v34 = vpop.f32.mrf.mxu1  ;;  %v832_v36 = vpop.f32.mrf.mxu0 }
 0x3a7   :  { %v5041_v37 = vmul.f32 -1.442695, %v622_v30  ;;  %6018 = vpow2.f32 %v5056_v31  ;;  %v602_v40 = vadd.f32 %v601_v34, %v6738_v62  ;;  %v848_v44 = vadd.f32 %v832_v36, %v753_v35 }
 0x3a8   :  { %v5553_v46 = vpop.f32.mrf.mxu1  ;;  %v5572_v47 = vpop.f32.mrf.mxu0 }
 0x3a9   :  { %6020 = vpow2.f32 %v5041_v37  ;;  %v623_v48 = vadd.f32 %v6785_v11, %v602_v40  ;;  %v5057_v5 = vmul.f32 -1.442695, %v848_v44 }
 0x3aa   :  { %v606_v6 = vpop.f32.mrf.mxu1  ;;  %v837_v50 = vpop.f32.mrf.mxu0 }
 0x3ab   :  { %v5042_v51 = vmul.f32 -1.442695, %v623_v48  ;;  %6022 = vpow2.f32 %v5057_v5  ;;  %v607_v52 = vadd.f32 %v606_v6, %v6740_v63  ;;  %v849_v53 = vadd.f32 %v837_v50, %v754_v49 }
 0x3ac   :  { %v5556_v54 = vpop.f32.mrf.mxu1  ;;  %v5575_v55 = vpop.f32.mrf.mxu0 }
 0x3ad   :  { %6024 = vpow2.f32 %v5042_v51  ;;  %v624_v56 = vadd.f32 %v6785_v11, %v607_v52  ;;  %v5058_v57 = vmul.f32 -1.442695, %v849_v53 }
 0x3ae   :  { %v611_v58 = vpop.f32.mrf.mxu1  ;;  %v842_v60 = vpop.f32.mrf.mxu0 }
 0x3af   :  { %v6015_v62 = vpop.eup %6014  ;;  %v5043_v61 = vmul.f32 -1.442695, %v624_v56  ;;  %6026 = vpow2.f32 %v5058_v57  ;;  %v612_v1 = vadd.f32 %v611_v58, %v6742_v3  ;;  %v850_v4 = vadd.f32 %v842_v60, %v755_v59 }
 0x3b0   :  { %v866_v7 = vadd.f32 1.0, %v6015_v62  ;;  %v5559_v0 = vpop.f32.mrf.mxu1  ;;  %v5578_v8 = vpop.f32.mrf.mxu0 }
 0x3b1   :  { %v6017_v63 = vpop.eup %6016  ;;  %6028 = vpow2.f32 %v5043_v61  ;;  %v625_v9 = vadd.f32 %v6785_v11, %v612_v1  ;;  %v5059_v10 = vmul.f32 -1.442695, %v850_v4 }
 0x3b2   :  { %v641_v12 = vadd.f32 1.0, %v6017_v63  ;;  %6030 = vrcp.f32 %v866_v7 }
 0x3b3   :  { %v5044_v13 = vmul.f32 -1.442695, %v625_v9  ;;  %6032 = vpow2.f32 %v5059_v10 }
 0x3b4   :  { %v6019_v14 = vpop.eup %6018  ;;  %6034 = vrcp.f32 %v641_v12 }
 0x3b5   :  { %v867_v15 = vadd.f32 1.0, %v6019_v14  ;;  %6036 = vpow2.f32 %v5044_v13 }
 0x3b6   :  { %v6021_v16 = vpop.eup %6020 }
 0x3b7   :  { %v642_v17 = vadd.f32 1.0, %v6021_v16  ;;  %6038 = vrcp.f32 %v867_v15 }
 0x3b8   :  { %v6023_v3 = vpop.eup %6022 }
 0x3b9   :  { %6040 = vrcp.f32 %v642_v17  ;;  %v868_v18 = vadd.f32 1.0, %v6023_v3 }
 0x3ba   :  { %v6025_v19 = vpop.eup %6024 }
 0x3bb   :  { %v643_v20 = vadd.f32 1.0, %v6025_v19  ;;  %6042 = vrcp.f32 %v868_v18 }
 0x3bc   :  { %v6027_v21 = vpop.eup %6026 }
 0x3bd   :  { %6044 = vrcp.f32 %v643_v20  ;;  %v869_v22 = vadd.f32 1.0, %v6027_v21 }
 0x3be   :  { %v6029_v23 = vpop.eup %6028 }
 0x3bf   :  { %v6795_v24 = vpop.eup %6030  ;;  %v644_v25 = vadd.f32 1.0, %v6029_v23  ;;  %6046 = vrcp.f32 %v869_v22 }
 0x3c0   :  { %v6033_v26 = vpop.eup %6032  ;;  %v881_v28 = vmul.f32 2.0, %v6795_v24 }
 0x3c1   :  { %v6798_v29 = vpop.eup %6034  ;;  %6048 = vrcp.f32 %v644_v25  ;;  %v870_v30 = vadd.f32 1.0, %v6033_v26 }
 0x3c2   :  { %v6037_v31 = vpop.eup %6036  ;;  %v5060_v34 = vadd.f32 -1.0, %v881_v28  ;;  %v656_v35 = vmul.f32 2.0, %v6798_v29  ;;  %v891_v28 = vmul.f32 %v6795_v24, %v6657_v27 }
 0x3c3   :  { %v645_v36 = vadd.f32 1.0, %v6037_v31  ;;  %6050 = vrcp.f32 %v870_v30 }
 0x3c4   :  { %v6801_v37 = vpop.eup %6038  ;;  %901 = vrot.lane.b32.xlu1 %v5060_v34, %s6487_s3  ;;  %v5045_v40 = vadd.f32 -1.0, %v656_v35  ;;  %v666_v34 = vmul.f32 0.0, %v6798_v29 }
 0x3c5   :  { %6052 = vrcp.f32 %v645_v36  ;;  %v882_v44 = vmul.f32 2.0, %v6801_v37 }
 0x3c6   :  { %v6805_v46 = vpop.eup %6040  ;;  %676 = vrot.lane.b32.xlu0 %v5045_v40, %s6487_s3  ;;  %v892_v40 = vmul.f32 %v6801_v37, %v6664_v33 }
 0x3c7   :  { %v5061_v47 = vadd.f32 -1.0, %v882_v44  ;;  %v657_v48 = vmul.f32 2.0, %v6805_v46  ;;  %v667_v27 = vmul.f32 0.0, %v6805_v46 }
 0x3c8   :  { %v6809_v5 = vpop.eup %6042 }
 0x3c9   :  { %903 = vrot.lane.b32.xlu1 %v5061_v47, %s6487_s3  ;;  %v5046_v6 = vadd.f32 -1.0, %v657_v48  ;;  %v883_v49 = vmul.f32 2.0, %v6809_v5 }
 0x3ca   :  { %v6813_v50 = vpop.eup %6044 }
 0x3cb   :  { %678 = vrot.lane.b32.xlu0 %v5046_v6, %s6487_s3  ;;  %v5062_v51 = vadd.f32 -1.0, %v883_v49  ;;  %v658_v52 = vmul.f32 2.0, %v6813_v50  ;;  %v893_v49 = vmul.f32 %v6809_v5, %v6662_v32  ;;  %v668_v33 = vmul.f32 0.0, %v6813_v50 }
 0x3cc   :  { %v6817_v53 = vpop.eup %6046 }
 0x3cd   :  { %905 = vrot.lane.b32.xlu1 %v5062_v51, %s6487_s3  ;;  %v5047_v54 = vadd.f32 -1.0, %v658_v52  ;;  %v884_v55 = vmul.f32 2.0, %v6817_v53 }
 0x3ce   :  { %v6821_v56 = vpop.eup %6048 }
 0x3cf   :  { %680 = vrot.lane.b32.xlu0 %v5047_v54, %s6487_s3  ;;  %v5063_v57 = vadd.f32 -1.0, %v884_v55  ;;  %v659_v58 = vmul.f32 2.0, %v6821_v56  ;;  %v669_v32 = vmul.f32 0.0, %v6821_v56 }
 0x3d0   :  { %v6825_v59 = vpop.eup %6050 }
 0x3d1   :  { %907 = vrot.lane.b32.xlu1 %v5063_v57, %s6487_s3  ;;  %v5048_v60 = vadd.f32 -1.0, %v659_v58  ;;  %v885_v62 = vmul.f32 2.0, %v6825_v59  ;;  %v894_v57 = vmul.f32 %v6817_v53, %v6672_v39 }
 0x3d2   :  { %v6829_v61 = vpop.eup %6052 }
 0x3d3   :  { %682 = vrot.lane.b32.xlu0 %v5048_v60, %s6487_s3  ;;  %v5064_v1 = vadd.f32 -1.0, %v885_v62  ;;  %v660_v4 = vmul.f32 2.0, %v6829_v61 }
 0x3d5   :  { %909 = vrot.lane.b32.xlu1 %v5064_v1, %s6487_s3  ;;  %v5049_v7 = vadd.f32 -1.0, %v660_v4 }
 0x3d7   :  { %684 = vrot.lane.b32.xlu0 %v5049_v7, %s6487_s3  ;;  %v895_v7 = vmul.f32 %v6825_v59, %v6670_v38 }
 0x436   :  { %v902_v0 = vpop.permute.xlu1 %901 }
 0x437   :  { %v916_v8 = vmul.f32 %v6795_v24, %v902_v0 }
 0x438   :  { %v677_v63 = vpop.permute.xlu0 %676 }
 0x439   :  { %v691_v9 = vmul.f32 %v6798_v29, %v677_v63  ;;  %926 = vrot.lane.b32.xlu1 %v916_v8, %s6488_s18  ;;  %v670_v63 = vmul.f32 0.0, %v6829_v61 }
 0x43b   :  { %v904_v10 = vpop.permute.xlu1 %903  ;;  %701 = vrot.lane.b32.xlu0 %v691_v9, %s6488_s18 }
 0x43c   :  { %v917_v12 = vmul.f32 %v6801_v37, %v904_v10 }
 0x43d   :  { %v679_v13 = vpop.permute.xlu0 %678 }
 0x43e   :  { %v692_v14 = vmul.f32 %v6805_v46, %v679_v13  ;;  %928 = vrot.lane.b32.xlu1 %v917_v12, %s6488_s18 }
 0x43f   :  { %v906_v15 = vpop.permute.xlu1 %905 }
 0x440   :  { %v918_v16 = vmul.f32 %v6809_v5, %v906_v15  ;;  %703 = vrot.lane.b32.xlu0 %v692_v14, %s6488_s18 }
 0x441   :  { %v681_v17 = vpop.permute.xlu0 %680 }
 0x442   :  { %v693_v3 = vmul.f32 %v6813_v50, %v681_v17  ;;  %930 = vrot.lane.b32.xlu1 %v918_v16, %s6488_s18 }
 0x443   :  { %v908_v18 = vpop.permute.xlu1 %907 }
 0x444   :  { %v919_v19 = vmul.f32 %v6817_v53, %v908_v18  ;;  %705 = vrot.lane.b32.xlu0 %v693_v3, %s6488_s18 }
 0x445   :  { %v683_v20 = vpop.permute.xlu0 %682 }
 0x446   :  { %v694_v21 = vmul.f32 %v6821_v56, %v683_v20  ;;  %932 = vrot.lane.b32.xlu1 %v919_v19, %s6488_s18 }
 0x447   :  { %v910_v22 = vpop.permute.xlu1 %909 }
 0x448   :  { %v920_v23 = vmul.f32 %v6825_v59, %v910_v22  ;;  %707 = vrot.lane.b32.xlu0 %v694_v21, %s6488_s18 }
 0x449   :  { %v685_v25 = vpop.permute.xlu0 %684 }
 0x44a   :  { %v695_v26 = vmul.f32 %v6829_v61, %v685_v25  ;;  %934 = vrot.lane.b32.xlu1 %v920_v23, %s6488_s18 }
 0x44c   :  { %709 = vrot.lane.b32.xlu0 %v695_v26, %s6488_s18 }
 0x4ab   :  { %v927_v30 = vpop.permute.xlu1 %926 }
 0x4ac   :  { %v6857_v31 = vadd.f32 %v927_v30, %v891_v28 }
 0x4ad   :  { %v702_v35 = vpop.permute.xlu0 %701 }
 0x4ae   :  { %6054 = vtanh.f32 %v6857_v31  ;;  %v6861_v36 = vadd.f32 %v702_v35, %v666_v34 }
 0x4b0   :  { %6056 = vtanh.f32 %v6861_v36  ;;  %v929_v44 = vpop.permute.xlu1 %928 }
 0x4b1   :  { %v6866_v47 = vadd.f32 %v929_v44, %v892_v40 }
 0x4b2   :  { %v704_v48 = vpop.permute.xlu0 %703 }
 0x4b3   :  { %6058 = vtanh.f32 %v6866_v47  ;;  %v6870_v6 = vadd.f32 %v704_v48, %v667_v27 }
 0x4b4   :  { %v931_v51 = vpop.permute.xlu1 %930 }
 0x4b5   :  { %6060 = vtanh.f32 %v6870_v6  ;;  %v6875_v52 = vadd.f32 %v931_v51, %v893_v49 }
 0x4b6   :  { %v706_v54 = vpop.permute.xlu0 %705 }
 0x4b7   :  { %6062 = vtanh.f32 %v6875_v52  ;;  %v6879_v55 = vadd.f32 %v706_v54, %v668_v33 }
 0x4b8   :  { %v933_v58 = vpop.permute.xlu1 %932 }
 0x4b9   :  { %6064 = vtanh.f32 %v6879_v55  ;;  %v6884_v60 = vadd.f32 %v933_v58, %v894_v57 }
 0x4ba   :  { %v708_v62 = vpop.permute.xlu0 %707 }
 0x4bb   :  { %v6055_v1 = vpop.eup %6054  ;;  %6066 = vtanh.f32 %v6884_v60  ;;  %v6888_v4 = vadd.f32 %v708_v62, %v669_v32 }
 0x4bc   :  { %v935_v0 = vpop.permute.xlu1 %934  ;;  %956 = vrot.lane.b32.xlu1 %v6055_v1, %s6489_s25 }
 0x4bd   :  { %v6057_v39 = vpop.eup %6056  ;;  %6068 = vtanh.f32 %v6888_v4  ;;  %v6894_v8 = vadd.f32 %v935_v0, %v895_v7 }
 0x4be   :  { %v710_v9 = vpop.permute.xlu0 %709  ;;  %731 = vrot.lane.b32.xlu0 %v6057_v39, %s6489_s25 }
 0x4bf   :  { %6070 = vtanh.f32 %v6894_v8  ;;  %v6899_v10 = vadd.f32 %v710_v9, %v670_v63 }
 0x4c0   :  { %v6059_v12 = vpop.eup %6058 }
 0x4c1   :  { %6072 = vtanh.f32 %v6899_v10  ;;  %958 = vrot.lane.b32.xlu1 %v6059_v12, %s6489_s25 }
 0x4c2   :  { %v6061_v38 = vpop.eup %6060 }
 0x4c3   :  { %733 = vrot.lane.b32.xlu0 %v6061_v38, %s6489_s25 }
 0x4c4   :  { %v6063_v13 = vpop.eup %6062 }
 0x4c5   :  { %960 = vrot.lane.b32.xlu1 %v6063_v13, %s6489_s25 }
 0x4c6   :  { %v6065_v14 = vpop.eup %6064 }
 0x4c7   :  { %735 = vrot.lane.b32.xlu0 %v6065_v14, %s6489_s25 }
 0x4c8   :  { %v6067_v15 = vpop.eup %6066 }
 0x4c9   :  { %962 = vrot.lane.b32.xlu1 %v6067_v15, %s6489_s25 }
 0x4ca   :  { %v6069_v16 = vpop.eup %6068 }
 0x4cb   :  { %737 = vrot.lane.b32.xlu0 %v6069_v16, %s6489_s25 }
 0x4cc   :  { %v6071_v17 = vpop.eup %6070 }
 0x4cd   :  { %964 = vrot.lane.b32.xlu1 %v6071_v17, %s6489_s25 }
 0x4ce   :  { %v6073_v3 = vpop.eup %6072 }
 0x4cf   :  { %739 = vrot.lane.b32.xlu0 %v6073_v3, %s6489_s25 }
 0x52e   :  { %v957_v18 = vpop.permute.xlu1 %956 }
 0x52f   :  { %v971_v19 = vmul.f32 %v6795_v24, %v957_v18 }
 0x530   :  { %v732_v20 = vpop.permute.xlu0 %731 }
 0x531   :  { %v746_v21 = vmul.f32 %v6798_v29, %v732_v20  ;;  %1096 = vrot.lane.b32.xlu1 %v971_v19, %s6490_s28 }
 0x533   :  { %v959_v22 = vpop.permute.xlu1 %958  ;;  %981 = vrot.lane.b32.xlu0 %v746_v21, %s6490_s28 }
 0x534   :  { %v972_v23 = vmul.f32 %v6801_v37, %v959_v22 }
 0x535   :  { %v734_v25 = vpop.permute.xlu0 %733 }
 0x536   :  { %v747_v26 = vmul.f32 %v6805_v46, %v734_v25  ;;  %1098 = vrot.lane.b32.xlu1 %v972_v23, %s6490_s28 }
 0x537   :  { %v961_v28 = vpop.permute.xlu1 %960 }
 0x538   :  { %v973_v30 = vmul.f32 %v6809_v5, %v961_v28  ;;  %983 = vrot.lane.b32.xlu0 %v747_v26, %s6490_s28 }
 0x539   :  { %v736_v24 = vpop.permute.xlu0 %735 }
 0x53a   :  { %v748_v29 = vmul.f32 %v6813_v50, %v736_v24  ;;  %1100 = vrot.lane.b32.xlu1 %v973_v30, %s6490_s28 }
 0x53b   :  { %v963_v34 = vpop.permute.xlu1 %962 }
 0x53c   :  { %v974_v35 = vmul.f32 %v6817_v53, %v963_v34  ;;  %985 = vrot.lane.b32.xlu0 %v748_v29, %s6490_s28 }
 0x53d   :  { %v738_v37 = vpop.permute.xlu0 %737 }
 0x53e   :  { %v749_v46 = vmul.f32 %v6821_v56, %v738_v37  ;;  %1102 = vrot.lane.b32.xlu1 %v974_v35, %s6490_s28  ;;  %v6939_v56 = vld [vmem:[%s8370_s2 + $0x8] sm:$0xff] }
 0x53f   :  { %v965_v40 = vpop.permute.xlu1 %964 }
 0x540   :  { %v975_v5 = vmul.f32 %v6825_v59, %v965_v40  ;;  %987 = vrot.lane.b32.xlu0 %v749_v46, %s6490_s28  ;;  %v1336_v40 = vld [vmem:[#allocation2 + $0x2] sm:$0xff] }
 0x541   :  { %v740_v44 = vpop.permute.xlu0 %739 }
 0x542   :  { %v750_v50 = vmul.f32 %v6829_v61, %v740_v44  ;;  %1104 = vrot.lane.b32.xlu1 %v975_v5, %s6490_s28 }
 0x544   :  { %989 = vrot.lane.b32.xlu0 %v750_v50, %s6490_s28 }
 0x5a3   :  { %v1097_v53 = vpop.permute.xlu1 %1096 }
 0x5a4   :  { %5603 = vmatmul.mubr.msk.f32.vlgmr.msra.gmra.mxu0 %vm186_vm3, %v1097_v53 }
 0x5a5   :  { %v982_v27 = vpop.permute.xlu0 %981  ;;  %5605 = vmatprep.mubr.msk.f32.mxu0 %vm6486_vm1, %v6485_v2  ;;  %5637 = vmatpush3.msra.mxu0 %v6679_v41  ;;  %v6950_v41 = vld [vmem:[%s8370_s2] sm:$0xff] }
 0x5a6   :  { %5584 = vmatmul.mubr.msk.f32.vlgmr.msra.gmra.mxu1 %vm186_vm3, %v982_v27  ;;  %5638 = vmatprep.subr.mxu0 %v6485_v2 }
 0x5a7   :  { %5618 = vmatpush3.msra.mxu1 %v6939_v56  ;;  %5586 = vmatprep.mubr.msk.f32.mxu1 %vm6486_vm1, %v6485_v2 }
 0x5a8   :  { %v1099_v59 = vpop.permute.xlu1 %1098  ;;  %5619 = vmatprep.subr.mxu1 %v6485_v2  ;;  %5639 = vmatpush3.msra.mxu0 %v6684_v42 }
 0x5a9   :  { %5606 = vmatmul.mubr.msk.f32.gmra.mxu0 %vm186_vm3, %v1099_v59  ;;  %5620 = vmatpush3.msra.mxu1 %v6950_v41 }
 0x5aa   :  { %v984_v61 = vpop.permute.xlu0 %983  ;;  %5608 = vmatprep.mubr.msk.f32.mxu0 %vm6486_vm1, %v6485_v2  ;;  %5655 = vmatprep.subr.mxu1 %v6485_v2 }
 0x5ab   :  { %5587 = vmatmul.mubr.msk.f32.gmra.mxu1 %vm186_vm3, %v984_v61  ;;  %5674 = vmatprep.subr.mxu0 %v6485_v2  ;;  %v1337_v61 = vld [vmem:[#allocation2 + $0xa] sm:$0xff] }
 0x5ac   :  { %v1101_v42 = vpop.permute.xlu1 %1100  ;;  %5589 = vmatprep.mubr.msk.f32.mxu1 %vm6486_vm1, %v6485_v2 }
 0x5ad   :  { %5609 = vmatmul.mubr.msk.f32.gmra.mxu0 %vm186_vm3, %v1101_v42 }
 0x5ae   :  { %v986_v48 = vpop.permute.xlu0 %985  ;;  %5611 = vmatprep.mubr.msk.f32.mxu0 %vm6486_vm1, %v6485_v2 }
 0x5af   :  { %5590 = vmatmul.mubr.msk.f32.gmra.mxu1 %vm186_vm3, %v986_v48 }
 0x5b0   :  { %v1103_v49 = vpop.permute.xlu1 %1102  ;;  %5592 = vmatprep.mubr.msk.f32.mxu1 %vm6486_vm1, %v6485_v2 }
 0x5b1   :  { %5612 = vmatmul.mubr.msk.f32.gmra.mxu0 %vm186_vm3, %v1103_v49 }
 0x5b2   :  { %v988_v51 = vpop.permute.xlu0 %987  ;;  %5614 = vmatprep.mubr.msk.f32.mxu0 %vm6486_vm1, %v6485_v2 }
 0x5b3   :  { %5593 = vmatmul.mubr.msk.f32.gmra.mxu1 %vm186_vm3, %v988_v51 }
 0x5b4   :  { %v1105_v33 = vpop.permute.xlu1 %1104  ;;  %5595 = vmatprep.mubr.msk.f32.mxu1 %vm6486_vm1, %v6485_v2 }
 0x5b5   :  { %5615 = vmatmul.mubr.msk.f32.gmra.mxu0 %vm186_vm3, %v1105_v33 }
 0x5b6   :  { %v990_v54 = vpop.permute.xlu0 %989  ;;  %5640 = vmatprep.mubr.msk.f32.mxu0 %vm6486_vm1, %v6485_v2 }
 0x5b7   :  { %5596 = vmatmul.mubr.msk.f32.gmra.mxu1 %vm186_vm3, %v990_v54 }
 0x5b8   :  { %5621 = vmatprep.mubr.msk.f32.mxu1 %vm6486_vm1, %v6485_v2 }
 0x5bb   :  { %5622 = vmatmul.mubr.msk.f32.vlgmr.msra.gmra.mxu1 %vm186_vm3, %v1097_v53 }
 0x5bc   :  { %5624 = vmatprep.mubr.msk.f32.mxu1 %vm6486_vm1, %v6485_v2  ;;  %5656 = vmatpush3.msra.mxu1 %v6689_v43 }
 0x5bd   :  { %5657 = vmatprep.subr.mxu1 %v6485_v2 }
 0x5be   :  { %5658 = vmatpush3.msra.mxu1 %v6702_v45 }
 0x5bf   :  { %5625 = vmatmul.mubr.msk.f32.gmra.mxu1 %vm186_vm3, %v1099_v59  ;;  %5693 = vmatprep.subr.mxu1 %v6485_v2 }
 0x5c0   :  { %5627 = vmatprep.mubr.msk.f32.mxu1 %vm6486_vm1, %v6485_v2 }
 0x5c3   :  { %5628 = vmatmul.mubr.msk.f32.gmra.mxu1 %vm186_vm3, %v1101_v42 }
 0x5c4   :  { %5630 = vmatprep.mubr.msk.f32.mxu1 %vm6486_vm1, %v6485_v2 }
 0x5c7   :  { %5631 = vmatmul.mubr.msk.f32.gmra.mxu1 %vm186_vm3, %v1103_v49 }
 0x5c8   :  { %5633 = vmatprep.mubr.msk.f32.mxu1 %vm6486_vm1, %v6485_v2 }
 0x5cb   :  { %5634 = vmatmul.mubr.msk.f32.gmra.mxu1 %vm186_vm3, %v1105_v33 }
 0x5cc   :  { %5659 = vmatprep.mubr.msk.f32.mxu1 %vm6486_vm1, %v6485_v2 }
 0x664   :  { %v1182_v43 = vpop.f32.mrf.mxu0 }
 0x666   :  { %v1067_v45 = vpop.f32.mrf.mxu1  ;;  %v5604_v57 = vpop.f32.mrf.mxu0 }
 0x667   :  { %v1183_v58 = vadd.f32 %v1182_v43, %v1067_v45 }
 0x668   :  { %v5585_v32 = vpop.f32.mrf.mxu1 }
 0x669   :  { %v1206_v62 = vadd.f32 %v6785_v11, %v1183_v58  ;;  %v1187_v1 = vpop.f32.mrf.mxu0 }
 0x66b   :  { %v5075_v7 = vmul.f32 -1.442695, %v1206_v62  ;;  %v1072_v0 = vpop.f32.mrf.mxu1  ;;  %v5607_v39 = vpop.f32.mrf.mxu0 }
 0x66c   :  { %v1188_v63 = vadd.f32 %v1187_v1, %v1072_v0  ;;  %v1339_v1 = vld [vmem:[#allocation2 + $0x1a] sm:$0xff] }
 0x66d   :  { %6074 = vpow2.f32 %v5075_v7  ;;  %v5588_v9 = vpop.f32.mrf.mxu1  ;;  %v1192_v12 = vpop.f32.mrf.mxu0 }
 0x66e   :  { %v1207_v38 = vadd.f32 %v6785_v11, %v1188_v63 }
 0x66f   :  { %v1077_v13 = vpop.f32.mrf.mxu1  ;;  %v5610_v14 = vpop.f32.mrf.mxu0 }
 0x670   :  { %v5076_v15 = vmul.f32 -1.442695, %v1207_v38  ;;  %v1193_v16 = vadd.f32 %v1192_v12, %v1077_v13  ;;  %v1340_v13 = vld [vmem:[#allocation2 + $0x22] sm:$0xff] }
 0x671   :  { %v5591_v17 = vpop.f32.mrf.mxu1  ;;  %v1197_v3 = vpop.f32.mrf.mxu0 }
 0x672   :  { %6076 = vpow2.f32 %v5076_v15  ;;  %v1208_v18 = vadd.f32 %v6785_v11, %v1193_v16 }
 0x673   :  { %v1082_v19 = vpop.f32.mrf.mxu1  ;;  %v5613_v20 = vpop.f32.mrf.mxu0 }
 0x674   :  { %v5077_v21 = vmul.f32 -1.442695, %v1208_v18  ;;  %v1198_v22 = vadd.f32 %v1197_v3, %v1082_v19 }
 0x675   :  { %v5594_v23 = vpop.f32.mrf.mxu1  ;;  %v1202_v25 = vpop.f32.mrf.mxu0 }
 0x676   :  { %6078 = vpow2.f32 %v5077_v21  ;;  %v1209_v26 = vadd.f32 %v6785_v11, %v1198_v22 }
 0x677   :  { %v1087_v28 = vpop.f32.mrf.mxu1  ;;  %v5616_v30 = vpop.f32.mrf.mxu0 }
 0x678   :  { %v5078_v24 = vmul.f32 -1.442695, %v1209_v26  ;;  %v1203_v29 = vadd.f32 %v1202_v25, %v1087_v28 }
 0x679   :  { %v5597_v34 = vpop.f32.mrf.mxu1 }
 0x67a   :  { %v6075_v35 = vpop.eup %6074  ;;  %6080 = vpow2.f32 %v5078_v24  ;;  %v1210_v37 = vadd.f32 %v6785_v11, %v1203_v29  ;;  %v1338_v11 = vld [vmem:[#allocation2 + $0x12] sm:$0xff] }
 0x67b   :  { %v1226_v46 = vadd.f32 1.0, %v6075_v35  ;;  %v1407_v5 = vpop.f32.mrf.mxu1 }
 0x67c   :  { %v5079_v44 = vmul.f32 -1.442695, %v1210_v37  ;;  %v1431_v50 = vadd.f32 %v1407_v5, %v1336_v40 }
 0x67d   :  { %6082 = vrcp.f32 %v1226_v46  ;;  %v5623_v53 = vpop.f32.mrf.mxu1 }
 0x67e   :  { %6084 = vpow2.f32 %v5079_v44  ;;  %v5090_v27 = vmul.f32 -1.442695, %v1431_v50 }
 0x67f   :  { %v6077_v59 = vpop.eup %6076  ;;  %v1412_v42 = vpop.f32.mrf.mxu1 }
 0x680   :  { %v1227_v48 = vadd.f32 1.0, %v6077_v59  ;;  %6086 = vpow2.f32 %v5090_v27  ;;  %v1432_v49 = vadd.f32 %v1412_v42, %v1337_v61 }
 0x681   :  { %v5626_v51 = vpop.f32.mrf.mxu1 }
 0x682   :  { %6088 = vrcp.f32 %v1227_v48  ;;  %v5091_v33 = vmul.f32 -1.442695, %v1432_v49 }
 0x683   :  { %v6079_v54 = vpop.eup %6078  ;;  %v1417_v43 = vpop.f32.mrf.mxu1 }
 0x684   :  { %v1228_v45 = vadd.f32 1.0, %v6079_v54  ;;  %6090 = vpow2.f32 %v5091_v33  ;;  %v1433_v57 = vadd.f32 %v1417_v43, %v1338_v11 }
 0x685   :  { %v5629_v58 = vpop.f32.mrf.mxu1 }
 0x686   :  { %6092 = vrcp.f32 %v1228_v45  ;;  %v5092_v32 = vmul.f32 -1.442695, %v1433_v57 }
 0x687   :  { %v6081_v62 = vpop.eup %6080  ;;  %v1422_v7 = vpop.f32.mrf.mxu1 }
 0x688   :  { %v1229_v0 = vadd.f32 1.0, %v6081_v62  ;;  %6094 = vpow2.f32 %v5092_v32  ;;  %v1434_v39 = vadd.f32 %v1422_v7, %v1339_v1 }
 0x689   :  { %v5632_v63 = vpop.f32.mrf.mxu1 }
 0x68a   :  { %v7002_v9 = vpop.eup %6082  ;;  %6096 = vrcp.f32 %v1229_v0  ;;  %v5093_v12 = vmul.f32 -1.442695, %v1434_v39 }
 0x68b   :  { %v6085_v38 = vpop.eup %6084  ;;  %v1427_v14 = vpop.f32.mrf.mxu1  ;;  %v1241_v15 = vmul.f32 2.0, %v7002_v9 }
 0x68c   :  { %v1230_v16 = vadd.f32 1.0, %v6085_v38  ;;  %6098 = vpow2.f32 %v5093_v12  ;;  %v1435_v17 = vadd.f32 %v1427_v14, %v1340_v13 }
 0x68d   :  { %v6087_v3 = vpop.eup %6086  ;;  %v5635_v18 = vpop.f32.mrf.mxu1  ;;  %v5080_v19 = vadd.f32 -1.0, %v1241_v15 }
 0x68e   :  { %6100 = vrcp.f32 %v1230_v16  ;;  %v1451_v20 = vadd.f32 1.0, %v6087_v3  ;;  %v5094_v21 = vmul.f32 -1.442695, %v1435_v17 }
 0x68f   :  { %v7005_v22 = vpop.eup %6088  ;;  %1261 = vrot.lane.b32.xlu0 %v5080_v19, %s6487_s3 }
 0x690   :  { %6102 = vrcp.f32 %v1451_v20  ;;  %v1242_v23 = vmul.f32 2.0, %v7005_v22 }
 0x691   :  { %v6091_v25 = vpop.eup %6090  ;;  %6104 = vpow2.f32 %v5094_v21 }
 0x692   :  { %v1452_v26 = vadd.f32 1.0, %v6091_v25  ;;  %v5081_v28 = vadd.f32 -1.0, %v1242_v23 }
 0x693   :  { %v7009_v30 = vpop.eup %6092 }
 0x694   :  { %6106 = vrcp.f32 %v1452_v26  ;;  %1263 = vrot.lane.b32.xlu1 %v5081_v28, %s6487_s3  ;;  %v1243_v24 = vmul.f32 2.0, %v7009_v30 }
 0x695   :  { %v6095_v29 = vpop.eup %6094 }
 0x696   :  { %v1453_v34 = vadd.f32 1.0, %v6095_v29  ;;  %v5082_v35 = vadd.f32 -1.0, %v1243_v24  ;;  %v1251_v29 = vmul.f32 %v7002_v9, %v6861_v36 }
 0x697   :  { %v7013_v37 = vpop.eup %6096 }
 0x698   :  { %6108 = vrcp.f32 %v1453_v34  ;;  %1265 = vrot.lane.b32.xlu0 %v5082_v35, %s6487_s3  ;;  %v1244_v46 = vmul.f32 2.0, %v7013_v37  ;;  %v1254_v36 = vmul.f32 %v7013_v37, %v6888_v4 }
 0x699   :  { %v6099_v40 = vpop.eup %6098 }
 0x69a   :  { %v1454_v5 = vadd.f32 1.0, %v6099_v40  ;;  %v5083_v44 = vadd.f32 -1.0, %v1244_v46  ;;  %v1252_v46 = vmul.f32 %v7005_v22, %v6870_v6 }
 0x69b   :  { %v7017_v50 = vpop.eup %6100 }
 0x69c   :  { %6110 = vrcp.f32 %v1454_v5  ;;  %1267 = vrot.lane.b32.xlu1 %v5083_v44, %s6487_s3  ;;  %v1245_v53 = vmul.f32 2.0, %v7017_v50  ;;  %v1253_v44 = vmul.f32 %v7009_v30, %v6879_v55 }
 0x69d   :  { %v7021_v27 = vpop.eup %6102 }
 0x69e   :  { %v6105_v59 = vpop.eup %6104  ;;  %v5084_v61 = vadd.f32 -1.0, %v1245_v53  ;;  %v1466_v42 = vmul.f32 2.0, %v7021_v27 }
 0x69f   :  { %v1455_v48 = vadd.f32 1.0, %v6105_v59 }
 0x6a0   :  { %1269 = vrot.lane.b32.xlu0 %v5084_v61, %s6487_s3  ;;  %v5095_v49 = vadd.f32 -1.0, %v1466_v42 }
 0x6a1   :  { %v7025_v51 = vpop.eup %6106  ;;  %6112 = vrcp.f32 %v1455_v48  ;;  %v1255_v48 = vmul.f32 %v7017_v50, %v6899_v10 }
 0x6a2   :  { %1486 = vrot.lane.b32.xlu1 %v5095_v49, %s6487_s3  ;;  %v1467_v33 = vmul.f32 2.0, %v7025_v51  ;;  %v1477_v10 = vmul.f32 %v7025_v51, %v6866_v47 }
 0x6a4   :  { %v5096_v54 = vadd.f32 -1.0, %v1467_v33  ;;  %v1476_v33 = vmul.f32 %v7021_v27, %v6857_v31 }
 0x6a5   :  { %v7029_v11 = vpop.eup %6108 }
 0x6a6   :  { %1488 = vrot.lane.b32.xlu0 %v5096_v54, %s6487_s3  ;;  %v1468_v43 = vmul.f32 2.0, %v7029_v11  ;;  %v1478_v31 = vmul.f32 %v7029_v11, %v6875_v52 }
 0x6a8   :  { %v5097_v45 = vadd.f32 -1.0, %v1468_v43 }
 0x6a9   :  { %v7033_v57 = vpop.eup %6110 }
 0x6aa   :  { %1490 = vrot.lane.b32.xlu1 %v5097_v45, %s6487_s3  ;;  %v1469_v58 = vmul.f32 2.0, %v7033_v57  ;;  %v1479_v47 = vmul.f32 %v7033_v57, %v6884_v60 }
 0x6ac   :  { %v5098_v32 = vadd.f32 -1.0, %v1469_v58 }
 0x6ae   :  { %v7037_v62 = vpop.eup %6112  ;;  %1492 = vrot.lane.b32.xlu0 %v5098_v32, %s6487_s3 }
 0x6af   :  { %v1470_v1 = vmul.f32 2.0, %v7037_v62 }
 0x6b1   :  { %v5099_v7 = vadd.f32 -1.0, %v1470_v1 }
 0x6b3   :  { %1494 = vrot.lane.b32.xlu1 %v5099_v7, %s6487_s3 }
 0x701   :  { %v1262_v0 = vpop.permute.xlu0 %1261 }
 0x702   :  { %v1276_v39 = vmul.f32 %v7002_v9, %v1262_v0 }
 0x704   :  { %1286 = vrot.lane.b32.xlu0 %v1276_v39, %s6488_s18 }
 0x706   :  { %v1264_v63 = vpop.permute.xlu1 %1263 }
 0x707   :  { %v1277_v12 = vmul.f32 %v7005_v22, %v1264_v63 }
 0x709   :  { %1288 = vrot.lane.b32.xlu1 %v1277_v12, %s6488_s18 }
 0x70a   :  { %v1266_v38 = vpop.permute.xlu0 %1265 }
 0x70b   :  { %v1278_v13 = vmul.f32 %v7009_v30, %v1266_v38  ;;  %v1480_v38 = vmul.f32 %v7037_v62, %v6894_v8 }
 0x70d   :  { %1290 = vrot.lane.b32.xlu0 %v1278_v13, %s6488_s18 }
 0x70e   :  { %v1268_v14 = vpop.permute.xlu1 %1267 }
 0x70f   :  { %v1279_v15 = vmul.f32 %v7013_v37, %v1268_v14 }
 0x711   :  { %1292 = vrot.lane.b32.xlu1 %v1279_v15, %s6488_s18 }
 0x712   :  { %v1270_v16 = vpop.permute.xlu0 %1269 }
 0x713   :  { %v1280_v17 = vmul.f32 %v7017_v50, %v1270_v16 }
 0x714   :  { %v1487_v3 = vpop.permute.xlu1 %1486 }
 0x715   :  { %v1501_v18 = vmul.f32 %v7021_v27, %v1487_v3  ;;  %1294 = vrot.lane.b32.xlu0 %v1280_v17, %s6488_s18 }
 0x717   :  { %1511 = vrot.lane.b32.xlu1 %v1501_v18, %s6488_s18 }
 0x718   :  { %v1489_v19 = vpop.permute.xlu0 %1488 }
 0x719   :  { %v1502_v20 = vmul.f32 %v7025_v51, %v1489_v19 }
 0x71b   :  { %1513 = vrot.lane.b32.xlu0 %v1502_v20, %s6488_s18 }
 0x71c   :  { %v1491_v21 = vpop.permute.xlu1 %1490 }
 0x71d   :  { %v1503_v23 = vmul.f32 %v7029_v11, %v1491_v21 }
 0x71f   :  { %1515 = vrot.lane.b32.xlu1 %v1503_v23, %s6488_s18 }
 0x720   :  { %v1493_v25 = vpop.permute.xlu0 %1492 }
 0x721   :  { %v1504_v26 = vmul.f32 %v7033_v57, %v1493_v25 }
 0x723   :  { %1517 = vrot.lane.b32.xlu0 %v1504_v26, %s6488_s18 }
 0x725   :  { %v1495_v28 = vpop.permute.xlu1 %1494 }
 0x726   :  { %v1505_v24 = vmul.f32 %v7037_v62, %v1495_v28 }
 0x728   :  { %1519 = vrot.lane.b32.xlu1 %v1505_v24, %s6488_s18 }
 0x776   :  { %v1287_v34 = vpop.permute.xlu0 %1286 }
 0x777   :  { %v7064_v35 = vadd.f32 %v1287_v34, %v1251_v29 }
 0x779   :  { %6114 = vtanh.f32 %v7064_v35 }
 0x77b   :  { %v1289_v40 = vpop.permute.xlu1 %1288 }
 0x77c   :  { %v7069_v5 = vadd.f32 %v1289_v40, %v1252_v46 }
 0x77e   :  { %6116 = vtanh.f32 %v7069_v5 }
 0x77f   :  { %v1291_v53 = vpop.permute.xlu0 %1290 }
 0x780   :  { %v7074_v59 = vadd.f32 %v1291_v53, %v1253_v44  ;;  %v7177_v53 = vld [vmem:[%s8373_s4 + $0x8] sm:$0xff] }
 0x782   :  { %6118 = vtanh.f32 %v7074_v59 }
 0x783   :  { %v1293_v61 = vpop.permute.xlu1 %1292 }
 0x784   :  { %v7079_v42 = vadd.f32 %v1293_v61, %v1254_v36  ;;  %v7187_v36 = vld [vmem:[%s8372_s5] sm:$0xff] }
 0x786   :  { %v6115_v6 = vpop.eup %6114  ;;  %6120 = vtanh.f32 %v7079_v42 }
 0x787   :  { %v1295_v49 = vpop.permute.xlu0 %1294  ;;  %1316 = vrot.lane.b32.xlu0 %v6115_v6, %s6489_s25  ;;  %v7197_v6 = vld [vmem:[%s8373_s4] sm:$0xff] }
 0x788   :  { %v7085_v55 = vadd.f32 %v1295_v49, %v1255_v48 }
 0x789   :  { %v1512_v54 = vpop.permute.xlu1 %1511 }
 0x78a   :  { %6122 = vtanh.f32 %v7085_v55  ;;  %v7090_v4 = vadd.f32 %v1512_v54, %v1476_v33 }
 0x78b   :  { %v6117_v43 = vpop.eup %6116 }
 0x78c   :  { %6124 = vtanh.f32 %v7090_v4  ;;  %1318 = vrot.lane.b32.xlu1 %v6117_v43, %s6489_s25 }
 0x78d   :  { %v1514_v45 = vpop.permute.xlu0 %1513 }
 0x78e   :  { %v7096_v58 = vadd.f32 %v1514_v45, %v1477_v10 }
 0x78f   :  { %v6119_v32 = vpop.eup %6118 }
 0x790   :  { %6126 = vtanh.f32 %v7096_v58  ;;  %1320 = vrot.lane.b32.xlu0 %v6119_v32, %s6489_s25 }
 0x791   :  { %v1516_v1 = vpop.permute.xlu1 %1515 }
 0x792   :  { %v7102_v7 = vadd.f32 %v1516_v1, %v1478_v31 }
 0x793   :  { %v6121_v0 = vpop.eup %6120 }
 0x794   :  { %6128 = vtanh.f32 %v7102_v7  ;;  %1322 = vrot.lane.b32.xlu1 %v6121_v0, %s6489_s25 }
 0x795   :  { %v1518_v39 = vpop.permute.xlu0 %1517 }
 0x796   :  { %v7108_v63 = vadd.f32 %v1518_v39, %v1479_v47 }
 0x797   :  { %v6123_v12 = vpop.eup %6122 }
 0x798   :  { %6130 = vtanh.f32 %v7108_v63  ;;  %1324 = vrot.lane.b32.xlu0 %v6123_v12, %s6489_s25 }
 0x799   :  { %v6125_v52 = vpop.eup %6124 }
 0x79a   :  { %v1520_v13 = vpop.permute.xlu1 %1519  ;;  %1541 = vrot.lane.b32.xlu1 %v6125_v52, %s6489_s25 }
 0x79b   :  { %v7115_v14 = vadd.f32 %v1520_v13, %v1480_v38  ;;  %v1921_v38 = vld [vmem:[#allocation2 + $0x3] sm:$0xff] }
 0x79d   :  { %v6127_v15 = vpop.eup %6126  ;;  %6132 = vtanh.f32 %v7115_v14 }
 0x79e   :  { %1543 = vrot.lane.b32.xlu0 %v6127_v15, %s6489_s25  ;;  %v7222_v15 = vld [vmem:[%s8374_s6] ss:$0 sm:$0xff] }
 0x7a1   :  { %v6129_v60 = vpop.eup %6128 }
 0x7a2   :  { %1545 = vrot.lane.b32.xlu1 %v6129_v60, %s6489_s25 }
 0x7a5   :  { %v6131_v16 = vpop.eup %6130 }
 0x7a6   :  { %1547 = vrot.lane.b32.xlu0 %v6131_v16, %s6489_s25 }
 0x7aa   :  { %v6133_v17 = vpop.eup %6132 }
 0x7ab   :  { %1549 = vrot.lane.b32.xlu1 %v6133_v17, %s6489_s25 }
 0x7f9   :  { %v1317_v8 = vpop.permute.xlu0 %1316 }
 0x7fa   :  { %v1331_v3 = vmul.f32 %v7002_v9, %v1317_v8 }
 0x7fc   :  { %1566 = vrot.lane.b32.xlu0 %v1331_v3, %s6490_s28 }
 0x7fe   :  { %v1319_v18 = vpop.permute.xlu1 %1318 }
 0x7ff   :  { %v1332_v19 = vmul.f32 %v7005_v22, %v1319_v18 }
 0x801   :  { %1568 = vrot.lane.b32.xlu1 %v1332_v19, %s6490_s28 }
 0x802   :  { %v1321_v20 = vpop.permute.xlu0 %1320 }
 0x803   :  { %v1333_v21 = vmul.f32 %v7009_v30, %v1321_v20 }
 0x805   :  { %1570 = vrot.lane.b32.xlu0 %v1333_v21, %s6490_s28  ;;  %v1922_v21 = vld [vmem:[#allocation2 + $0xb] sm:$0xff] }
 0x806   :  { %v1323_v23 = vpop.permute.xlu1 %1322 }
 0x807   :  { %v1334_v25 = vmul.f32 %v7013_v37, %v1323_v23 }
 0x809   :  { %1572 = vrot.lane.b32.xlu1 %v1334_v25, %s6490_s28 }
 0x80a   :  { %v1325_v26 = vpop.permute.xlu0 %1324 }
 0x80b   :  { %v1335_v9 = vmul.f32 %v7017_v50, %v1325_v26 }
 0x80c   :  { %v1542_v28 = vpop.permute.xlu1 %1541 }
 0x80d   :  { %v1556_v24 = vmul.f32 %v7021_v27, %v1542_v28  ;;  %1574 = vrot.lane.b32.xlu0 %v1335_v9, %s6490_s28 }
 0x80f   :  { %1681 = vrot.lane.b32.xlu1 %v1556_v24, %s6490_s28 }
 0x810   :  { %v1544_v22 = vpop.permute.xlu0 %1543 }
 0x811   :  { %v1557_v30 = vmul.f32 %v7025_v51, %v1544_v22 }
 0x813   :  { %1683 = vrot.lane.b32.xlu0 %v1557_v30, %s6490_s28 }
 0x814   :  { %v1546_v29 = vpop.permute.xlu1 %1545 }
 0x815   :  { %v1558_v37 = vmul.f32 %v7029_v11, %v1546_v29 }
 0x817   :  { %1685 = vrot.lane.b32.xlu1 %v1558_v37, %s6490_s28  ;;  %v1923_v37 = vld [vmem:[#allocation2 + $0x13] sm:$0xff] }
 0x818   :  { %v1548_v34 = vpop.permute.xlu0 %1547 }
 0x819   :  { %v1559_v50 = vmul.f32 %v7033_v57, %v1548_v34 }
 0x81b   :  { %1687 = vrot.lane.b32.xlu0 %v1559_v50, %s6490_s28 }
 0x81d   :  { %v1550_v27 = vpop.permute.xlu1 %1549 }
 0x81e   :  { %v1560_v46 = vmul.f32 %v7037_v62, %v1550_v27  ;;  %v7167_v62 = vld [vmem:[%s8372_s5 + $0x8] sm:$0xff] }
 0x820   :  { %1689 = vrot.lane.b32.xlu1 %v1560_v46, %s6490_s28 }
 0x86e   :  { %v1567_v40 = vpop.permute.xlu0 %1566 }
 0x86f   :  { %5641 = vmatmul.mubr.msk.f32.vlgmr.msra.gmra.mxu0 %vm186_vm3, %v1567_v40 }
 0x870   :  { %5675 = vmatpush3.msra.mxu0 %v6939_v56  ;;  %5643 = vmatprep.mubr.msk.f32.mxu0 %vm6486_vm1, %v6485_v2 }
 0x871   :  { %5676 = vmatprep.subr.mxu0 %v6485_v2 }
 0x872   :  { %5677 = vmatpush3.msra.mxu0 %v6950_v41 }
 0x873   :  { %v1569_v51 = vpop.permute.xlu1 %1568  ;;  %5712 = vmatprep.subr.mxu0 %v6485_v2 }
 0x874   :  { %5644 = vmatmul.mubr.msk.f32.gmra.mxu0 %vm186_vm3, %v1569_v51 }
 0x875   :  { %5646 = vmatprep.mubr.msk.f32.mxu0 %vm6486_vm1, %v6485_v2 }
 0x877   :  { %v1571_v11 = vpop.permute.xlu0 %1570 }
 0x878   :  { %5647 = vmatmul.mubr.msk.f32.gmra.mxu0 %vm186_vm3, %v1571_v11 }
 0x879   :  { %5649 = vmatprep.mubr.msk.f32.mxu0 %vm6486_vm1, %v6485_v2 }
 0x87b   :  { %v1573_v56 = vpop.permute.xlu1 %1572 }
 0x87c   :  { %5650 = vmatmul.mubr.msk.f32.gmra.mxu0 %vm186_vm3, %v1573_v56 }
 0x87d   :  { %5652 = vmatprep.mubr.msk.f32.mxu0 %vm6486_vm1, %v6485_v2 }
 0x87f   :  { %v1575_v41 = vpop.permute.xlu0 %1574 }
 0x880   :  { %5653 = vmatmul.mubr.msk.f32.gmra.mxu0 %vm186_vm3, %v1575_v41 }
 0x881   :  { %v1682_v57 = vpop.permute.xlu1 %1681  ;;  %5678 = vmatprep.mubr.msk.f32.mxu0 %vm6486_vm1, %v6485_v2 }
 0x882   :  { %5660 = vmatmul.mubr.msk.f32.vlgmr.msra.gmra.mxu1 %vm186_vm3, %v1682_v57 }
 0x883   :  { %5662 = vmatprep.mubr.msk.f32.mxu1 %vm6486_vm1, %v6485_v2  ;;  %5694 = vmatpush3.msra.mxu1 %v7167_v62 }
 0x884   :  { %5679 = vmatmul.mubr.msk.f32.vlgmr.msra.gmra.mxu0 %vm186_vm3, %v1682_v57  ;;  %5695 = vmatprep.subr.mxu1 %v6485_v2  ;;  %v1924_v57 = vld [vmem:[#allocation2 + $0x1b] sm:$0xff] }
 0x885   :  { %v1684_v44 = vpop.permute.xlu0 %1683  ;;  %5681 = vmatprep.mubr.msk.f32.mxu0 %vm6486_vm1, %v6485_v2  ;;  %5713 = vmatpush3.msra.mxu0 %v7177_v53 }
 0x886   :  { %5663 = vmatmul.mubr.msk.f32.gmra.mxu1 %vm186_vm3, %v1684_v44  ;;  %5714 = vmatprep.subr.mxu0 %v6485_v2 }
 0x887   :  { %5665 = vmatprep.mubr.msk.f32.mxu1 %vm6486_vm1, %v6485_v2  ;;  %5696 = vmatpush3.msra.mxu1 %v7187_v36 }
 0x888   :  { %5682 = vmatmul.mubr.msk.f32.gmra.mxu0 %vm186_vm3, %v1684_v44  ;;  %5731 = vmatprep.subr.mxu1 %v6485_v2 }
 0x889   :  { %v1686_v61 = vpop.permute.xlu1 %1685  ;;  %5684 = vmatprep.mubr.msk.f32.mxu0 %vm6486_vm1, %v6485_v2  ;;  %5715 = vmatpush3.msra.mxu0 %v7197_v6 }
 0x88a   :  { %5666 = vmatmul.mubr.msk.f32.gmra.mxu1 %vm186_vm3, %v1686_v61  ;;  %5750 = vmatprep.subr.mxu0 %v6485_v2 }
 0x88b   :  { %5668 = vmatprep.mubr.msk.f32.mxu1 %vm6486_vm1, %v6485_v2 }
 0x88c   :  { %5685 = vmatmul.mubr.msk.f32.gmra.mxu0 %vm186_vm3, %v1686_v61 }
 0x88d   :  { %v1688_v48 = vpop.permute.xlu0 %1687  ;;  %5687 = vmatprep.mubr.msk.f32.mxu0 %vm6486_vm1, %v6485_v2 }
 0x88e   :  { %5669 = vmatmul.mubr.msk.f32.gmra.mxu1 %vm186_vm3, %v1688_v48 }
 0x88f   :  { %5671 = vmatprep.mubr.msk.f32.mxu1 %vm6486_vm1, %v6485_v2 }
 0x890   :  { %5688 = vmatmul.mubr.msk.f32.gmra.mxu0 %vm186_vm3, %v1688_v48 }
 0x891   :  { %5690 = vmatprep.mubr.msk.f32.mxu0 %vm6486_vm1, %v6485_v2 }
 0x892   :  { %v1690_v49 = vpop.permute.xlu1 %1689 }
 0x893   :  { %5672 = vmatmul.mubr.msk.f32.gmra.mxu1 %vm186_vm3, %v1690_v49 }
 0x894   :  { %5691 = vmatmul.mubr.msk.f32.gmra.mxu0 %vm186_vm3, %v1690_v49  ;;  %5697 = vmatprep.mubr.msk.f32.mxu1 %vm6486_vm1, %v6485_v2 }
 0x895   :  { %5716 = vmatprep.mubr.msk.f32.mxu0 %vm6486_vm1, %v6485_v2 }
 0x92f   :  { %v1652_v33 = vpop.f32.mrf.mxu0 }
 0x931   :  { %v5642_v54 = vpop.f32.mrf.mxu0 }
 0x934   :  { %v1657_v43 = vpop.f32.mrf.mxu0 }
 0x936   :  { %v5645_v10 = vpop.f32.mrf.mxu0 }
 0x938   :  { %v1662_v45 = vpop.f32.mrf.mxu0 }
 0x93a   :  { %v5648_v32 = vpop.f32.mrf.mxu0 }
 0x93c   :  { %v1667_v31 = vpop.f32.mrf.mxu0 }
 0x93e   :  { %v5651_v1 = vpop.f32.mrf.mxu0 }
 0x940   :  { %v1672_v0 = vpop.f32.mrf.mxu0 }
 0x942   :  { %v5654_v47 = vpop.f32.mrf.mxu0  ;;  %v1767_v39 = vpop.f32.mrf.mxu1 }
 0x943   :  { %v1768_v12 = vadd.f32 %v1767_v39, %v1652_v33 }
 0x944   :  { %v5661_v52 = vpop.f32.mrf.mxu1  ;;  %v1992_v13 = vpop.f32.mrf.mxu0 }
 0x945   :  { %v1791_v60 = vadd.f32 %v7222_v15, %v1768_v12  ;;  %v2016_v16 = vadd.f32 %v1992_v13, %v1921_v38 }
 0x946   :  { %v1772_v17 = vpop.f32.mrf.mxu1  ;;  %v5680_v8 = vpop.f32.mrf.mxu0 }
 0x947   :  { %v5110_v3 = vmul.f32 -1.442695, %v1791_v60  ;;  %v5125_v18 = vmul.f32 -1.442695, %v2016_v16  ;;  %v1773_v19 = vadd.f32 %v1772_v17, %v1657_v43 }
 0x948   :  { %v5664_v20 = vpop.f32.mrf.mxu1  ;;  %v1997_v23 = vpop.f32.mrf.mxu0 }
 0x949   :  { %6134 = vpow2.f32 %v5110_v3  ;;  %v1792_v25 = vadd.f32 %v7222_v15, %v1773_v19  ;;  %v2017_v26 = vadd.f32 %v1997_v23, %v1922_v21 }
 0x94a   :  { %6136 = vpow2.f32 %v5125_v18  ;;  %v1777_v9 = vpop.f32.mrf.mxu1  ;;  %v5683_v28 = vpop.f32.mrf.mxu0 }
 0x94b   :  { %v5111_v24 = vmul.f32 -1.442695, %v1792_v25  ;;  %v5126_v22 = vmul.f32 -1.442695, %v2017_v26  ;;  %v1778_v30 = vadd.f32 %v1777_v9, %v1662_v45  ;;  %v1925_v45 = vld [vmem:[#allocation2 + $0x23] sm:$0xff] }
 0x94c   :  { %v5667_v29 = vpop.f32.mrf.mxu1  ;;  %v2002_v34 = vpop.f32.mrf.mxu0 }
 0x94d   :  { %6138 = vpow2.f32 %v5111_v24  ;;  %v1793_v50 = vadd.f32 %v7222_v15, %v1778_v30  ;;  %v2018_v27 = vadd.f32 %v2002_v34, %v1923_v37 }
 0x94e   :  { %6140 = vpow2.f32 %v5126_v22  ;;  %v1782_v46 = vpop.f32.mrf.mxu1  ;;  %v5686_v40 = vpop.f32.mrf.mxu0 }
 0x94f   :  { %v5112_v51 = vmul.f32 -1.442695, %v1793_v50  ;;  %v5127_v11 = vmul.f32 -1.442695, %v2018_v27  ;;  %v1783_v56 = vadd.f32 %v1782_v46, %v1667_v31 }
 0x950   :  { %v5670_v41 = vpop.f32.mrf.mxu1  ;;  %v2007_v44 = vpop.f32.mrf.mxu0 }
 0x951   :  { %6142 = vpow2.f32 %v5112_v51  ;;  %v1794_v61 = vadd.f32 %v7222_v15, %v1783_v56  ;;  %v2019_v48 = vadd.f32 %v2007_v44, %v1924_v57 }
 0x952   :  { %6144 = vpow2.f32 %v5127_v11  ;;  %v5689_v49 = vpop.f32.mrf.mxu0 }
 0x953   :  { %v5113_v33 = vmul.f32 -1.442695, %v1794_v61  ;;  %v5128_v54 = vmul.f32 -1.442695, %v2019_v48  ;;  %v1787_v43 = vpop.f32.mrf.mxu1 }
 0x954   :  { %v1788_v10 = vadd.f32 %v1787_v43, %v1672_v0  ;;  %v2012_v32 = vpop.f32.mrf.mxu0 }
 0x955   :  { %6146 = vpow2.f32 %v5113_v33  ;;  %v5673_v1 = vpop.f32.mrf.mxu1  ;;  %v2020_v47 = vadd.f32 %v2012_v32, %v1925_v45 }
 0x956   :  { %v6135_v39 = vpop.eup %6134  ;;  %6148 = vpow2.f32 %v5128_v54  ;;  %v1795_v31 = vadd.f32 %v7222_v15, %v1788_v10  ;;  %v5692_v12 = vpop.f32.mrf.mxu0 }
 0x957   :  { %v6137_v52 = vpop.eup %6136  ;;  %v1811_v38 = vadd.f32 1.0, %v6135_v39  ;;  %v5129_v16 = vmul.f32 -1.442695, %v2020_v47 }
 0x958   :  { %v2036_v13 = vadd.f32 1.0, %v6137_v52  ;;  %v5114_v60 = vmul.f32 -1.442695, %v1795_v31 }
 0x959   :  { %6150 = vrcp.f32 %v1811_v38 }
 0x95a   :  { %v6139_v17 = vpop.eup %6138  ;;  %6152 = vrcp.f32 %v2036_v13 }
 0x95b   :  { %v6141_v8 = vpop.eup %6140  ;;  %v1812_v0 = vadd.f32 1.0, %v6139_v17  ;;  %6154 = vpow2.f32 %v5114_v60 }
 0x95c   :  { %v2037_v3 = vadd.f32 1.0, %v6141_v8  ;;  %6156 = vpow2.f32 %v5129_v16 }
 0x95d   :  { %6158 = vrcp.f32 %v1812_v0 }
 0x95e   :  { %v6143_v18 = vpop.eup %6142  ;;  %6160 = vrcp.f32 %v2037_v3 }
 0x95f   :  { %v6145_v19 = vpop.eup %6144  ;;  %v1813_v20 = vadd.f32 1.0, %v6143_v18 }
 0x960   :  { %v2038_v21 = vadd.f32 1.0, %v6145_v19 }
 0x961   :  { %6162 = vrcp.f32 %v1813_v20 }
 0x962   :  { %v6147_v23 = vpop.eup %6146  ;;  %6164 = vrcp.f32 %v2038_v21 }
 0x963   :  { %v6149_v25 = vpop.eup %6148  ;;  %v1814_v26 = vadd.f32 1.0, %v6147_v23 }
 0x964   :  { %v2039_v9 = vadd.f32 1.0, %v6149_v25 }
 0x965   :  { %6166 = vrcp.f32 %v1814_v26 }
 0x966   :  { %v7229_v28 = vpop.eup %6150  ;;  %6168 = vrcp.f32 %v2039_v9 }
 0x967   :  { %v7231_v24 = vpop.eup %6152  ;;  %v1826_v22 = vmul.f32 2.0, %v7229_v28 }
 0x968   :  { %v6155_v30 = vpop.eup %6154  ;;  %v2051_v29 = vmul.f32 2.0, %v7231_v24 }
 0x969   :  { %v6157_v37 = vpop.eup %6156  ;;  %v1815_v34 = vadd.f32 1.0, %v6155_v30  ;;  %v5115_v50 = vadd.f32 -1.0, %v1826_v22 }
 0x96a   :  { %v7235_v27 = vpop.eup %6158  ;;  %v2040_v46 = vadd.f32 1.0, %v6157_v37  ;;  %v5130_v40 = vadd.f32 -1.0, %v2051_v29 }
 0x96b   :  { %v7237_v51 = vpop.eup %6160  ;;  %6170 = vrcp.f32 %v1815_v34  ;;  %1846 = vrot.lane.b32.xlu0 %v5115_v50, %s6487_s3  ;;  %v1827_v11 = vmul.f32 2.0, %v7235_v27 }
 0x96c   :  { %6172 = vrcp.f32 %v2040_v46  ;;  %2071 = vrot.lane.b32.xlu1 %v5130_v40, %s6487_s3  ;;  %v2052_v56 = vmul.f32 2.0, %v7237_v51  ;;  %v1836_v46 = vmul.f32 %v7229_v28, %v7064_v35  ;;  %v2061_v40 = vmul.f32 %v7231_v24, %v7090_v4 }
 0x96d   :  { %v5116_v41 = vadd.f32 -1.0, %v1827_v11 }
 0x96e   :  { %v7243_v57 = vpop.eup %6162  ;;  %v5131_v44 = vadd.f32 -1.0, %v2052_v56 }
 0x96f   :  { %v7245_v61 = vpop.eup %6164  ;;  %1848 = vrot.lane.b32.xlu0 %v5116_v41, %s6487_s3  ;;  %v1828_v48 = vmul.f32 2.0, %v7243_v57 }
 0x970   :  { %2073 = vrot.lane.b32.xlu1 %v5131_v44, %s6487_s3  ;;  %v2053_v49 = vmul.f32 2.0, %v7245_v61 }
 0x971   :  { %v5117_v33 = vadd.f32 -1.0, %v1828_v48  ;;  %v1837_v48 = vmul.f32 %v7235_v27, %v7069_v5  ;;  %v2063_v5 = vmul.f32 %v7245_v61, %v7102_v7 }
 0x972   :  { %v7251_v54 = vpop.eup %6166  ;;  %v5132_v43 = vadd.f32 -1.0, %v2053_v49  ;;  %v2062_v49 = vmul.f32 %v7237_v51, %v7096_v58 }
 0x973   :  { %v7253_v10 = vpop.eup %6168  ;;  %1850 = vrot.lane.b32.xlu0 %v5117_v33, %s6487_s3  ;;  %v1829_v45 = vmul.f32 2.0, %v7251_v54 }
 0x974   :  { %2075 = vrot.lane.b32.xlu1 %v5132_v43, %s6487_s3  ;;  %v2054_v32 = vmul.f32 2.0, %v7253_v10 }
 0x975   :  { %v5118_v1 = vadd.f32 -1.0, %v1829_v45  ;;  %v1838_v45 = vmul.f32 %v7243_v57, %v7074_v59  ;;  %v2064_v59 = vmul.f32 %v7253_v10, %v7108_v63 }
 0x976   :  { %v5133_v47 = vadd.f32 -1.0, %v2054_v32 }
 0x977   :  { %1852 = vrot.lane.b32.xlu0 %v5118_v1, %s6487_s3 }
 0x978   :  { %v7260_v39 = vpop.eup %6170  ;;  %2077 = vrot.lane.b32.xlu1 %v5133_v47, %s6487_s3 }
 0x979   :  { %v7263_v31 = vpop.eup %6172  ;;  %v1830_v12 = vmul.f32 2.0, %v7260_v39 }
 0x97a   :  { %v2055_v52 = vmul.f32 2.0, %v7263_v31  ;;  %v2065_v63 = vmul.f32 %v7263_v31, %v7115_v14 }
 0x97b   :  { %v5119_v38 = vadd.f32 -1.0, %v1830_v12  ;;  %v1839_v12 = vmul.f32 %v7251_v54, %v7079_v42  ;;  %v1840_v42 = vmul.f32 %v7260_v39, %v7085_v55 }
 0x97c   :  { %v5134_v13 = vadd.f32 -1.0, %v2055_v52 }
 0x97d   :  { %1854 = vrot.lane.b32.xlu0 %v5119_v38, %s6487_s3 }
 0x97e   :  { %2079 = vrot.lane.b32.xlu1 %v5134_v13, %s6487_s3 }
 0x9dd   :  { %v1847_v60 = vpop.permute.xlu0 %1846 }
 0x9de   :  { %v2072_v16 = vpop.permute.xlu1 %2071  ;;  %v1861_v17 = vmul.f32 %v7229_v28, %v1847_v60 }
 0x9df   :  { %v2086_v8 = vmul.f32 %v7231_v24, %v2072_v16 }
 0x9e0   :  { %1871 = vrot.lane.b32.xlu0 %v1861_v17, %s6488_s18 }
 0x9e1   :  { %2096 = vrot.lane.b32.xlu1 %v2086_v8, %s6488_s18  ;;  %v1849_v0 = vpop.permute.xlu0 %1848 }
 0x9e2   :  { %v2074_v3 = vpop.permute.xlu1 %2073  ;;  %v1862_v18 = vmul.f32 %v7235_v27, %v1849_v0 }
 0x9e3   :  { %v2087_v19 = vmul.f32 %v7237_v51, %v2074_v3 }
 0x9e4   :  { %1873 = vrot.lane.b32.xlu0 %v1862_v18, %s6488_s18 }
 0x9e5   :  { %2098 = vrot.lane.b32.xlu1 %v2087_v19, %s6488_s18  ;;  %v1851_v20 = vpop.permute.xlu0 %1850 }
 0x9e6   :  { %v2076_v21 = vpop.permute.xlu1 %2075  ;;  %v1863_v23 = vmul.f32 %v7243_v57, %v1851_v20 }
 0x9e7   :  { %v2088_v25 = vmul.f32 %v7245_v61, %v2076_v21 }
 0x9e8   :  { %1875 = vrot.lane.b32.xlu0 %v1863_v23, %s6488_s18 }
 0x9e9   :  { %2100 = vrot.lane.b32.xlu1 %v2088_v25, %s6488_s18  ;;  %v1853_v26 = vpop.permute.xlu0 %1852 }
 0x9ea   :  { %v2078_v9 = vpop.permute.xlu1 %2077  ;;  %v1864_v22 = vmul.f32 %v7251_v54, %v1853_v26 }
 0x9eb   :  { %v2089_v30 = vmul.f32 %v7253_v10, %v2078_v9 }
 0x9ec   :  { %1877 = vrot.lane.b32.xlu0 %v1864_v22, %s6488_s18 }
 0x9ed   :  { %2102 = vrot.lane.b32.xlu1 %v2089_v30, %s6488_s18 }
 0x9ef   :  { %v1855_v29 = vpop.permute.xlu0 %1854 }
 0x9f0   :  { %v2080_v37 = vpop.permute.xlu1 %2079  ;;  %v1865_v34 = vmul.f32 %v7260_v39, %v1855_v29 }
 0x9f1   :  { %v2090_v50 = vmul.f32 %v7263_v31, %v2080_v37 }
 0x9f2   :  { %1879 = vrot.lane.b32.xlu0 %v1865_v34, %s6488_s18 }
 0x9f3   :  { %2104 = vrot.lane.b32.xlu1 %v2090_v50, %s6488_s18 }
 0xa52   :  { %v1872_v11 = vpop.permute.xlu0 %1871 }
 0xa53   :  { %v2097_v56 = vpop.permute.xlu1 %2096  ;;  %v7293_v41 = vadd.f32 %v1872_v11, %v1836_v46 }
 0xa54   :  { %v7295_v44 = vadd.f32 %v2097_v56, %v2061_v40 }
 0xa55   :  { %6174 = vtanh.f32 %v7293_v41 }
 0xa56   :  { %6176 = vtanh.f32 %v7295_v44  ;;  %v1874_v35 = vpop.permute.xlu0 %1873 }
 0xa57   :  { %v2099_v33 = vpop.permute.xlu1 %2098  ;;  %v7303_v43 = vadd.f32 %v1874_v35, %v1837_v48 }
 0xa58   :  { %v7305_v4 = vadd.f32 %v2099_v33, %v2062_v49 }
 0xa59   :  { %6178 = vtanh.f32 %v7303_v43 }
 0xa5a   :  { %6180 = vtanh.f32 %v7305_v4  ;;  %v1876_v32 = vpop.permute.xlu0 %1875 }
 0xa5b   :  { %v2101_v1 = vpop.permute.xlu1 %2100  ;;  %v7313_v47 = vadd.f32 %v1876_v32, %v1838_v45 }
 0xa5c   :  { %v7315_v58 = vadd.f32 %v2101_v1, %v2063_v5 }
 0xa5d   :  { %6182 = vtanh.f32 %v7313_v47 }
 0xa5e   :  { %6184 = vtanh.f32 %v7315_v58  ;;  %v1878_v52 = vpop.permute.xlu0 %1877 }
 0xa5f   :  { %v2103_v38 = vpop.permute.xlu1 %2102  ;;  %v7323_v13 = vadd.f32 %v1878_v52, %v1839_v12 }
 0xa60   :  { %v7325_v7 = vadd.f32 %v2103_v38, %v2064_v59 }
 0xa61   :  { %6186 = vtanh.f32 %v7323_v13 }
 0xa62   :  { %v6175_v60 = vpop.eup %6174  ;;  %6188 = vtanh.f32 %v7325_v7 }
 0xa63   :  { %v6177_v16 = vpop.eup %6176  ;;  %1901 = vrot.lane.b32.xlu0 %v6175_v60, %s6489_s25 }
 0xa64   :  { %v1880_v17 = vpop.permute.xlu0 %1879  ;;  %2126 = vrot.lane.b32.xlu1 %v6177_v16, %s6489_s25 }
 0xa65   :  { %v2105_v8 = vpop.permute.xlu1 %2104  ;;  %v7335_v0 = vadd.f32 %v1880_v17, %v1840_v42 }
 0xa66   :  { %v6179_v3 = vpop.eup %6178  ;;  %v7337_v18 = vadd.f32 %v2105_v8, %v2065_v63 }
 0xa67   :  { %v6181_v19 = vpop.eup %6180  ;;  %6190 = vtanh.f32 %v7335_v0  ;;  %1903 = vrot.lane.b32.xlu0 %v6179_v3, %s6489_s25 }
 0xa68   :  { %6192 = vtanh.f32 %v7337_v18  ;;  %2128 = vrot.lane.b32.xlu1 %v6181_v19, %s6489_s25 }
 0xa6a   :  { %v6183_v55 = vpop.eup %6182 }
 0xa6b   :  { %v6185_v14 = vpop.eup %6184  ;;  %1905 = vrot.lane.b32.xlu0 %v6183_v55, %s6489_s25 }
 0xa6c   :  { %2130 = vrot.lane.b32.xlu1 %v6185_v14, %s6489_s25 }
 0xa6e   :  { %v6187_v20 = vpop.eup %6186 }
 0xa6f   :  { %v6189_v21 = vpop.eup %6188  ;;  %1907 = vrot.lane.b32.xlu0 %v6187_v20, %s6489_s25 }
 0xa70   :  { %2132 = vrot.lane.b32.xlu1 %v6189_v21, %s6489_s25 }
 0xa74   :  { %v6191_v23 = vpop.eup %6190 }
 0xa75   :  { %v6193_v25 = vpop.eup %6192  ;;  %1909 = vrot.lane.b32.xlu0 %v6191_v23, %s6489_s25 }
 0xa76   :  { %2134 = vrot.lane.b32.xlu1 %v6193_v25, %s6489_s25 }
 0xad5   :  { %v1902_v26 = vpop.permute.xlu0 %1901 }
 0xad6   :  { %v2127_v9 = vpop.permute.xlu1 %2126  ;;  %v1916_v22 = vmul.f32 %v7229_v28, %v1902_v26 }
 0xad7   :  { %v2141_v30 = vmul.f32 %v7231_v24, %v2127_v9 }
 0xad8   :  { %2151 = vrot.lane.b32.xlu0 %v1916_v22, %s6490_s28 }
 0xad9   :  { %2266 = vrot.lane.b32.xlu1 %v2141_v30, %s6490_s28  ;;  %v1904_v29 = vpop.permute.xlu0 %1903 }
 0xada   :  { %v2129_v37 = vpop.permute.xlu1 %2128  ;;  %v1917_v34 = vmul.f32 %v7235_v27, %v1904_v29 }
 0xadb   :  { %v2142_v50 = vmul.f32 %v7237_v51, %v2129_v37 }
 0xadc   :  { %2153 = vrot.lane.b32.xlu0 %v1917_v34, %s6490_s28 }
 0xadd   :  { %2268 = vrot.lane.b32.xlu1 %v2142_v50, %s6490_s28  ;;  %v1906_v46 = vpop.permute.xlu0 %1905 }
 0xade   :  { %v2131_v40 = vpop.permute.xlu1 %2130  ;;  %v1918_v28 = vmul.f32 %v7243_v57, %v1906_v46 }
 0xadf   :  { %v2143_v24 = vmul.f32 %v7245_v61, %v2131_v40 }
 0xae0   :  { %2155 = vrot.lane.b32.xlu0 %v1918_v28, %s6490_s28 }
 0xae1   :  { %2270 = vrot.lane.b32.xlu1 %v2143_v24, %s6490_s28  ;;  %v1908_v11 = vpop.permute.xlu0 %1907 }
 0xae2   :  { %v2133_v56 = vpop.permute.xlu1 %2132  ;;  %v1919_v27 = vmul.f32 %v7251_v54, %v1908_v11  ;;  %v7374_v54 = vld [vmem:[%s8370_s2 + $0x8] sm:$0xff] }
 0xae3   :  { %v2144_v51 = vmul.f32 %v7253_v10, %v2133_v56 }
 0xae4   :  { %2157 = vrot.lane.b32.xlu0 %v1919_v27, %s6490_s28 }
 0xae5   :  { %2272 = vrot.lane.b32.xlu1 %v2144_v51, %s6490_s28 }
 0xae7   :  { %v1910_v48 = vpop.permute.xlu0 %1909 }
 0xae8   :  { %v2135_v49 = vpop.permute.xlu1 %2134  ;;  %v1920_v57 = vmul.f32 %v7260_v39, %v1910_v48  ;;  %v2506_v48 = vld [vmem:[#allocation2 + $0x4] sm:$0xff] }
 0xae9   :  { %v2145_v61 = vmul.f32 %v7263_v31, %v2135_v49  ;;  %v7393_v31 = vld [vmem:[%s8370_s2] sm:$0xff] }
 0xaea   :  { %2159 = vrot.lane.b32.xlu0 %v1920_v57, %s6490_s28 }
 0xaeb   :  { %2274 = vrot.lane.b32.xlu1 %v2145_v61, %s6490_s28 }
 0xb4a   :  { %v2152_v35 = vpop.permute.xlu0 %2151 }
 0xb4b   :  { %v2267_v33 = vpop.permute.xlu1 %2266  ;;  %5698 = vmatmul.mubr.msk.f32.vlgmr.msra.gmra.mxu1 %vm186_vm3, %v2152_v35 }
 0xb4c   :  { %5717 = vmatmul.mubr.msk.f32.vlgmr.msra.gmra.mxu0 %vm186_vm3, %v2267_v33  ;;  %5732 = vmatpush3.msra.mxu1 %v7374_v54 }
 0xb4d   :  { %5719 = vmatprep.mubr.msk.f32.mxu0 %vm6486_vm1, %v6485_v2  ;;  %5700 = vmatprep.mubr.msk.f32.mxu1 %vm6486_vm1, %v6485_v2 }
 0xb4e   :  { %v2154_v10 = vpop.permute.xlu0 %2153  ;;  %5733 = vmatprep.subr.mxu1 %v6485_v2  ;;  %5751 = vmatpush3.msra.mxu0 %v7167_v62 }
 0xb4f   :  { %v2269_v39 = vpop.permute.xlu1 %2268  ;;  %5701 = vmatmul.mubr.msk.f32.gmra.mxu1 %vm186_vm3, %v2154_v10  ;;  %5752 = vmatprep.subr.mxu0 %v6485_v2 }
 0xb50   :  { %5720 = vmatmul.mubr.msk.f32.gmra.mxu0 %vm186_vm3, %v2269_v39  ;;  %5703 = vmatprep.mubr.msk.f32.mxu1 %vm6486_vm1, %v6485_v2 }
 0xb51   :  { %5722 = vmatprep.mubr.msk.f32.mxu0 %vm6486_vm1, %v6485_v2  ;;  %5734 = vmatpush3.msra.mxu1 %v7393_v31 }
 0xb52   :  { %v2156_v62 = vpop.permute.xlu0 %2155  ;;  %5753 = vmatpush3.msra.mxu0 %v7187_v36  ;;  %5769 = vmatprep.subr.mxu1 %v6485_v2 }
 0xb53   :  { %v2271_v45 = vpop.permute.xlu1 %2270  ;;  %5704 = vmatmul.mubr.msk.f32.gmra.mxu1 %vm186_vm3, %v2156_v62  ;;  %5788 = vmatprep.subr.mxu0 %v6485_v2  ;;  %v2507_v62 = vld [vmem:[#allocation2 + $0xc] sm:$0xff] }
 0xb54   :  { %5723 = vmatmul.mubr.msk.f32.gmra.mxu0 %vm186_vm3, %v2271_v45  ;;  %5706 = vmatprep.mubr.msk.f32.mxu1 %vm6486_vm1, %v6485_v2 }
 0xb55   :  { %5725 = vmatprep.mubr.msk.f32.mxu0 %vm6486_vm1, %v6485_v2 }
 0xb56   :  { %v2158_v5 = vpop.permute.xlu0 %2157 }
 0xb57   :  { %v2273_v32 = vpop.permute.xlu1 %2272  ;;  %5707 = vmatmul.mubr.msk.f32.gmra.mxu1 %vm186_vm3, %v2158_v5 }
 0xb58   :  { %5726 = vmatmul.mubr.msk.f32.gmra.mxu0 %vm186_vm3, %v2273_v32  ;;  %5709 = vmatprep.mubr.msk.f32.mxu1 %vm6486_vm1, %v6485_v2 }
 0xb59   :  { %5728 = vmatprep.mubr.msk.f32.mxu0 %vm6486_vm1, %v6485_v2 }
 0xb5c   :  { %v2160_v36 = vpop.permute.xlu0 %2159 }
 0xb5d   :  { %v2275_v1 = vpop.permute.xlu1 %2274  ;;  %5710 = vmatmul.mubr.msk.f32.gmra.mxu1 %vm186_vm3, %v2160_v36 }
 0xb5e   :  { %5729 = vmatmul.mubr.msk.f32.gmra.mxu0 %vm186_vm3, %v2275_v1  ;;  %5735 = vmatprep.mubr.msk.f32.mxu1 %vm6486_vm1, %v6485_v2 }
 0xb5f   :  { %5754 = vmatprep.mubr.msk.f32.mxu0 %vm6486_vm1, %v6485_v2 }
 0xb61   :  { %5736 = vmatmul.mubr.msk.f32.vlgmr.msra.gmra.mxu1 %vm186_vm3, %v2267_v33 }
 0xb62   :  { %5738 = vmatprep.mubr.msk.f32.mxu1 %vm6486_vm1, %v6485_v2  ;;  %5770 = vmatpush3.msra.mxu1 %v7177_v53 }
 0xb63   :  { %5771 = vmatprep.subr.mxu1 %v6485_v2 }
 0xb64   :  { %5772 = vmatpush3.msra.mxu1 %v7197_v6 }
 0xb65   :  { %5739 = vmatmul.mubr.msk.f32.gmra.mxu1 %vm186_vm3, %v2269_v39  ;;  %5807 = vmatprep.subr.mxu1 %v6485_v2 }
 0xb66   :  { %5741 = vmatprep.mubr.msk.f32.mxu1 %vm6486_vm1, %v6485_v2 }
 0xb69   :  { %5742 = vmatmul.mubr.msk.f32.gmra.mxu1 %vm186_vm3, %v2271_v45 }
 0xb6a   :  { %5744 = vmatprep.mubr.msk.f32.mxu1 %vm6486_vm1, %v6485_v2 }
 0xb6d   :  { %5745 = vmatmul.mubr.msk.f32.gmra.mxu1 %vm186_vm3, %v2273_v32 }
 0xb6e   :  { %5747 = vmatprep.mubr.msk.f32.mxu1 %vm6486_vm1, %v6485_v2 }
 0xb71   :  { %5748 = vmatmul.mubr.msk.f32.gmra.mxu1 %vm186_vm3, %v2275_v1 }
 0xb72   :  { %5773 = vmatprep.mubr.msk.f32.mxu1 %vm6486_vm1, %v6485_v2 }
 0xc0b   :  { %v2237_v53 = vpop.f32.mrf.mxu1 }
 0xc0c   :  { %v2352_v6 = vpop.f32.mrf.mxu0 }
 0xc0d   :  { %v2353_v12 = vadd.f32 %v2352_v6, %v2237_v53  ;;  %v5699_v59 = vpop.f32.mrf.mxu1 }
 0xc0e   :  { %v5718_v52 = vpop.f32.mrf.mxu0 }
 0xc0f   :  { %v2376_v38 = vadd.f32 %v7222_v15, %v2353_v12  ;;  %v2242_v60 = vpop.f32.mrf.mxu1 }
 0xc10   :  { %v2357_v16 = vpop.f32.mrf.mxu0 }
 0xc11   :  { %v5145_v42 = vmul.f32 -1.442695, %v2376_v38  ;;  %v2358_v63 = vadd.f32 %v2357_v16, %v2242_v60  ;;  %v5702_v17 = vpop.f32.mrf.mxu1  ;;  %v2509_v16 = vld [vmem:[#allocation2 + $0x1c] sm:$0xff] }
 0xc12   :  { %v5721_v8 = vpop.f32.mrf.mxu0 }
 0xc13   :  { %6194 = vpow2.f32 %v5145_v42  ;;  %v2377_v3 = vadd.f32 %v7222_v15, %v2358_v63  ;;  %v2247_v19 = vpop.f32.mrf.mxu1 }
 0xc14   :  { %v2362_v55 = vpop.f32.mrf.mxu0 }
 0xc15   :  { %v5146_v14 = vmul.f32 -1.442695, %v2377_v3  ;;  %v2363_v20 = vadd.f32 %v2362_v55, %v2247_v19  ;;  %v5705_v21 = vpop.f32.mrf.mxu1  ;;  %v2510_v19 = vld [vmem:[#allocation2 + $0x24] sm:$0xff] }
 0xc16   :  { %v5724_v23 = vpop.f32.mrf.mxu0 }
 0xc17   :  { %6196 = vpow2.f32 %v5146_v14  ;;  %v2378_v25 = vadd.f32 %v7222_v15, %v2363_v20  ;;  %v2252_v26 = vpop.f32.mrf.mxu1 }
 0xc18   :  { %v2367_v9 = vpop.f32.mrf.mxu0 }
 0xc19   :  { %v5147_v22 = vmul.f32 -1.442695, %v2378_v25  ;;  %v2368_v30 = vadd.f32 %v2367_v9, %v2252_v26  ;;  %v5708_v29 = vpop.f32.mrf.mxu1 }
 0xc1a   :  { %v5727_v37 = vpop.f32.mrf.mxu0 }
 0xc1b   :  { %6198 = vpow2.f32 %v5147_v22  ;;  %v2379_v34 = vadd.f32 %v7222_v15, %v2368_v30 }
 0xc1d   :  { %v5148_v50 = vmul.f32 -1.442695, %v2379_v34  ;;  %v2257_v46 = vpop.f32.mrf.mxu1 }
 0xc1e   :  { %v2372_v40 = vpop.f32.mrf.mxu0 }
 0xc1f   :  { %6200 = vpow2.f32 %v5148_v50  ;;  %v2373_v28 = vadd.f32 %v2372_v40, %v2257_v46  ;;  %v5711_v24 = vpop.f32.mrf.mxu1 }
 0xc20   :  { %v6195_v11 = vpop.eup %6194  ;;  %v5730_v56 = vpop.f32.mrf.mxu0 }
 0xc21   :  { %v2396_v27 = vadd.f32 1.0, %v6195_v11  ;;  %v2380_v51 = vadd.f32 %v7222_v15, %v2373_v28  ;;  %v2577_v49 = vpop.f32.mrf.mxu1  ;;  %v2508_v15 = vld [vmem:[#allocation2 + $0x14] sm:$0xff] }
 0xc22   :  { %v2601_v57 = vadd.f32 %v2577_v49, %v2506_v48 }
 0xc23   :  { %6202 = vrcp.f32 %v2396_v27  ;;  %v5149_v61 = vmul.f32 -1.442695, %v2380_v51  ;;  %v5737_v35 = vpop.f32.mrf.mxu1 }
 0xc24   :  { %v6197_v33 = vpop.eup %6196  ;;  %v5160_v10 = vmul.f32 -1.442695, %v2601_v57 }
 0xc25   :  { %v2397_v39 = vadd.f32 1.0, %v6197_v33  ;;  %6204 = vpow2.f32 %v5149_v61  ;;  %v2582_v45 = vpop.f32.mrf.mxu1 }
 0xc26   :  { %6206 = vpow2.f32 %v5160_v10  ;;  %v2602_v5 = vadd.f32 %v2582_v45, %v2507_v62 }
 0xc27   :  { %6208 = vrcp.f32 %v2397_v39  ;;  %v5740_v32 = vpop.f32.mrf.mxu1 }
 0xc28   :  { %v6199_v36 = vpop.eup %6198  ;;  %v5161_v1 = vmul.f32 -1.442695, %v2602_v5 }
 0xc29   :  { %v2398_v53 = vadd.f32 1.0, %v6199_v36  ;;  %v2587_v6 = vpop.f32.mrf.mxu1 }
 0xc2a   :  { %6210 = vpow2.f32 %v5161_v1  ;;  %v2603_v12 = vadd.f32 %v2587_v6, %v2508_v15 }
 0xc2b   :  { %6212 = vrcp.f32 %v2398_v53  ;;  %v5743_v59 = vpop.f32.mrf.mxu1 }
 0xc2c   :  { %v6201_v52 = vpop.eup %6200  ;;  %v5162_v38 = vmul.f32 -1.442695, %v2603_v12 }
 0xc2d   :  { %v2399_v60 = vadd.f32 1.0, %v6201_v52  ;;  %v2592_v42 = vpop.f32.mrf.mxu1 }
 0xc2e   :  { %6214 = vpow2.f32 %v5162_v38  ;;  %v2604_v63 = vadd.f32 %v2592_v42, %v2509_v16 }
 0xc2f   :  { %6216 = vrcp.f32 %v2399_v60  ;;  %v5746_v17 = vpop.f32.mrf.mxu1 }
 0xc30   :  { %v7441_v8 = vpop.eup %6202  ;;  %v5163_v3 = vmul.f32 -1.442695, %v2604_v63 }
 0xc31   :  { %v2597_v55 = vpop.f32.mrf.mxu1  ;;  %v2411_v14 = vmul.f32 2.0, %v7441_v8 }
 0xc32   :  { %v6205_v20 = vpop.eup %6204  ;;  %6218 = vpow2.f32 %v5163_v3  ;;  %v2605_v21 = vadd.f32 %v2597_v55, %v2510_v19 }
 0xc33   :  { %v6207_v23 = vpop.eup %6206  ;;  %v2400_v25 = vadd.f32 1.0, %v6205_v20  ;;  %v5749_v26 = vpop.f32.mrf.mxu1  ;;  %v5150_v9 = vadd.f32 -1.0, %v2411_v14 }
 0xc34   :  { %v7444_v22 = vpop.eup %6208  ;;  %v2621_v30 = vadd.f32 1.0, %v6207_v23  ;;  %v5164_v29 = vmul.f32 -1.442695, %v2605_v21 }
 0xc35   :  { %6220 = vrcp.f32 %v2400_v25  ;;  %2431 = vrot.lane.b32.xlu0 %v5150_v9, %s6487_s3  ;;  %v2412_v37 = vmul.f32 2.0, %v7444_v22 }
 0xc36   :  { %6222 = vrcp.f32 %v2621_v30 }
 0xc37   :  { %v6211_v34 = vpop.eup %6210  ;;  %6224 = vpow2.f32 %v5164_v29  ;;  %v5151_v50 = vadd.f32 -1.0, %v2412_v37 }
 0xc38   :  { %v7448_v46 = vpop.eup %6212  ;;  %v2622_v40 = vadd.f32 1.0, %v6211_v34 }
 0xc39   :  { %2433 = vrot.lane.b32.xlu1 %v5151_v50, %s6487_s3  ;;  %v2413_v28 = vmul.f32 2.0, %v7448_v46 }
 0xc3a   :  { %6226 = vrcp.f32 %v2622_v40 }
 0xc3b   :  { %v6215_v24 = vpop.eup %6214  ;;  %v5152_v11 = vadd.f32 -1.0, %v2413_v28 }
 0xc3c   :  { %v7452_v56 = vpop.eup %6216  ;;  %v2623_v27 = vadd.f32 1.0, %v6215_v24  ;;  %v2421_v24 = vmul.f32 %v7441_v8, %v7293_v41 }
 0xc3d   :  { %2435 = vrot.lane.b32.xlu0 %v5152_v11, %s6487_s3  ;;  %v2414_v51 = vmul.f32 2.0, %v7452_v56  ;;  %v2424_v41 = vmul.f32 %v7452_v56, %v7323_v13 }
 0xc3e   :  { %6228 = vrcp.f32 %v2623_v27 }
 0xc3f   :  { %v6219_v48 = vpop.eup %6218  ;;  %v5153_v49 = vadd.f32 -1.0, %v2414_v51  ;;  %v2422_v51 = vmul.f32 %v7444_v22, %v7303_v43 }
 0xc40   :  { %v2624_v57 = vadd.f32 1.0, %v6219_v48 }
 0xc41   :  { %2437 = vrot.lane.b32.xlu1 %v5153_v49, %s6487_s3 }
 0xc42   :  { %v7457_v61 = vpop.eup %6220  ;;  %6230 = vrcp.f32 %v2624_v57  ;;  %v2423_v57 = vmul.f32 %v7448_v46, %v7313_v47 }
 0xc43   :  { %v7459_v35 = vpop.eup %6222  ;;  %v2415_v33 = vmul.f32 2.0, %v7457_v61 }
 0xc44   :  { %v6225_v10 = vpop.eup %6224  ;;  %v2636_v39 = vmul.f32 2.0, %v7459_v35 }
 0xc45   :  { %v2625_v62 = vadd.f32 1.0, %v6225_v10  ;;  %v5154_v45 = vadd.f32 -1.0, %v2415_v33 }
 0xc46   :  { %v5165_v5 = vadd.f32 -1.0, %v2636_v39 }
 0xc47   :  { %v7463_v32 = vpop.eup %6226  ;;  %6232 = vrcp.f32 %v2625_v62  ;;  %2439 = vrot.lane.b32.xlu0 %v5154_v45, %s6487_s3  ;;  %v2425_v45 = vmul.f32 %v7457_v61, %v7335_v0 }
 0xc48   :  { %2656 = vrot.lane.b32.xlu1 %v5165_v5, %s6487_s3  ;;  %v2637_v36 = vmul.f32 2.0, %v7463_v32  ;;  %v2646_v5 = vmul.f32 %v7459_v35, %v7295_v44  ;;  %v2647_v0 = vmul.f32 %v7463_v32, %v7305_v4 }
 0xc4a   :  { %v5166_v1 = vadd.f32 -1.0, %v2637_v36 }
 0xc4b   :  { %v7468_v53 = vpop.eup %6228 }
 0xc4c   :  { %2658 = vrot.lane.b32.xlu0 %v5166_v1, %s6487_s3  ;;  %v2638_v15 = vmul.f32 2.0, %v7468_v53  ;;  %v2648_v44 = vmul.f32 %v7468_v53, %v7315_v58 }
 0xc4e   :  { %v5167_v6 = vadd.f32 -1.0, %v2638_v15 }
 0xc4f   :  { %v7472_v12 = vpop.eup %6230 }
 0xc50   :  { %2660 = vrot.lane.b32.xlu1 %v5167_v6, %s6487_s3  ;;  %v2639_v59 = vmul.f32 2.0, %v7472_v12  ;;  %v2649_v4 = vmul.f32 %v7472_v12, %v7325_v7 }
 0xc52   :  { %v5168_v52 = vadd.f32 -1.0, %v2639_v59 }
 0xc54   :  { %v7476_v38 = vpop.eup %6232  ;;  %2662 = vrot.lane.b32.xlu0 %v5168_v52, %s6487_s3 }
 0xc55   :  { %v2640_v60 = vmul.f32 2.0, %v7476_v38  ;;  %v2650_v58 = vmul.f32 %v7476_v38, %v7337_v18 }
 0xc57   :  { %v5169_v16 = vadd.f32 -1.0, %v2640_v60 }
 0xc59   :  { %2664 = vrot.lane.b32.xlu1 %v5169_v16, %s6487_s3 }
 0xca7   :  { %v2432_v42 = vpop.permute.xlu0 %2431 }
 0xca8   :  { %v2446_v63 = vmul.f32 %v7441_v8, %v2432_v42 }
 0xcaa   :  { %2456 = vrot.lane.b32.xlu0 %v2446_v63, %s6488_s18 }
 0xcab   :  { %v2434_v17 = vpop.permute.xlu1 %2433 }
 0xcac   :  { %v2447_v3 = vmul.f32 %v7444_v22, %v2434_v17 }
 0xcae   :  { %2458 = vrot.lane.b32.xlu1 %v2447_v3, %s6488_s18 }
 0xcaf   :  { %v2436_v19 = vpop.permute.xlu0 %2435 }
 0xcb0   :  { %v2448_v55 = vmul.f32 %v7448_v46, %v2436_v19 }
 0xcb2   :  { %2460 = vrot.lane.b32.xlu0 %v2448_v55, %s6488_s18 }
 0xcb3   :  { %v2438_v14 = vpop.permute.xlu1 %2437 }
 0xcb4   :  { %v2449_v20 = vmul.f32 %v7452_v56, %v2438_v14 }
 0xcb6   :  { %2462 = vrot.lane.b32.xlu1 %v2449_v20, %s6488_s18 }
 0xcb9   :  { %v2440_v21 = vpop.permute.xlu0 %2439 }
 0xcba   :  { %v2450_v23 = vmul.f32 %v7457_v61, %v2440_v21  ;;  %v2657_v25 = vpop.permute.xlu1 %2656 }
 0xcbb   :  { %v2671_v26 = vmul.f32 %v7459_v35, %v2657_v25 }
 0xcbc   :  { %2464 = vrot.lane.b32.xlu0 %v2450_v23, %s6488_s18 }
 0xcbd   :  { %2681 = vrot.lane.b32.xlu1 %v2671_v26, %s6488_s18 }
 0xcbe   :  { %v2659_v9 = vpop.permute.xlu0 %2658 }
 0xcbf   :  { %v2672_v30 = vmul.f32 %v7463_v32, %v2659_v9 }
 0xcc1   :  { %2683 = vrot.lane.b32.xlu0 %v2672_v30, %s6488_s18 }
 0xcc2   :  { %v2661_v29 = vpop.permute.xlu1 %2660 }
 0xcc3   :  { %v2673_v37 = vmul.f32 %v7468_v53, %v2661_v29 }
 0xcc5   :  { %2685 = vrot.lane.b32.xlu1 %v2673_v37, %s6488_s18 }
 0xcc6   :  { %v2663_v34 = vpop.permute.xlu0 %2662 }
 0xcc7   :  { %v2674_v50 = vmul.f32 %v7472_v12, %v2663_v34 }
 0xcc9   :  { %2687 = vrot.lane.b32.xlu0 %v2674_v50, %s6488_s18 }
 0xccb   :  { %v2665_v40 = vpop.permute.xlu1 %2664 }
 0xccc   :  { %v2675_v28 = vmul.f32 %v7476_v38, %v2665_v40 }
 0xcce   :  { %2689 = vrot.lane.b32.xlu1 %v2675_v28, %s6488_s18 }
 0xd1c   :  { %v2457_v11 = vpop.permute.xlu0 %2456 }
 0xd1d   :  { %v7503_v27 = vadd.f32 %v2457_v11, %v2421_v24 }
 0xd1f   :  { %6234 = vtanh.f32 %v7503_v27 }
 0xd20   :  { %v2459_v48 = vpop.permute.xlu1 %2458 }
 0xd21   :  { %v7508_v49 = vadd.f32 %v2459_v48, %v2422_v51 }
 0xd23   :  { %6236 = vtanh.f32 %v7508_v49 }
 0xd24   :  { %v2461_v33 = vpop.permute.xlu0 %2460 }
 0xd25   :  { %v7513_v10 = vadd.f32 %v2461_v33, %v2423_v57  ;;  %v7614_v33 = vld [vmem:[%s8372_s5] sm:$0xff] }
 0xd27   :  { %6238 = vtanh.f32 %v7513_v10 }
 0xd28   :  { %v2463_v39 = vpop.permute.xlu1 %2462 }
 0xd29   :  { %v7518_v62 = vadd.f32 %v2463_v39, %v2424_v41  ;;  %v7625_v41 = vld [vmem:[%s8373_s4 + $0x8] sm:$0xff] }
 0xd2b   :  { %6240 = vtanh.f32 %v7518_v62 }
 0xd2c   :  { %v6235_v43 = vpop.eup %6234 }
 0xd2d   :  { %2486 = vrot.lane.b32.xlu0 %v6235_v43, %s6489_s25  ;;  %v7639_v43 = vld [vmem:[%s8373_s4] sm:$0xff] }
 0xd2e   :  { %v2465_v47 = vpop.permute.xlu0 %2464 }
 0xd2f   :  { %v7526_v36 = vadd.f32 %v2465_v47, %v2425_v45  ;;  %v2682_v1 = vpop.permute.xlu1 %2681 }
 0xd30   :  { %v6237_v15 = vpop.eup %6236  ;;  %v7528_v13 = vadd.f32 %v2682_v1, %v2646_v5 }
 0xd31   :  { %6242 = vtanh.f32 %v7526_v36  ;;  %2488 = vrot.lane.b32.xlu1 %v6237_v15, %s6489_s25 }
 0xd32   :  { %6244 = vtanh.f32 %v7528_v13 }
 0xd33   :  { %v2684_v6 = vpop.permute.xlu0 %2683 }
 0xd34   :  { %v6239_v59 = vpop.eup %6238  ;;  %v7535_v52 = vadd.f32 %v2684_v6, %v2647_v0 }
 0xd35   :  { %2490 = vrot.lane.b32.xlu0 %v6239_v59, %s6489_s25 }
 0xd36   :  { %6246 = vtanh.f32 %v7535_v52 }
 0xd37   :  { %v2686_v60 = vpop.permute.xlu1 %2685 }
 0xd38   :  { %v6241_v16 = vpop.eup %6240  ;;  %v7541_v42 = vadd.f32 %v2686_v60, %v2648_v44 }
 0xd39   :  { %2492 = vrot.lane.b32.xlu1 %v6241_v16, %s6489_s25 }
 0xd3a   :  { %6248 = vtanh.f32 %v7541_v42 }
 0xd3b   :  { %v2688_v63 = vpop.permute.xlu0 %2687 }
 0xd3c   :  { %v7547_v17 = vadd.f32 %v2688_v63, %v2649_v4 }
 0xd3e   :  { %v6243_v3 = vpop.eup %6242  ;;  %6250 = vtanh.f32 %v7547_v17 }
 0xd3f   :  { %v6245_v19 = vpop.eup %6244  ;;  %2494 = vrot.lane.b32.xlu0 %v6243_v3, %s6489_s25 }
 0xd40   :  { %v2690_v55 = vpop.permute.xlu1 %2689  ;;  %2711 = vrot.lane.b32.xlu1 %v6245_v19, %s6489_s25 }
 0xd41   :  { %v7554_v14 = vadd.f32 %v2690_v55, %v2650_v58  ;;  %v7661_v58 = vld [vmem:[%s8374_s6] ss:$0 sm:$0xff] }
 0xd43   :  { %v6247_v20 = vpop.eup %6246  ;;  %6252 = vtanh.f32 %v7554_v14 }
 0xd44   :  { %2713 = vrot.lane.b32.xlu0 %v6247_v20, %s6489_s25  ;;  %v3091_v20 = vld [vmem:[#allocation2 + $0x5] sm:$0xff] }
 0xd47   :  { %v6249_v7 = vpop.eup %6248 }
 0xd48   :  { %2715 = vrot.lane.b32.xlu1 %v6249_v7, %s6489_s25 }
 0xd4b   :  { %v6251_v21 = vpop.eup %6250 }
 0xd4c   :  { %2717 = vrot.lane.b32.xlu0 %v6251_v21, %s6489_s25 }
 0xd50   :  { %v6253_v23 = vpop.eup %6252 }
 0xd51   :  { %2719 = vrot.lane.b32.xlu1 %v6253_v23, %s6489_s25 }
 0xd9f   :  { %v2487_v18 = vpop.permute.xlu0 %2486 }
 0xda0   :  { %v2501_v25 = vmul.f32 %v7441_v8, %v2487_v18 }
 0xda2   :  { %2736 = vrot.lane.b32.xlu0 %v2501_v25, %s6490_s28 }
 0xda3   :  { %v2489_v26 = vpop.permute.xlu1 %2488 }
 0xda4   :  { %v2502_v9 = vmul.f32 %v7444_v22, %v2489_v26 }
 0xda6   :  { %2738 = vrot.lane.b32.xlu1 %v2502_v9, %s6490_s28 }
 0xda7   :  { %v2491_v30 = vpop.permute.xlu0 %2490 }
 0xda8   :  { %v2503_v29 = vmul.f32 %v7448_v46, %v2491_v30 }
 0xdaa   :  { %2740 = vrot.lane.b32.xlu0 %v2503_v29, %s6490_s28 }
 0xdab   :  { %v2493_v37 = vpop.permute.xlu1 %2492 }
 0xdac   :  { %v2504_v34 = vmul.f32 %v7452_v56, %v2493_v37  ;;  %v3092_v37 = vld [vmem:[#allocation2 + $0xd] sm:$0xff] }
 0xdae   :  { %2742 = vrot.lane.b32.xlu1 %v2504_v34, %s6490_s28 }
 0xdb1   :  { %v2495_v50 = vpop.permute.xlu0 %2494 }
 0xdb2   :  { %v2505_v8 = vmul.f32 %v7457_v61, %v2495_v50  ;;  %v2712_v40 = vpop.permute.xlu1 %2711 }
 0xdb3   :  { %v2726_v28 = vmul.f32 %v7459_v35, %v2712_v40 }
 0xdb4   :  { %2744 = vrot.lane.b32.xlu0 %v2505_v8, %s6490_s28 }
 0xdb5   :  { %2851 = vrot.lane.b32.xlu1 %v2726_v28, %s6490_s28 }
 0xdb6   :  { %v2714_v22 = vpop.permute.xlu0 %2713 }
 0xdb7   :  { %v2727_v46 = vmul.f32 %v7463_v32, %v2714_v22 }
 0xdb9   :  { %2853 = vrot.lane.b32.xlu0 %v2727_v46, %s6490_s28 }
 0xdba   :  { %v2716_v24 = vpop.permute.xlu1 %2715 }
 0xdbb   :  { %v2728_v56 = vmul.f32 %v7468_v53, %v2716_v24 }
 0xdbd   :  { %2855 = vrot.lane.b32.xlu1 %v2728_v56, %s6490_s28 }
 0xdbe   :  { %v2718_v11 = vpop.permute.xlu0 %2717 }
 0xdbf   :  { %v2729_v61 = vmul.f32 %v7472_v12, %v2718_v11  ;;  %v3093_v11 = vld [vmem:[#allocation2 + $0x15] sm:$0xff] }
 0xdc1   :  { %2857 = vrot.lane.b32.xlu0 %v2729_v61, %s6490_s28 }
 0xdc3   :  { %v2720_v35 = vpop.permute.xlu1 %2719 }
 0xdc4   :  { %v2730_v51 = vmul.f32 %v7476_v38, %v2720_v35  ;;  %v7606_v38 = vld [vmem:[%s8372_s5 + $0x8] sm:$0xff] }
 0xdc6   :  { %2859 = vrot.lane.b32.xlu1 %v2730_v51, %s6490_s28 }
 0xe14   :  { %v2737_v48 = vpop.permute.xlu0 %2736 }
 0xe15   :  { %5755 = vmatmul.mubr.msk.f32.vlgmr.msra.gmra.mxu0 %vm186_vm3, %v2737_v48 }
 0xe16   :  { %5789 = vmatpush3.msra.mxu0 %v7374_v54  ;;  %5757 = vmatprep.mubr.msk.f32.mxu0 %vm6486_vm1, %v6485_v2 }
 0xe17   :  { %5790 = vmatprep.subr.mxu0 %v6485_v2 }
 0xe18   :  { %v2739_v32 = vpop.permute.xlu1 %2738  ;;  %5791 = vmatpush3.msra.mxu0 %v7393_v31 }
 0xe19   :  { %5758 = vmatmul.mubr.msk.f32.gmra.mxu0 %vm186_vm3, %v2739_v32  ;;  %5826 = vmatprep.subr.mxu0 %v6485_v2 }
 0xe1a   :  { %5760 = vmatprep.mubr.msk.f32.mxu0 %vm6486_vm1, %v6485_v2 }
 0xe1c   :  { %v2741_v53 = vpop.permute.xlu0 %2740 }
 0xe1d   :  { %5761 = vmatmul.mubr.msk.f32.gmra.mxu0 %vm186_vm3, %v2741_v53 }
 0xe1e   :  { %5763 = vmatprep.mubr.msk.f32.mxu0 %vm6486_vm1, %v6485_v2 }
 0xe20   :  { %v2743_v54 = vpop.permute.xlu1 %2742 }
 0xe21   :  { %5764 = vmatmul.mubr.msk.f32.gmra.mxu0 %vm186_vm3, %v2743_v54 }
 0xe22   :  { %5766 = vmatprep.mubr.msk.f32.mxu0 %vm6486_vm1, %v6485_v2 }
 0xe26   :  { %v2745_v31 = vpop.permute.xlu0 %2744 }
 0xe27   :  { %5767 = vmatmul.mubr.msk.f32.gmra.mxu0 %vm186_vm3, %v2745_v31  ;;  %v2852_v12 = vpop.permute.xlu1 %2851 }
 0xe28   :  { %5774 = vmatmul.mubr.msk.f32.vlgmr.msra.gmra.mxu1 %vm186_vm3, %v2852_v12  ;;  %5792 = vmatprep.mubr.msk.f32.mxu0 %vm6486_vm1, %v6485_v2 }
 0xe29   :  { %5776 = vmatprep.mubr.msk.f32.mxu1 %vm6486_vm1, %v6485_v2  ;;  %5808 = vmatpush3.msra.mxu1 %v7606_v38 }
 0xe2a   :  { %5809 = vmatprep.subr.mxu1 %v6485_v2 }
 0xe2b   :  { %5793 = vmatmul.mubr.msk.f32.vlgmr.msra.gmra.mxu0 %vm186_vm3, %v2852_v12  ;;  %v2854_v57 = vpop.permute.xlu0 %2853  ;;  %5810 = vmatpush3.msra.mxu1 %v7614_v33 }
 0xe2c   :  { %5777 = vmatmul.mubr.msk.f32.gmra.mxu1 %vm186_vm3, %v2854_v57  ;;  %5795 = vmatprep.mubr.msk.f32.mxu0 %vm6486_vm1, %v6485_v2 }
 0xe2d   :  { %5779 = vmatprep.mubr.msk.f32.mxu1 %vm6486_vm1, %v6485_v2  ;;  %5827 = vmatpush3.msra.mxu0 %v7625_v41 }
 0xe2e   :  { %5828 = vmatprep.subr.mxu0 %v6485_v2  ;;  %5845 = vmatprep.subr.mxu1 %v6485_v2 }
 0xe2f   :  { %5796 = vmatmul.mubr.msk.f32.gmra.mxu0 %vm186_vm3, %v2854_v57  ;;  %v2856_v39 = vpop.permute.xlu1 %2855  ;;  %v3094_v57 = vld [vmem:[#allocation2 + $0x1d] sm:$0xff] }
 0xe30   :  { %5780 = vmatmul.mubr.msk.f32.gmra.mxu1 %vm186_vm3, %v2856_v39  ;;  %5798 = vmatprep.mubr.msk.f32.mxu0 %vm6486_vm1, %v6485_v2 }
 0xe31   :  { %5782 = vmatprep.mubr.msk.f32.mxu1 %vm6486_vm1, %v6485_v2  ;;  %5829 = vmatpush3.msra.mxu0 %v7639_v43 }
 0xe32   :  { %5864 = vmatprep.subr.mxu0 %v6485_v2 }
 0xe33   :  { %5799 = vmatmul.mubr.msk.f32.gmra.mxu0 %vm186_vm3, %v2856_v39  ;;  %v2858_v45 = vpop.permute.xlu0 %2857 }
 0xe34   :  { %5783 = vmatmul.mubr.msk.f32.gmra.mxu1 %vm186_vm3, %v2858_v45  ;;  %5801 = vmatprep.mubr.msk.f32.mxu0 %vm6486_vm1, %v6485_v2 }
 0xe35   :  { %5785 = vmatprep.mubr.msk.f32.mxu1 %vm6486_vm1, %v6485_v2 }
 0xe37   :  { %5802 = vmatmul.mubr.msk.f32.gmra.mxu0 %vm186_vm3, %v2858_v45 }
 0xe38   :  { %v2860_v47 = vpop.permute.xlu1 %2859  ;;  %5804 = vmatprep.mubr.msk.f32.mxu0 %vm6486_vm1, %v6485_v2 }
 0xe39   :  { %5786 = vmatmul.mubr.msk.f32.gmra.mxu1 %vm186_vm3, %v2860_v47 }
 0xe3a   :  { %5811 = vmatprep.mubr.msk.f32.mxu1 %vm6486_vm1, %v6485_v2 }
 0xe3b   :  { %5805 = vmatmul.mubr.msk.f32.gmra.mxu0 %vm186_vm3, %v2860_v47 }
 0xe3c   :  { %5830 = vmatprep.mubr.msk.f32.mxu0 %vm6486_vm1, %v6485_v2 }
 0xed5   :  { %v2822_v5 = vpop.f32.mrf.mxu0 }
 0xed7   :  { %v5756_v1 = vpop.f32.mrf.mxu0 }
 0xed9   :  { %v2827_v15 = vpop.f32.mrf.mxu0 }
 0xedb   :  { %v5759_v0 = vpop.f32.mrf.mxu0 }
 0xedd   :  { %v2832_v6 = vpop.f32.mrf.mxu0 }
 0xedf   :  { %v5762_v59 = vpop.f32.mrf.mxu0 }
 0xee0   :  { %v3095_v59 = vld [vmem:[#allocation2 + $0x25] sm:$0xff] }
 0xee1   :  { %v2837_v44 = vpop.f32.mrf.mxu0 }
 0xee3   :  { %v5765_v60 = vpop.f32.mrf.mxu0 }
 0xee7   :  { %v2842_v16 = vpop.f32.mrf.mxu0 }
 0xee8   :  { %v2937_v4 = vpop.f32.mrf.mxu1 }
 0xee9   :  { %v5768_v63 = vpop.f32.mrf.mxu0  ;;  %v2938_v3 = vadd.f32 %v2937_v4, %v2822_v5 }
 0xeea   :  { %v5775_v19 = vpop.f32.mrf.mxu1 }
 0xeeb   :  { %v2961_v55 = vadd.f32 %v7661_v58, %v2938_v3  ;;  %v3162_v7 = vpop.f32.mrf.mxu0 }
 0xeec   :  { %v3186_v21 = vadd.f32 %v3162_v7, %v3091_v20  ;;  %v2942_v23 = vpop.f32.mrf.mxu1 }
 0xeed   :  { %v5180_v18 = vmul.f32 -1.442695, %v2961_v55  ;;  %v2943_v25 = vadd.f32 %v2942_v23, %v2827_v15  ;;  %v5794_v26 = vpop.f32.mrf.mxu0 }
 0xeee   :  { %v5195_v9 = vmul.f32 -1.442695, %v3186_v21  ;;  %v5778_v30 = vpop.f32.mrf.mxu1 }
 0xeef   :  { %6254 = vpow2.f32 %v5180_v18  ;;  %v2962_v29 = vadd.f32 %v7661_v58, %v2943_v25  ;;  %v3167_v34 = vpop.f32.mrf.mxu0 }
 0xef0   :  { %6256 = vpow2.f32 %v5195_v9  ;;  %v3187_v50 = vadd.f32 %v3167_v34, %v3092_v37  ;;  %v2947_v8 = vpop.f32.mrf.mxu1 }
 0xef1   :  { %v5181_v40 = vmul.f32 -1.442695, %v2962_v29  ;;  %v2948_v28 = vadd.f32 %v2947_v8, %v2832_v6  ;;  %v5797_v22 = vpop.f32.mrf.mxu0 }
 0xef2   :  { %v5196_v46 = vmul.f32 -1.442695, %v3187_v50  ;;  %v5781_v24 = vpop.f32.mrf.mxu1 }
 0xef3   :  { %6258 = vpow2.f32 %v5181_v40  ;;  %v2963_v56 = vadd.f32 %v7661_v58, %v2948_v28  ;;  %v3172_v61 = vpop.f32.mrf.mxu0 }
 0xef4   :  { %6260 = vpow2.f32 %v5196_v46  ;;  %v3188_v35 = vadd.f32 %v3172_v61, %v3093_v11  ;;  %v2952_v51 = vpop.f32.mrf.mxu1 }
 0xef5   :  { %v5182_v48 = vmul.f32 -1.442695, %v2963_v56  ;;  %v2953_v32 = vadd.f32 %v2952_v51, %v2837_v44  ;;  %v5800_v53 = vpop.f32.mrf.mxu0 }
 0xef6   :  { %v5197_v54 = vmul.f32 -1.442695, %v3188_v35  ;;  %v5784_v31 = vpop.f32.mrf.mxu1 }
 0xef7   :  { %6262 = vpow2.f32 %v5182_v48  ;;  %v2964_v12 = vadd.f32 %v7661_v58, %v2953_v32  ;;  %v3177_v39 = vpop.f32.mrf.mxu0 }
 0xef8   :  { %6264 = vpow2.f32 %v5197_v54  ;;  %v3189_v45 = vadd.f32 %v3177_v39, %v3094_v57 }
 0xef9   :  { %v5183_v47 = vmul.f32 -1.442695, %v2964_v12  ;;  %v2957_v5 = vpop.f32.mrf.mxu1  ;;  %v5803_v1 = vpop.f32.mrf.mxu0 }
 0xefa   :  { %v5198_v15 = vmul.f32 -1.442695, %v3189_v45  ;;  %v2958_v0 = vadd.f32 %v2957_v5, %v2842_v16 }
 0xefb   :  { %6266 = vpow2.f32 %v5183_v47  ;;  %v5787_v6 = vpop.f32.mrf.mxu1  ;;  %v3182_v60 = vpop.f32.mrf.mxu0 }
 0xefc   :  { %v6255_v44 = vpop.eup %6254  ;;  %6268 = vpow2.f32 %v5198_v15  ;;  %v2965_v4 = vadd.f32 %v7661_v58, %v2958_v0  ;;  %v3190_v63 = vadd.f32 %v3182_v60, %v3095_v59 }
 0xefd   :  { %v6257_v3 = vpop.eup %6256  ;;  %v2981_v19 = vadd.f32 1.0, %v6255_v44  ;;  %v5806_v55 = vpop.f32.mrf.mxu0 }
 0xefe   :  { %v3206_v20 = vadd.f32 1.0, %v6257_v3  ;;  %v5184_v7 = vmul.f32 -1.442695, %v2965_v4  ;;  %v5199_v21 = vmul.f32 -1.442695, %v3190_v63 }
 0xeff   :  { %6270 = vrcp.f32 %v2981_v19 }
 0xf00   :  { %v6259_v23 = vpop.eup %6258  ;;  %6272 = vrcp.f32 %v3206_v20 }
 0xf01   :  { %v6261_v18 = vpop.eup %6260  ;;  %v2982_v16 = vadd.f32 1.0, %v6259_v23  ;;  %6274 = vpow2.f32 %v5184_v7 }
 0xf02   :  { %v3207_v25 = vadd.f32 1.0, %v6261_v18  ;;  %6276 = vpow2.f32 %v5199_v21 }
 0xf03   :  { %6278 = vrcp.f32 %v2982_v16 }
 0xf04   :  { %v6263_v26 = vpop.eup %6262  ;;  %6280 = vrcp.f32 %v3207_v25 }
 0xf05   :  { %v6265_v9 = vpop.eup %6264  ;;  %v2983_v30 = vadd.f32 1.0, %v6263_v26 }
 0xf06   :  { %v3208_v29 = vadd.f32 1.0, %v6265_v9 }
 0xf07   :  { %6282 = vrcp.f32 %v2983_v30 }
 0xf08   :  { %v6267_v37 = vpop.eup %6266  ;;  %6284 = vrcp.f32 %v3208_v29 }
 0xf09   :  { %v6269_v34 = vpop.eup %6268  ;;  %v2984_v50 = vadd.f32 1.0, %v6267_v37 }
 0xf0a   :  { %v3209_v8 = vadd.f32 1.0, %v6269_v34 }
 0xf0b   :  { %6286 = vrcp.f32 %v2984_v50 }
 0xf0c   :  { %v7668_v40 = vpop.eup %6270  ;;  %6288 = vrcp.f32 %v3209_v8 }
 0xf0d   :  { %v7670_v28 = vpop.eup %6272  ;;  %v2996_v22 = vmul.f32 2.0, %v7668_v40 }
 0xf0e   :  { %v6275_v46 = vpop.eup %6274  ;;  %v3221_v24 = vmul.f32 2.0, %v7670_v28 }
 0xf0f   :  { %v6277_v56 = vpop.eup %6276  ;;  %v2985_v11 = vadd.f32 1.0, %v6275_v46  ;;  %v5185_v61 = vadd.f32 -1.0, %v2996_v22 }
 0xf10   :  { %v7674_v35 = vpop.eup %6278  ;;  %v3210_v51 = vadd.f32 1.0, %v6277_v56  ;;  %v5200_v48 = vadd.f32 -1.0, %v3221_v24 }
 0xf11   :  { %v7676_v32 = vpop.eup %6280  ;;  %6290 = vrcp.f32 %v2985_v11  ;;  %3016 = vrot.lane.b32.xlu0 %v5185_v61, %s6487_s3  ;;  %v2997_v53 = vmul.f32 2.0, %v7674_v35 }
 0xf12   :  { %6292 = vrcp.f32 %v3210_v51  ;;  %3241 = vrot.lane.b32.xlu1 %v5200_v48, %s6487_s3  ;;  %v3222_v54 = vmul.f32 2.0, %v7676_v32  ;;  %v3006_v51 = vmul.f32 %v7668_v40, %v7503_v27  ;;  %v3231_v48 = vmul.f32 %v7670_v28, %v7528_v13 }
 0xf13   :  { %v5186_v31 = vadd.f32 -1.0, %v2997_v53 }
 0xf14   :  { %v7682_v12 = vpop.eup %6282  ;;  %v5201_v57 = vadd.f32 -1.0, %v3222_v54 }
 0xf15   :  { %v7684_v39 = vpop.eup %6284  ;;  %3018 = vrot.lane.b32.xlu0 %v5186_v31, %s6487_s3  ;;  %v2998_v45 = vmul.f32 2.0, %v7682_v12 }
 0xf16   :  { %3243 = vrot.lane.b32.xlu1 %v5201_v57, %s6487_s3  ;;  %v3223_v47 = vmul.f32 2.0, %v7684_v39 }
 0xf17   :  { %v5187_v5 = vadd.f32 -1.0, %v2998_v45  ;;  %v3007_v45 = vmul.f32 %v7674_v35, %v7508_v49  ;;  %v3233_v49 = vmul.f32 %v7684_v39, %v7541_v42 }
 0xf18   :  { %v7690_v1 = vpop.eup %6286  ;;  %v5202_v15 = vadd.f32 -1.0, %v3223_v47  ;;  %v3232_v47 = vmul.f32 %v7676_v32, %v7535_v52 }
 0xf19   :  { %v7692_v0 = vpop.eup %6288  ;;  %3020 = vrot.lane.b32.xlu0 %v5187_v5, %s6487_s3  ;;  %v2999_v6 = vmul.f32 2.0, %v7690_v1 }
 0xf1a   :  { %3245 = vrot.lane.b32.xlu1 %v5202_v15, %s6487_s3  ;;  %v3224_v59 = vmul.f32 2.0, %v7692_v0 }
 0xf1b   :  { %v5188_v60 = vadd.f32 -1.0, %v2999_v6  ;;  %v3008_v6 = vmul.f32 %v7682_v12, %v7513_v10  ;;  %v3234_v10 = vmul.f32 %v7692_v0, %v7547_v17 }
 0xf1c   :  { %v5203_v44 = vadd.f32 -1.0, %v3224_v59 }
 0xf1d   :  { %3022 = vrot.lane.b32.xlu0 %v5188_v60, %s6487_s3 }
 0xf1e   :  { %v7699_v4 = vpop.eup %6290  ;;  %3247 = vrot.lane.b32.xlu1 %v5203_v44, %s6487_s3 }
 0xf1f   :  { %v7702_v63 = vpop.eup %6292  ;;  %v3000_v3 = vmul.f32 2.0, %v7699_v4 }
 0xf20   :  { %v3225_v19 = vmul.f32 2.0, %v7702_v63  ;;  %v3235_v17 = vmul.f32 %v7702_v63, %v7554_v14 }
 0xf21   :  { %v5189_v55 = vadd.f32 -1.0, %v3000_v3  ;;  %v3009_v3 = vmul.f32 %v7690_v1, %v7518_v62  ;;  %v3010_v62 = vmul.f32 %v7699_v4, %v7526_v36 }
 0xf22   :  { %v5204_v20 = vadd.f32 -1.0, %v3225_v19 }
 0xf23   :  { %3024 = vrot.lane.b32.xlu0 %v5189_v55, %s6487_s3 }
 0xf24   :  { %3249 = vrot.lane.b32.xlu1 %v5204_v20, %s6487_s3 }
 0xf83   :  { %v3017_v7 = vpop.permute.xlu0 %3016 }
 0xf84   :  { %v3242_v21 = vpop.permute.xlu1 %3241  ;;  %v3031_v23 = vmul.f32 %v7668_v40, %v3017_v7 }
 0xf85   :  { %v3256_v18 = vmul.f32 %v7670_v28, %v3242_v21 }
 0xf86   :  { %3041 = vrot.lane.b32.xlu0 %v3031_v23, %s6488_s18 }
 0xf87   :  { %3266 = vrot.lane.b32.xlu1 %v3256_v18, %s6488_s18  ;;  %v3019_v16 = vpop.permute.xlu0 %3018 }
 0xf88   :  { %v3244_v25 = vpop.permute.xlu1 %3243  ;;  %v3032_v26 = vmul.f32 %v7674_v35, %v3019_v16 }
 0xf89   :  { %v3257_v9 = vmul.f32 %v7676_v32, %v3244_v25 }
 0xf8a   :  { %3043 = vrot.lane.b32.xlu0 %v3032_v26, %s6488_s18 }
 0xf8b   :  { %3268 = vrot.lane.b32.xlu1 %v3257_v9, %s6488_s18  ;;  %v3021_v30 = vpop.permute.xlu0 %3020 }
 0xf8c   :  { %v3246_v29 = vpop.permute.xlu1 %3245  ;;  %v3033_v37 = vmul.f32 %v7682_v12, %v3021_v30 }
 0xf8d   :  { %v3258_v34 = vmul.f32 %v7684_v39, %v3246_v29 }
 0xf8e   :  { %3045 = vrot.lane.b32.xlu0 %v3033_v37, %s6488_s18 }
 0xf8f   :  { %3270 = vrot.lane.b32.xlu1 %v3258_v34, %s6488_s18  ;;  %v3023_v50 = vpop.permute.xlu0 %3022 }
 0xf90   :  { %v3248_v8 = vpop.permute.xlu1 %3247  ;;  %v3034_v22 = vmul.f32 %v7690_v1, %v3023_v50 }
 0xf91   :  { %v3259_v46 = vmul.f32 %v7692_v0, %v3248_v8 }
 0xf92   :  { %3047 = vrot.lane.b32.xlu0 %v3034_v22, %s6488_s18 }
 0xf93   :  { %3272 = vrot.lane.b32.xlu1 %v3259_v46, %s6488_s18 }
 0xf95   :  { %v3025_v24 = vpop.permute.xlu0 %3024 }
 0xf96   :  { %v3250_v56 = vpop.permute.xlu1 %3249  ;;  %v3035_v11 = vmul.f32 %v7699_v4, %v3025_v24 }
 0xf97   :  { %v3260_v61 = vmul.f32 %v7702_v63, %v3250_v56 }
 0xf98   :  { %3049 = vrot.lane.b32.xlu0 %v3035_v11, %s6488_s18 }
 0xf99   :  { %3274 = vrot.lane.b32.xlu1 %v3260_v61, %s6488_s18 }
 0xff8   :  { %v3042_v53 = vpop.permute.xlu0 %3041 }
 0xff9   :  { %v3267_v54 = vpop.permute.xlu1 %3266  ;;  %v7732_v31 = vadd.f32 %v3042_v53, %v3006_v51 }
 0xffa   :  { %v7734_v57 = vadd.f32 %v3267_v54, %v3231_v48 }
 0xffb   :  { %6294 = vtanh.f32 %v7732_v31 }
 0xffc   :  { %6296 = vtanh.f32 %v7734_v57  ;;  %v3044_v27 = vpop.permute.xlu0 %3043 }
 0xffd   :  { %v3269_v5 = vpop.permute.xlu1 %3268  ;;  %v7742_v15 = vadd.f32 %v3044_v27, %v3007_v45 }
 0xffe   :  { %v7744_v13 = vadd.f32 %v3269_v5, %v3232_v47 }
 0xfff   :  { %6298 = vtanh.f32 %v7742_v15 }
0x1000   :  { %6300 = vtanh.f32 %v7744_v13  ;;  %v3046_v59 = vpop.permute.xlu0 %3045 }
0x1001   :  { %v3271_v60 = vpop.permute.xlu1 %3270  ;;  %v7752_v44 = vadd.f32 %v3046_v59, %v3008_v6 }
0x1002   :  { %v7754_v52 = vadd.f32 %v3271_v60, %v3233_v49 }
0x1003   :  { %6302 = vtanh.f32 %v7752_v44 }
0x1004   :  { %6304 = vtanh.f32 %v7754_v52  ;;  %v3048_v19 = vpop.permute.xlu0 %3047 }
0x1005   :  { %v3273_v55 = vpop.permute.xlu1 %3272  ;;  %v7762_v20 = vadd.f32 %v3048_v19, %v3009_v3 }
0x1006   :  { %v7764_v42 = vadd.f32 %v3273_v55, %v3234_v10 }
0x1007   :  { %6306 = vtanh.f32 %v7762_v20 }
0x1008   :  { %v6295_v7 = vpop.eup %6294  ;;  %6308 = vtanh.f32 %v7764_v42 }
0x1009   :  { %v6297_v21 = vpop.eup %6296  ;;  %3071 = vrot.lane.b32.xlu0 %v6295_v7, %s6489_s25 }
0x100a   :  { %v3050_v23 = vpop.permute.xlu0 %3049  ;;  %3296 = vrot.lane.b32.xlu1 %v6297_v21, %s6489_s25 }
0x100b   :  { %v3275_v18 = vpop.permute.xlu1 %3274  ;;  %v7774_v16 = vadd.f32 %v3050_v23, %v3010_v62 }
0x100c   :  { %v6299_v25 = vpop.eup %6298  ;;  %v7776_v26 = vadd.f32 %v3275_v18, %v3235_v17 }
0x100d   :  { %v6301_v9 = vpop.eup %6300  ;;  %6310 = vtanh.f32 %v7774_v16  ;;  %3073 = vrot.lane.b32.xlu0 %v6299_v25, %s6489_s25 }
0x100e   :  { %6312 = vtanh.f32 %v7776_v26  ;;  %3298 = vrot.lane.b32.xlu1 %v6301_v9, %s6489_s25 }
0x1010   :  { %v6303_v36 = vpop.eup %6302 }
0x1011   :  { %v6305_v14 = vpop.eup %6304  ;;  %3075 = vrot.lane.b32.xlu0 %v6303_v36, %s6489_s25 }
0x1012   :  { %3300 = vrot.lane.b32.xlu1 %v6305_v14, %s6489_s25 }
0x1014   :  { %v6307_v30 = vpop.eup %6306 }
0x1015   :  { %v6309_v29 = vpop.eup %6308  ;;  %3077 = vrot.lane.b32.xlu0 %v6307_v30, %s6489_s25 }
0x1016   :  { %3302 = vrot.lane.b32.xlu1 %v6309_v29, %s6489_s25 }
0x101a   :  { %v6311_v37 = vpop.eup %6310 }
0x101b   :  { %v6313_v34 = vpop.eup %6312  ;;  %3079 = vrot.lane.b32.xlu0 %v6311_v37, %s6489_s25 }
0x101c   :  { %3304 = vrot.lane.b32.xlu1 %v6313_v34, %s6489_s25 }
0x107b   :  { %v3072_v50 = vpop.permute.xlu0 %3071 }
0x107c   :  { %v3297_v8 = vpop.permute.xlu1 %3296  ;;  %v3086_v22 = vmul.f32 %v7668_v40, %v3072_v50 }
0x107d   :  { %v3311_v46 = vmul.f32 %v7670_v28, %v3297_v8 }
0x107e   :  { %3321 = vrot.lane.b32.xlu0 %v3086_v22, %s6490_s28 }
0x107f   :  { %3436 = vrot.lane.b32.xlu1 %v3311_v46, %s6490_s28  ;;  %v3074_v24 = vpop.permute.xlu0 %3073 }
0x1080   :  { %v3299_v56 = vpop.permute.xlu1 %3298  ;;  %v3087_v11 = vmul.f32 %v7674_v35, %v3074_v24 }
0x1081   :  { %v3312_v61 = vmul.f32 %v7676_v32, %v3299_v56 }
0x1082   :  { %3323 = vrot.lane.b32.xlu0 %v3087_v11, %s6490_s28 }
0x1083   :  { %3438 = vrot.lane.b32.xlu1 %v3312_v61, %s6490_s28  ;;  %v3076_v51 = vpop.permute.xlu0 %3075 }
0x1084   :  { %v3301_v48 = vpop.permute.xlu1 %3300  ;;  %v3088_v40 = vmul.f32 %v7682_v12, %v3076_v51 }
0x1085   :  { %v3313_v28 = vmul.f32 %v7684_v39, %v3301_v48 }
0x1086   :  { %3325 = vrot.lane.b32.xlu0 %v3088_v40, %s6490_s28 }
0x1087   :  { %3440 = vrot.lane.b32.xlu1 %v3313_v28, %s6490_s28  ;;  %v3078_v53 = vpop.permute.xlu0 %3077 }
0x1088   :  { %v3303_v54 = vpop.permute.xlu1 %3302  ;;  %v3089_v35 = vmul.f32 %v7690_v1, %v3078_v53  ;;  %v7813_v1 = vld [vmem:[%s8370_s2 + $0x8] sm:$0xff] }
0x1089   :  { %v3314_v32 = vmul.f32 %v7692_v0, %v3303_v54 }
0x108a   :  { %3327 = vrot.lane.b32.xlu0 %v3089_v35, %s6490_s28 }
0x108b   :  { %3442 = vrot.lane.b32.xlu1 %v3314_v32, %s6490_s28 }
0x108d   :  { %v3080_v45 = vpop.permute.xlu0 %3079 }
0x108e   :  { %v3305_v47 = vpop.permute.xlu1 %3304  ;;  %v3090_v12 = vmul.f32 %v7699_v4, %v3080_v45  ;;  %v3676_v45 = vld [vmem:[#allocation2 + $0x6] sm:$0xff] }
0x108f   :  { %v3315_v39 = vmul.f32 %v7702_v63, %v3305_v47  ;;  %v7832_v63 = vld [vmem:[%s8370_s2] sm:$0xff] }
0x1090   :  { %3329 = vrot.lane.b32.xlu0 %v3090_v12, %s6490_s28 }
0x1091   :  { %3444 = vrot.lane.b32.xlu1 %v3315_v39, %s6490_s28 }
0x10f0   :  { %v3322_v27 = vpop.permute.xlu0 %3321 }
0x10f1   :  { %v3437_v5 = vpop.permute.xlu1 %3436  ;;  %5812 = vmatmul.mubr.msk.f32.vlgmr.msra.gmra.mxu1 %vm186_vm3, %v3322_v27 }
0x10f2   :  { %5831 = vmatmul.mubr.msk.f32.vlgmr.msra.gmra.mxu0 %vm186_vm3, %v3437_v5  ;;  %5846 = vmatpush3.msra.mxu1 %v7813_v1 }
0x10f3   :  { %5833 = vmatprep.mubr.msk.f32.mxu0 %vm6486_vm1, %v6485_v2  ;;  %5814 = vmatprep.mubr.msk.f32.mxu1 %vm6486_vm1, %v6485_v2 }
0x10f4   :  { %v3324_v0 = vpop.permute.xlu0 %3323  ;;  %5847 = vmatprep.subr.mxu1 %v6485_v2  ;;  %5865 = vmatpush3.msra.mxu0 %v7606_v38 }
0x10f5   :  { %v3439_v4 = vpop.permute.xlu1 %3438  ;;  %5815 = vmatmul.mubr.msk.f32.gmra.mxu1 %vm186_vm3, %v3324_v0  ;;  %5866 = vmatprep.subr.mxu0 %v6485_v2 }
0x10f6   :  { %5834 = vmatmul.mubr.msk.f32.gmra.mxu0 %vm186_vm3, %v3439_v4  ;;  %5817 = vmatprep.mubr.msk.f32.mxu1 %vm6486_vm1, %v6485_v2 }
0x10f7   :  { %5836 = vmatprep.mubr.msk.f32.mxu0 %vm6486_vm1, %v6485_v2  ;;  %5848 = vmatpush3.msra.mxu1 %v7832_v63 }
0x10f8   :  { %v3326_v38 = vpop.permute.xlu0 %3325  ;;  %5867 = vmatpush3.msra.mxu0 %v7614_v33  ;;  %5883 = vmatprep.subr.mxu1 %v6485_v2 }
0x10f9   :  { %v3441_v6 = vpop.permute.xlu1 %3440  ;;  %5818 = vmatmul.mubr.msk.f32.gmra.mxu1 %vm186_vm3, %v3326_v38  ;;  %5902 = vmatprep.subr.mxu0 %v6485_v2  ;;  %v3677_v38 = vld [vmem:[#allocation2 + $0xe] sm:$0xff] }
0x10fa   :  { %5837 = vmatmul.mubr.msk.f32.gmra.mxu0 %vm186_vm3, %v3441_v6  ;;  %5820 = vmatprep.mubr.msk.f32.mxu1 %vm6486_vm1, %v6485_v2 }
0x10fb   :  { %5839 = vmatprep.mubr.msk.f32.mxu0 %vm6486_vm1, %v6485_v2 }
0x10fc   :  { %v3328_v49 = vpop.permute.xlu0 %3327 }
0x10fd   :  { %v3443_v59 = vpop.permute.xlu1 %3442  ;;  %5821 = vmatmul.mubr.msk.f32.gmra.mxu1 %vm186_vm3, %v3328_v49 }
0x10fe   :  { %5840 = vmatmul.mubr.msk.f32.gmra.mxu0 %vm186_vm3, %v3443_v59  ;;  %5823 = vmatprep.mubr.msk.f32.mxu1 %vm6486_vm1, %v6485_v2 }
0x10ff   :  { %5842 = vmatprep.mubr.msk.f32.mxu0 %vm6486_vm1, %v6485_v2 }
0x1102   :  { %v3330_v33 = vpop.permute.xlu0 %3329 }
0x1103   :  { %v3445_v60 = vpop.permute.xlu1 %3444  ;;  %5824 = vmatmul.mubr.msk.f32.gmra.mxu1 %vm186_vm3, %v3330_v33 }
0x1104   :  { %5843 = vmatmul.mubr.msk.f32.gmra.mxu0 %vm186_vm3, %v3445_v60  ;;  %5849 = vmatprep.mubr.msk.f32.mxu1 %vm6486_vm1, %v6485_v2 }
0x1105   :  { %5868 = vmatprep.mubr.msk.f32.mxu0 %vm6486_vm1, %v6485_v2 }
0x1107   :  { %5850 = vmatmul.mubr.msk.f32.vlgmr.msra.gmra.mxu1 %vm186_vm3, %v3437_v5 }
0x1108   :  { %5852 = vmatprep.mubr.msk.f32.mxu1 %vm6486_vm1, %v6485_v2  ;;  %5884 = vmatpush3.msra.mxu1 %v7625_v41 }
0x1109   :  { %5885 = vmatprep.subr.mxu1 %v6485_v2 }
0x110a   :  { %5886 = vmatpush3.msra.mxu1 %v7639_v43 }
0x110b   :  { %5853 = vmatmul.mubr.msk.f32.gmra.mxu1 %vm186_vm3, %v3439_v4  ;;  %5921 = vmatprep.subr.mxu1 %v6485_v2 }
0x110c   :  { %5855 = vmatprep.mubr.msk.f32.mxu1 %vm6486_vm1, %v6485_v2 }
0x110f   :  { %5856 = vmatmul.mubr.msk.f32.gmra.mxu1 %vm186_vm3, %v3441_v6 }
0x1110   :  { %5858 = vmatprep.mubr.msk.f32.mxu1 %vm6486_vm1, %v6485_v2 }
0x1113   :  { %5859 = vmatmul.mubr.msk.f32.gmra.mxu1 %vm186_vm3, %v3443_v59 }
0x1114   :  { %5861 = vmatprep.mubr.msk.f32.mxu1 %vm6486_vm1, %v6485_v2 }
0x1117   :  { %5862 = vmatmul.mubr.msk.f32.gmra.mxu1 %vm186_vm3, %v3445_v60 }
0x1118   :  { %5887 = vmatprep.mubr.msk.f32.mxu1 %vm6486_vm1, %v6485_v2 }
0x11b1   :  { %v3407_v41 = vpop.f32.mrf.mxu1 }
0x11b2   :  { %v3522_v43 = vpop.f32.mrf.mxu0 }
0x11b3   :  { %v3523_v3 = vadd.f32 %v3522_v43, %v3407_v41  ;;  %v5813_v10 = vpop.f32.mrf.mxu1 }
0x11b4   :  { %v5832_v19 = vpop.f32.mrf.mxu0 }
0x11b5   :  { %v3546_v55 = vadd.f32 %v7661_v58, %v3523_v3  ;;  %v3412_v7 = vpop.f32.mrf.mxu1 }
0x11b6   :  { %v3527_v21 = vpop.f32.mrf.mxu0 }
0x11b7   :  { %v5215_v62 = vmul.f32 -1.442695, %v3546_v55  ;;  %v3528_v17 = vadd.f32 %v3527_v21, %v3412_v7  ;;  %v5816_v23 = vpop.f32.mrf.mxu1  ;;  %v3679_v21 = vld [vmem:[#allocation2 + $0x1e] sm:$0xff] }
0x11b8   :  { %v5835_v18 = vpop.f32.mrf.mxu0 }
0x11b9   :  { %6314 = vpow2.f32 %v5215_v62  ;;  %v3547_v25 = vadd.f32 %v7661_v58, %v3528_v17  ;;  %v3417_v9 = vpop.f32.mrf.mxu1 }
0x11ba   :  { %v3532_v36 = vpop.f32.mrf.mxu0 }
0x11bb   :  { %v5216_v14 = vmul.f32 -1.442695, %v3547_v25  ;;  %v3533_v30 = vadd.f32 %v3532_v36, %v3417_v9  ;;  %v5819_v29 = vpop.f32.mrf.mxu1  ;;  %v3680_v9 = vld [vmem:[#allocation2 + $0x26] sm:$0xff] }
0x11bc   :  { %v5838_v37 = vpop.f32.mrf.mxu0 }
0x11bd   :  { %6316 = vpow2.f32 %v5216_v14  ;;  %v3548_v34 = vadd.f32 %v7661_v58, %v3533_v30  ;;  %v3422_v50 = vpop.f32.mrf.mxu1 }
0x11be   :  { %v3537_v8 = vpop.f32.mrf.mxu0 }
0x11bf   :  { %v5217_v22 = vmul.f32 -1.442695, %v3548_v34  ;;  %v3538_v46 = vadd.f32 %v3537_v8, %v3422_v50  ;;  %v5822_v24 = vpop.f32.mrf.mxu1 }
0x11c0   :  { %v5841_v56 = vpop.f32.mrf.mxu0 }
0x11c1   :  { %6318 = vpow2.f32 %v5217_v22  ;;  %v3549_v11 = vadd.f32 %v7661_v58, %v3538_v46 }
0x11c3   :  { %v5218_v61 = vmul.f32 -1.442695, %v3549_v11  ;;  %v3427_v51 = vpop.f32.mrf.mxu1 }
0x11c4   :  { %v3542_v48 = vpop.f32.mrf.mxu0 }
0x11c5   :  { %6320 = vpow2.f32 %v5218_v61  ;;  %v3543_v40 = vadd.f32 %v3542_v48, %v3427_v51  ;;  %v5825_v28 = vpop.f32.mrf.mxu1 }
0x11c6   :  { %v6315_v53 = vpop.eup %6314  ;;  %v5844_v54 = vpop.f32.mrf.mxu0 }
0x11c7   :  { %v3566_v35 = vadd.f32 1.0, %v6315_v53  ;;  %v3550_v32 = vadd.f32 %v7661_v58, %v3543_v40  ;;  %v3747_v47 = vpop.f32.mrf.mxu1  ;;  %v3678_v58 = vld [vmem:[#allocation2 + $0x16] sm:$0xff] }
0x11c8   :  { %v3771_v12 = vadd.f32 %v3747_v47, %v3676_v45 }
0x11c9   :  { %6322 = vrcp.f32 %v3566_v35  ;;  %v5219_v39 = vmul.f32 -1.442695, %v3550_v32  ;;  %v5851_v27 = vpop.f32.mrf.mxu1 }
0x11ca   :  { %v6317_v5 = vpop.eup %6316  ;;  %v5230_v0 = vmul.f32 -1.442695, %v3771_v12 }
0x11cb   :  { %v3567_v4 = vadd.f32 1.0, %v6317_v5  ;;  %6324 = vpow2.f32 %v5219_v39  ;;  %v3752_v6 = vpop.f32.mrf.mxu1 }
0x11cc   :  { %6326 = vpow2.f32 %v5230_v0  ;;  %v3772_v49 = vadd.f32 %v3752_v6, %v3677_v38 }
0x11cd   :  { %6328 = vrcp.f32 %v3567_v4  ;;  %v5854_v59 = vpop.f32.mrf.mxu1 }
0x11ce   :  { %v6319_v33 = vpop.eup %6318  ;;  %v5231_v60 = vmul.f32 -1.442695, %v3772_v49 }
0x11cf   :  { %v3568_v41 = vadd.f32 1.0, %v6319_v33  ;;  %v3757_v43 = vpop.f32.mrf.mxu1 }
0x11d0   :  { %6330 = vpow2.f32 %v5231_v60  ;;  %v3773_v3 = vadd.f32 %v3757_v43, %v3678_v58 }
0x11d1   :  { %6332 = vrcp.f32 %v3568_v41  ;;  %v5857_v10 = vpop.f32.mrf.mxu1 }
0x11d2   :  { %v6321_v19 = vpop.eup %6320  ;;  %v5232_v55 = vmul.f32 -1.442695, %v3773_v3 }
0x11d3   :  { %v3569_v7 = vadd.f32 1.0, %v6321_v19  ;;  %v3762_v62 = vpop.f32.mrf.mxu1 }
0x11d4   :  { %6334 = vpow2.f32 %v5232_v55  ;;  %v3774_v17 = vadd.f32 %v3762_v62, %v3679_v21 }
0x11d5   :  { %6336 = vrcp.f32 %v3569_v7  ;;  %v5860_v23 = vpop.f32.mrf.mxu1 }
0x11d6   :  { %v7880_v18 = vpop.eup %6322  ;;  %v5233_v25 = vmul.f32 -1.442695, %v3774_v17 }
0x11d7   :  { %v3767_v36 = vpop.f32.mrf.mxu1  ;;  %v3581_v14 = vmul.f32 2.0, %v7880_v18 }
0x11d8   :  { %v6325_v30 = vpop.eup %6324  ;;  %6338 = vpow2.f32 %v5233_v25  ;;  %v3775_v29 = vadd.f32 %v3767_v36, %v3680_v9 }
0x11d9   :  { %v6327_v37 = vpop.eup %6326  ;;  %v3570_v34 = vadd.f32 1.0, %v6325_v30  ;;  %v5863_v50 = vpop.f32.mrf.mxu1  ;;  %v5220_v8 = vadd.f32 -1.0, %v3581_v14 }
0x11da   :  { %v7883_v22 = vpop.eup %6328  ;;  %v3791_v46 = vadd.f32 1.0, %v6327_v37  ;;  %v5234_v24 = vmul.f32 -1.442695, %v3775_v29 }
0x11db   :  { %6340 = vrcp.f32 %v3570_v34  ;;  %3601 = vrot.lane.b32.xlu0 %v5220_v8, %s6487_s3  ;;  %v3582_v56 = vmul.f32 2.0, %v7883_v22 }
0x11dc   :  { %6342 = vrcp.f32 %v3791_v46 }
0x11dd   :  { %v6331_v11 = vpop.eup %6330  ;;  %6344 = vpow2.f32 %v5234_v24  ;;  %v5221_v61 = vadd.f32 -1.0, %v3582_v56 }
0x11de   :  { %v7887_v51 = vpop.eup %6332  ;;  %v3792_v48 = vadd.f32 1.0, %v6331_v11 }
0x11df   :  { %3603 = vrot.lane.b32.xlu1 %v5221_v61, %s6487_s3  ;;  %v3583_v40 = vmul.f32 2.0, %v7887_v51 }
0x11e0   :  { %6346 = vrcp.f32 %v3792_v48 }
0x11e1   :  { %v6335_v28 = vpop.eup %6334  ;;  %v5222_v53 = vadd.f32 -1.0, %v3583_v40 }
0x11e2   :  { %v7891_v54 = vpop.eup %6336  ;;  %v3793_v35 = vadd.f32 1.0, %v6335_v28  ;;  %v3591_v28 = vmul.f32 %v7880_v18, %v7732_v31 }
0x11e3   :  { %3605 = vrot.lane.b32.xlu0 %v5222_v53, %s6487_s3  ;;  %v3584_v32 = vmul.f32 2.0, %v7891_v54  ;;  %v3594_v31 = vmul.f32 %v7891_v54, %v7762_v20 }
0x11e4   :  { %6348 = vrcp.f32 %v3793_v35 }
0x11e5   :  { %v6339_v45 = vpop.eup %6338  ;;  %v5223_v47 = vadd.f32 -1.0, %v3584_v32  ;;  %v3592_v32 = vmul.f32 %v7883_v22, %v7742_v15 }
0x11e6   :  { %v3794_v12 = vadd.f32 1.0, %v6339_v45 }
0x11e7   :  { %3607 = vrot.lane.b32.xlu1 %v5223_v47, %s6487_s3 }
0x11e8   :  { %v7896_v39 = vpop.eup %6340  ;;  %6350 = vrcp.f32 %v3794_v12  ;;  %v3593_v12 = vmul.f32 %v7887_v51, %v7752_v44 }
0x11e9   :  { %v7898_v27 = vpop.eup %6342  ;;  %v3585_v5 = vmul.f32 2.0, %v7896_v39 }
0x11ea   :  { %v6345_v0 = vpop.eup %6344  ;;  %v3806_v4 = vmul.f32 2.0, %v7898_v27 }
0x11eb   :  { %v3795_v38 = vadd.f32 1.0, %v6345_v0  ;;  %v5224_v6 = vadd.f32 -1.0, %v3585_v5 }
0x11ec   :  { %v5235_v49 = vadd.f32 -1.0, %v3806_v4 }
0x11ed   :  { %v7902_v59 = vpop.eup %6346  ;;  %6352 = vrcp.f32 %v3795_v38  ;;  %3609 = vrot.lane.b32.xlu0 %v5224_v6, %s6487_s3  ;;  %v3595_v6 = vmul.f32 %v7896_v39, %v7774_v16 }
0x11ee   :  { %3826 = vrot.lane.b32.xlu1 %v5235_v49, %s6487_s3  ;;  %v3807_v33 = vmul.f32 2.0, %v7902_v59  ;;  %v3816_v49 = vmul.f32 %v7898_v27, %v7734_v57  ;;  %v3817_v16 = vmul.f32 %v7902_v59, %v7744_v13 }
0x11f0   :  { %v5236_v60 = vadd.f32 -1.0, %v3807_v33 }
0x11f1   :  { %v7907_v41 = vpop.eup %6348 }
0x11f2   :  { %3828 = vrot.lane.b32.xlu0 %v5236_v60, %s6487_s3  ;;  %v3808_v58 = vmul.f32 2.0, %v7907_v41  ;;  %v3818_v57 = vmul.f32 %v7907_v41, %v7754_v52 }
0x11f4   :  { %v5237_v43 = vadd.f32 -1.0, %v3808_v58 }
0x11f5   :  { %v7911_v3 = vpop.eup %6350 }
0x11f6   :  { %3830 = vrot.lane.b32.xlu1 %v5237_v43, %s6487_s3  ;;  %v3809_v10 = vmul.f32 2.0, %v7911_v3  ;;  %v3819_v13 = vmul.f32 %v7911_v3, %v7764_v42 }
0x11f8   :  { %v5238_v19 = vadd.f32 -1.0, %v3809_v10 }
0x11fa   :  { %v7915_v55 = vpop.eup %6352  ;;  %3832 = vrot.lane.b32.xlu0 %v5238_v19, %s6487_s3 }
0x11fb   :  { %v3810_v7 = vmul.f32 2.0, %v7915_v55  ;;  %v3820_v52 = vmul.f32 %v7915_v55, %v7776_v26 }
0x11fd   :  { %v5239_v21 = vadd.f32 -1.0, %v3810_v7 }
0x11ff   :  { %3834 = vrot.lane.b32.xlu1 %v5239_v21, %s6487_s3 }
0x124d   :  { %v3602_v62 = vpop.permute.xlu0 %3601 }
0x124e   :  { %v3616_v17 = vmul.f32 %v7880_v18, %v3602_v62 }
0x1250   :  { %3626 = vrot.lane.b32.xlu0 %v3616_v17, %s6488_s18 }
0x1251   :  { %v3604_v23 = vpop.permute.xlu1 %3603 }
0x1252   :  { %v3617_v25 = vmul.f32 %v7883_v22, %v3604_v23 }
0x1254   :  { %3628 = vrot.lane.b32.xlu1 %v3617_v25, %s6488_s18 }
0x1255   :  { %v3606_v9 = vpop.permute.xlu0 %3605 }
0x1256   :  { %v3618_v36 = vmul.f32 %v7887_v51, %v3606_v9 }
0x1258   :  { %3630 = vrot.lane.b32.xlu0 %v3618_v36, %s6488_s18 }
0x1259   :  { %v3608_v14 = vpop.permute.xlu1 %3607 }
0x125a   :  { %v3619_v30 = vmul.f32 %v7891_v54, %v3608_v14 }
0x125c   :  { %3632 = vrot.lane.b32.xlu1 %v3619_v30, %s6488_s18 }
0x125f   :  { %v3610_v29 = vpop.permute.xlu0 %3609 }
0x1260   :  { %v3620_v37 = vmul.f32 %v7896_v39, %v3610_v29  ;;  %v3827_v34 = vpop.permute.xlu1 %3826 }
0x1261   :  { %v3841_v50 = vmul.f32 %v7898_v27, %v3827_v34 }
0x1262   :  { %3634 = vrot.lane.b32.xlu0 %v3620_v37, %s6488_s18 }
0x1263   :  { %3851 = vrot.lane.b32.xlu1 %v3841_v50, %s6488_s18 }
0x1264   :  { %v3829_v8 = vpop.permute.xlu0 %3828 }
0x1265   :  { %v3842_v46 = vmul.f32 %v7902_v59, %v3829_v8 }
0x1267   :  { %3853 = vrot.lane.b32.xlu0 %v3842_v46, %s6488_s18 }
0x1268   :  { %v3831_v24 = vpop.permute.xlu1 %3830 }
0x1269   :  { %v3843_v56 = vmul.f32 %v7907_v41, %v3831_v24 }
0x126b   :  { %3855 = vrot.lane.b32.xlu1 %v3843_v56, %s6488_s18 }
0x126c   :  { %v3833_v11 = vpop.permute.xlu0 %3832 }
0x126d   :  { %v3844_v61 = vmul.f32 %v7911_v3, %v3833_v11 }
0x126f   :  { %3857 = vrot.lane.b32.xlu0 %v3844_v61, %s6488_s18 }
0x1271   :  { %v3835_v48 = vpop.permute.xlu1 %3834 }
0x1272   :  { %v3845_v40 = vmul.f32 %v7915_v55, %v3835_v48 }
0x1274   :  { %3859 = vrot.lane.b32.xlu1 %v3845_v40, %s6488_s18 }
0x12c2   :  { %v3627_v53 = vpop.permute.xlu0 %3626 }
0x12c3   :  { %v7942_v35 = vadd.f32 %v3627_v53, %v3591_v28 }
0x12c5   :  { %6354 = vtanh.f32 %v7942_v35 }
0x12c6   :  { %v3629_v45 = vpop.permute.xlu1 %3628 }
0x12c7   :  { %v7947_v47 = vadd.f32 %v3629_v45, %v3592_v32 }
0x12c9   :  { %6356 = vtanh.f32 %v7947_v47 }
0x12ca   :  { %v3631_v5 = vpop.permute.xlu0 %3630 }
0x12cb   :  { %v7952_v0 = vadd.f32 %v3631_v5, %v3593_v12  ;;  %v6481_v5 = vld [vmem:[%s8372_s5] sm:$0xff] }
0x12cd   :  { %6358 = vtanh.f32 %v7952_v0 }
0x12ce   :  { %v3633_v4 = vpop.permute.xlu1 %3632 }
0x12cf   :  { %v7957_v38 = vadd.f32 %v3633_v4, %v3594_v31  ;;  %v6482_v31 = vld [vmem:[%s8373_s4 + $0x8] sm:$0xff] }
0x12d1   :  { %6360 = vtanh.f32 %v7957_v38 }
0x12d2   :  { %v6355_v15 = vpop.eup %6354 }
0x12d3   :  { %3656 = vrot.lane.b32.xlu0 %v6355_v15, %s6489_s25  ;;  %v6483_v15 = vld [vmem:[%s8373_s4] sm:$0xff] }
0x12d4   :  { %v3635_v44 = vpop.permute.xlu0 %3634 }
0x12d5   :  { %v7965_v33 = vadd.f32 %v3635_v44, %v3595_v6  ;;  %v3852_v60 = vpop.permute.xlu1 %3851 }
0x12d6   :  { %v6357_v58 = vpop.eup %6356  ;;  %v7967_v20 = vadd.f32 %v3852_v60, %v3816_v49 }
0x12d7   :  { %6362 = vtanh.f32 %v7965_v33  ;;  %3658 = vrot.lane.b32.xlu1 %v6357_v58, %s6489_s25 }
0x12d8   :  { %6364 = vtanh.f32 %v7967_v20 }
0x12d9   :  { %v3854_v43 = vpop.permute.xlu0 %3853 }
0x12da   :  { %v6359_v10 = vpop.eup %6358  ;;  %v7974_v19 = vadd.f32 %v3854_v43, %v3817_v16 }
0x12db   :  { %3660 = vrot.lane.b32.xlu0 %v6359_v10, %s6489_s25 }
0x12dc   :  { %6366 = vtanh.f32 %v7974_v19 }
0x12dd   :  { %v3856_v7 = vpop.permute.xlu1 %3855 }
0x12de   :  { %v6361_v21 = vpop.eup %6360  ;;  %v7980_v62 = vadd.f32 %v3856_v7, %v3818_v57 }
0x12df   :  { %3662 = vrot.lane.b32.xlu1 %v6361_v21, %s6489_s25 }
0x12e0   :  { %6368 = vtanh.f32 %v7980_v62 }
0x12e1   :  { %v3858_v17 = vpop.permute.xlu0 %3857 }
0x12e2   :  { %v7986_v23 = vadd.f32 %v3858_v17, %v3819_v13 }
0x12e4   :  { %v6363_v25 = vpop.eup %6362  ;;  %6370 = vtanh.f32 %v7986_v23 }
0x12e5   :  { %v6365_v9 = vpop.eup %6364  ;;  %3664 = vrot.lane.b32.xlu0 %v6363_v25, %s6489_s25 }
0x12e6   :  { %v3860_v36 = vpop.permute.xlu1 %3859  ;;  %3881 = vrot.lane.b32.xlu1 %v6365_v9, %s6489_s25 }
0x12e7   :  { %v7993_v14 = vadd.f32 %v3860_v36, %v3820_v52  ;;  %v8087_v52 = vld [vmem:[%s8374_s6] ss:$0 sm:$0xff] }
0x12e9   :  { %v6367_v30 = vpop.eup %6366  ;;  %6372 = vtanh.f32 %v7993_v14 }
0x12ea   :  { %3883 = vrot.lane.b32.xlu0 %v6367_v30, %s6489_s25  ;;  %v4261_v30 = vld [vmem:[#allocation2 + $0x7] sm:$0xff] }
0x12ed   :  { %v6369_v42 = vpop.eup %6368 }
0x12ee   :  { %3885 = vrot.lane.b32.xlu1 %v6369_v42, %s6489_s25 }
0x12f1   :  { %v6371_v29 = vpop.eup %6370 }
0x12f2   :  { %3887 = vrot.lane.b32.xlu0 %v6371_v29, %s6489_s25 }
0x12f6   :  { %v6373_v37 = vpop.eup %6372 }
0x12f7   :  { %3889 = vrot.lane.b32.xlu1 %v6373_v37, %s6489_s25 }
0x1345   :  { %v3657_v26 = vpop.permute.xlu0 %3656 }
0x1346   :  { %v3671_v34 = vmul.f32 %v7880_v18, %v3657_v26 }
0x1348   :  { %3906 = vrot.lane.b32.xlu0 %v3671_v34, %s6490_s28 }
0x1349   :  { %v3659_v50 = vpop.permute.xlu1 %3658 }
0x134a   :  { %v3672_v8 = vmul.f32 %v7883_v22, %v3659_v50 }
0x134c   :  { %3908 = vrot.lane.b32.xlu1 %v3672_v8, %s6490_s28 }
0x134d   :  { %v3661_v46 = vpop.permute.xlu0 %3660 }
0x134e   :  { %v3673_v24 = vmul.f32 %v7887_v51, %v3661_v46 }
0x1350   :  { %3910 = vrot.lane.b32.xlu0 %v3673_v24, %s6490_s28 }
0x1351   :  { %v3663_v56 = vpop.permute.xlu1 %3662 }
0x1352   :  { %v3674_v11 = vmul.f32 %v7891_v54, %v3663_v56  ;;  %v4262_v56 = vld [vmem:[#allocation2 + $0xf] sm:$0xff] }
0x1354   :  { %3912 = vrot.lane.b32.xlu1 %v3674_v11, %s6490_s28 }
0x1357   :  { %v3665_v61 = vpop.permute.xlu0 %3664 }
0x1358   :  { %v3675_v18 = vmul.f32 %v7896_v39, %v3665_v61  ;;  %v3882_v48 = vpop.permute.xlu1 %3881 }
0x1359   :  { %v3896_v40 = vmul.f32 %v7898_v27, %v3882_v48 }
0x135a   :  { %3914 = vrot.lane.b32.xlu0 %v3675_v18, %s6490_s28 }
0x135b   :  { %4021 = vrot.lane.b32.xlu1 %v3896_v40, %s6490_s28 }
0x135c   :  { %v3884_v22 = vpop.permute.xlu0 %3883 }
0x135d   :  { %v3897_v51 = vmul.f32 %v7902_v59, %v3884_v22 }
0x135f   :  { %4023 = vrot.lane.b32.xlu0 %v3897_v51, %s6490_s28 }
0x1360   :  { %v3886_v28 = vpop.permute.xlu1 %3885 }
0x1361   :  { %v3898_v54 = vmul.f32 %v7907_v41, %v3886_v28 }
0x1363   :  { %4025 = vrot.lane.b32.xlu1 %v3898_v54, %s6490_s28 }
0x1364   :  { %v3888_v53 = vpop.permute.xlu0 %3887 }
0x1365   :  { %v3899_v39 = vmul.f32 %v7911_v3, %v3888_v53  ;;  %v4263_v53 = vld [vmem:[#allocation2 + $0x17] sm:$0xff] }
0x1367   :  { %4027 = vrot.lane.b32.xlu0 %v3899_v39, %s6490_s28 }
0x1369   :  { %v3890_v27 = vpop.permute.xlu1 %3889 }
0x136a   :  { %v3900_v32 = vmul.f32 %v7915_v55, %v3890_v27  ;;  %v6480_v55 = vld [vmem:[%s8372_s5 + $0x8] sm:$0xff] }
0x136c   :  { %4029 = vrot.lane.b32.xlu1 %v3900_v32, %s6490_s28 }
0x13ba   :  { %v3907_v45 = vpop.permute.xlu0 %3906 }
0x13bb   :  { %5869 = vmatmul.mubr.msk.f32.vlgmr.msra.gmra.mxu0 %vm186_vm3, %v3907_v45 }
0x13bc   :  { %5903 = vmatpush3.msra.mxu0 %v7813_v1  ;;  %5871 = vmatprep.mubr.msk.f32.mxu0 %vm6486_vm1, %v6485_v2 }
0x13bd   :  { %5904 = vmatprep.subr.mxu0 %v6485_v2 }
0x13be   :  { %v3909_v59 = vpop.permute.xlu1 %3908  ;;  %5905 = vmatpush3.msra.mxu0 %v7832_v63 }
0x13bf   :  { %5872 = vmatmul.mubr.msk.f32.gmra.mxu0 %vm186_vm3, %v3909_v59  ;;  %5940 = vmatprep.subr.mxu0 %v6485_v2 }
0x13c0   :  { %5874 = vmatprep.mubr.msk.f32.mxu0 %vm6486_vm1, %v6485_v2 }
0x13c2   :  { %v3911_v41 = vpop.permute.xlu0 %3910 }
0x13c3   :  { %5875 = vmatmul.mubr.msk.f32.gmra.mxu0 %vm186_vm3, %v3911_v41 }
0x13c4   :  { %5877 = vmatprep.mubr.msk.f32.mxu0 %vm6486_vm1, %v6485_v2 }
0x13c6   :  { %v3913_v1 = vpop.permute.xlu1 %3912 }
0x13c7   :  { %5878 = vmatmul.mubr.msk.f32.gmra.mxu0 %vm186_vm3, %v3913_v1 }
0x13c8   :  { %5880 = vmatprep.mubr.msk.f32.mxu0 %vm6486_vm1, %v6485_v2 }
0x13cc   :  { %v3915_v63 = vpop.permute.xlu0 %3914 }
0x13cd   :  { %5881 = vmatmul.mubr.msk.f32.gmra.mxu0 %vm186_vm3, %v3915_v63  ;;  %v4022_v3 = vpop.permute.xlu1 %4021 }
0x13ce   :  { %5888 = vmatmul.mubr.msk.f32.vlgmr.msra.gmra.mxu1 %vm186_vm3, %v4022_v3  ;;  %5906 = vmatprep.mubr.msk.f32.mxu0 %vm6486_vm1, %v6485_v2 }
0x13cf   :  { %5890 = vmatprep.mubr.msk.f32.mxu1 %vm6486_vm1, %v6485_v2  ;;  %5922 = vmatpush3.msra.mxu1 %v6480_v55  ;;  %v4264_v55 = vld [vmem:[#allocation2 + $0x1f] sm:$0xff] }
0x13d0   :  { %5923 = vmatprep.subr.mxu1 %v6485_v2 }
0x13d1   :  { %5907 = vmatmul.mubr.msk.f32.vlgmr.msra.gmra.mxu0 %vm186_vm3, %v4022_v3  ;;  %v4024_v12 = vpop.permute.xlu0 %4023  ;;  %5924 = vmatpush3.msra.mxu1 %v6481_v5 }
0x13d2   :  { %5891 = vmatmul.mubr.msk.f32.gmra.mxu1 %vm186_vm3, %v4024_v12  ;;  %5909 = vmatprep.mubr.msk.f32.mxu0 %vm6486_vm1, %v6485_v2 }
0x13d3   :  { %5893 = vmatprep.mubr.msk.f32.mxu1 %vm6486_vm1, %v6485_v2  ;;  %5941 = vmatpush3.msra.mxu0 %v6482_v31 }
0x13d4   :  { %5942 = vmatprep.subr.mxu0 %v6485_v2  ;;  %5959 = vmatprep.subr.mxu1 %v6485_v2 }
0x13d5   :  { %5910 = vmatmul.mubr.msk.f32.gmra.mxu0 %vm186_vm3, %v4024_v12  ;;  %v4026_v4 = vpop.permute.xlu1 %4025 }
0x13d6   :  { %5894 = vmatmul.mubr.msk.f32.gmra.mxu1 %vm186_vm3, %v4026_v4  ;;  %5912 = vmatprep.mubr.msk.f32.mxu0 %vm6486_vm1, %v6485_v2 }
0x13d7   :  { %5896 = vmatprep.mubr.msk.f32.mxu1 %vm6486_vm1, %v6485_v2  ;;  %5943 = vmatpush3.msra.mxu0 %v6483_v15 }
0x13d9   :  { %5913 = vmatmul.mubr.msk.f32.gmra.mxu0 %vm186_vm3, %v4026_v4  ;;  %v4028_v6 = vpop.permute.xlu0 %4027 }
0x13da   :  { %5897 = vmatmul.mubr.msk.f32.gmra.mxu1 %vm186_vm3, %v4028_v6  ;;  %5915 = vmatprep.mubr.msk.f32.mxu0 %vm6486_vm1, %v6485_v2 }
0x13db   :  { %5899 = vmatprep.mubr.msk.f32.mxu1 %vm6486_vm1, %v6485_v2 }
0x13dd   :  { %5916 = vmatmul.mubr.msk.f32.gmra.mxu0 %vm186_vm3, %v4028_v6 }
0x13de   :  { %v4030_v44 = vpop.permute.xlu1 %4029  ;;  %5918 = vmatprep.mubr.msk.f32.mxu0 %vm6486_vm1, %v6485_v2 }
0x13df   :  { %5900 = vmatmul.mubr.msk.f32.gmra.mxu1 %vm186_vm3, %v4030_v44 }
0x13e0   :  { %5925 = vmatprep.mubr.msk.f32.mxu1 %vm6486_vm1, %v6485_v2 }
0x13e1   :  { %5919 = vmatmul.mubr.msk.f32.gmra.mxu0 %vm186_vm3, %v4030_v44 }
0x13e2   :  { %5944 = vmatprep.mubr.msk.f32.mxu0 %vm6486_vm1, %v6485_v2 }
0x147b   :  { %v3992_v49 = vpop.f32.mrf.mxu0 }
0x147d   :  { %v5870_v60 = vpop.f32.mrf.mxu0 }
0x147e   :  { %v4265_v60 = vld [vmem:[#allocation2 + $0x27] sm:$0xff] }
0x147f   :  { %v3997_v58 = vpop.f32.mrf.mxu0 }
0x1481   :  { %v5873_v16 = vpop.f32.mrf.mxu0 }
0x1483   :  { %v4002_v43 = vpop.f32.mrf.mxu0 }
0x1485   :  { %v5876_v10 = vpop.f32.mrf.mxu0 }
0x1487   :  { %v4007_v57 = vpop.f32.mrf.mxu0 }
0x1489   :  { %v5879_v7 = vpop.f32.mrf.mxu0 }
0x148d   :  { %v4012_v21 = vpop.f32.mrf.mxu0 }
0x148e   :  { %v4107_v13 = vpop.f32.mrf.mxu1 }
0x148f   :  { %v5882_v17 = vpop.f32.mrf.mxu0  ;;  %v4108_v25 = vadd.f32 %v4107_v13, %v3992_v49 }
0x1490   :  { %v5889_v9 = vpop.f32.mrf.mxu1 }
0x1491   :  { %v4131_v36 = vadd.f32 %v8087_v52, %v4108_v25  ;;  %v4332_v42 = vpop.f32.mrf.mxu0 }
0x1492   :  { %v4356_v29 = vadd.f32 %v4332_v42, %v4261_v30  ;;  %v4112_v37 = vpop.f32.mrf.mxu1 }
0x1493   :  { %v5250_v26 = vmul.f32 -1.442695, %v4131_v36  ;;  %v4113_v34 = vadd.f32 %v4112_v37, %v3997_v58  ;;  %v5908_v50 = vpop.f32.mrf.mxu0 }
0x1494   :  { %v5265_v8 = vmul.f32 -1.442695, %v4356_v29  ;;  %v5892_v46 = vpop.f32.mrf.mxu1 }
0x1495   :  { %6374 = vpow2.f32 %v5250_v26  ;;  %v4132_v24 = vadd.f32 %v8087_v52, %v4113_v34  ;;  %v4337_v11 = vpop.f32.mrf.mxu0 }
0x1496   :  { %6376 = vpow2.f32 %v5265_v8  ;;  %v4357_v61 = vadd.f32 %v4337_v11, %v4262_v56  ;;  %v4117_v18 = vpop.f32.mrf.mxu1 }
0x1497   :  { %v5251_v48 = vmul.f32 -1.442695, %v4132_v24  ;;  %v4118_v40 = vadd.f32 %v4117_v18, %v4002_v43  ;;  %v5911_v22 = vpop.f32.mrf.mxu0 }
0x1498   :  { %v5266_v51 = vmul.f32 -1.442695, %v4357_v61  ;;  %v5895_v28 = vpop.f32.mrf.mxu1 }
0x1499   :  { %6378 = vpow2.f32 %v5251_v48  ;;  %v4133_v54 = vadd.f32 %v8087_v52, %v4118_v40  ;;  %v4342_v39 = vpop.f32.mrf.mxu0 }
0x149a   :  { %6380 = vpow2.f32 %v5266_v51  ;;  %v4358_v27 = vadd.f32 %v4342_v39, %v4263_v53  ;;  %v4122_v32 = vpop.f32.mrf.mxu1 }
0x149b   :  { %v5252_v45 = vmul.f32 -1.442695, %v4133_v54  ;;  %v4123_v59 = vadd.f32 %v4122_v32, %v4007_v57  ;;  %v5914_v41 = vpop.f32.mrf.mxu0 }
0x149c   :  { %v5267_v1 = vmul.f32 -1.442695, %v4358_v27  ;;  %v5898_v63 = vpop.f32.mrf.mxu1 }
0x149d   :  { %6382 = vpow2.f32 %v5252_v45  ;;  %v4134_v3 = vadd.f32 %v8087_v52, %v4123_v59  ;;  %v4347_v12 = vpop.f32.mrf.mxu0 }
0x149e   :  { %6384 = vpow2.f32 %v5267_v1  ;;  %v4359_v5 = vadd.f32 %v4347_v12, %v4264_v55 }
0x149f   :  { %v5253_v31 = vmul.f32 -1.442695, %v4134_v3  ;;  %v4127_v4 = vpop.f32.mrf.mxu1  ;;  %v5917_v15 = vpop.f32.mrf.mxu0 }
0x14a0   :  { %v5268_v6 = vmul.f32 -1.442695, %v4359_v5  ;;  %v4128_v44 = vadd.f32 %v4127_v4, %v4012_v21 }
0x14a1   :  { %6386 = vpow2.f32 %v5253_v31  ;;  %v5901_v49 = vpop.f32.mrf.mxu1  ;;  %v4352_v58 = vpop.f32.mrf.mxu0 }
0x14a2   :  { %v6375_v16 = vpop.eup %6374  ;;  %6388 = vpow2.f32 %v5268_v6  ;;  %v4135_v43 = vadd.f32 %v8087_v52, %v4128_v44  ;;  %v4360_v10 = vadd.f32 %v4352_v58, %v4265_v60 }
0x14a3   :  { %v6377_v57 = vpop.eup %6376  ;;  %v4151_v7 = vadd.f32 1.0, %v6375_v16  ;;  %v5920_v13 = vpop.f32.mrf.mxu0 }
0x14a4   :  { %v4376_v17 = vadd.f32 1.0, %v6377_v57  ;;  %v5254_v25 = vmul.f32 -1.442695, %v4135_v43  ;;  %v5269_v9 = vmul.f32 -1.442695, %v4360_v10 }
0x14a5   :  { %6390 = vrcp.f32 %v4151_v7 }
0x14a6   :  { %v6379_v36 = vpop.eup %6378  ;;  %6392 = vrcp.f32 %v4376_v17 }
0x14a7   :  { %v6381_v30 = vpop.eup %6380  ;;  %v4152_v21 = vadd.f32 1.0, %v6379_v36  ;;  %6394 = vpow2.f32 %v5254_v25 }
0x14a8   :  { %v4377_v42 = vadd.f32 1.0, %v6381_v30  ;;  %6396 = vpow2.f32 %v5269_v9 }
0x14a9   :  { %6398 = vrcp.f32 %v4152_v21 }
0x14aa   :  { %v6383_v29 = vpop.eup %6382  ;;  %6400 = vrcp.f32 %v4377_v42 }
0x14ab   :  { %v6385_v37 = vpop.eup %6384  ;;  %v4153_v26 = vadd.f32 1.0, %v6383_v29 }
0x14ac   :  { %v4378_v34 = vadd.f32 1.0, %v6385_v37 }
0x14ad   :  { %6402 = vrcp.f32 %v4153_v26 }
0x14ae   :  { %v6387_v50 = vpop.eup %6386  ;;  %6404 = vrcp.f32 %v4378_v34 }
0x14af   :  { %v6389_v8 = vpop.eup %6388  ;;  %v4154_v46 = vadd.f32 1.0, %v6387_v50 }
0x14b0   :  { %v4379_v24 = vadd.f32 1.0, %v6389_v8 }
0x14b1   :  { %6406 = vrcp.f32 %v4154_v46 }
0x14b2   :  { %v8094_v56 = vpop.eup %6390  ;;  %6408 = vrcp.f32 %v4379_v24 }
0x14b3   :  { %v8096_v11 = vpop.eup %6392  ;;  %v4166_v61 = vmul.f32 2.0, %v8094_v56 }
0x14b4   :  { %v6395_v18 = vpop.eup %6394  ;;  %v4391_v48 = vmul.f32 2.0, %v8096_v11 }
0x14b5   :  { %v6397_v40 = vpop.eup %6396  ;;  %v4155_v22 = vadd.f32 1.0, %v6395_v18  ;;  %v5255_v51 = vadd.f32 -1.0, %v4166_v61 }
0x14b6   :  { %v8100_v28 = vpop.eup %6398  ;;  %v4380_v54 = vadd.f32 1.0, %v6397_v40  ;;  %v5270_v53 = vadd.f32 -1.0, %v4391_v48  ;;  %v4176_v48 = vmul.f32 %v8094_v56, %v7942_v35  ;;  %v4401_v40 = vmul.f32 %v8096_v11, %v7967_v20 }
0x14b7   :  { %v8102_v39 = vpop.eup %6400  ;;  %6410 = vrcp.f32 %v4155_v22  ;;  %4186 = vrot.lane.b32.xlu0 %v5255_v51, %s6487_s3  ;;  %v4167_v27 = vmul.f32 2.0, %v8100_v28 }
0x14b8   :  { %6412 = vrcp.f32 %v4380_v54  ;;  %4411 = vrot.lane.b32.xlu1 %v5270_v53, %s6487_s3  ;;  %v4392_v32 = vmul.f32 2.0, %v8102_v39 }
0x14b9   :  { %v5256_v45 = vadd.f32 -1.0, %v4167_v27  ;;  %v4177_v27 = vmul.f32 %v8100_v28, %v7947_v47 }
0x14ba   :  { %v8108_v59 = vpop.eup %6402  ;;  %v5271_v41 = vadd.f32 -1.0, %v4392_v32  ;;  %v4402_v32 = vmul.f32 %v8102_v39, %v7974_v19 }
0x14bb   :  { %v8110_v1 = vpop.eup %6404  ;;  %4188 = vrot.lane.b32.xlu0 %v5256_v45, %s6487_s3  ;;  %v4168_v63 = vmul.f32 2.0, %v8108_v59  ;;  %v4178_v20 = vmul.f32 %v8108_v59, %v7952_v0 }
0x14bc   :  { %4413 = vrot.lane.b32.xlu1 %v5271_v41, %s6487_s3  ;;  %v4393_v3 = vmul.f32 2.0, %v8110_v1 }
0x14bd   :  { %v5257_v55 = vadd.f32 -1.0, %v4168_v63 }
0x14be   :  { %v8116_v12 = vpop.eup %6406  ;;  %v5272_v5 = vadd.f32 -1.0, %v4393_v3  ;;  %v4403_v3 = vmul.f32 %v8110_v1, %v7980_v62 }
0x14bf   :  { %v8118_v31 = vpop.eup %6408  ;;  %4190 = vrot.lane.b32.xlu0 %v5257_v55, %s6487_s3  ;;  %v4169_v4 = vmul.f32 2.0, %v8116_v12  ;;  %v4179_v19 = vmul.f32 %v8116_v12, %v7957_v38 }
0x14c0   :  { %4415 = vrot.lane.b32.xlu1 %v5272_v5, %s6487_s3  ;;  %v4394_v15 = vmul.f32 2.0, %v8118_v31 }
0x14c1   :  { %v5258_v6 = vadd.f32 -1.0, %v4169_v4 }
0x14c2   :  { %v5273_v44 = vadd.f32 -1.0, %v4394_v15  ;;  %v4404_v15 = vmul.f32 %v8118_v31, %v7986_v23 }
0x14c3   :  { %4192 = vrot.lane.b32.xlu0 %v5258_v6, %s6487_s3 }
0x14c4   :  { %v8125_v49 = vpop.eup %6410  ;;  %4417 = vrot.lane.b32.xlu1 %v5273_v44, %s6487_s3 }
0x14c5   :  { %v8128_v60 = vpop.eup %6412  ;;  %v4170_v58 = vmul.f32 2.0, %v8125_v49 }
0x14c6   :  { %v4395_v16 = vmul.f32 2.0, %v8128_v60  ;;  %v4405_v38 = vmul.f32 %v8128_v60, %v7993_v14 }
0x14c7   :  { %v5259_v43 = vadd.f32 -1.0, %v4170_v58 }
0x14c8   :  { %v5274_v10 = vadd.f32 -1.0, %v4395_v16 }
0x14c9   :  { %4194 = vrot.lane.b32.xlu0 %v5259_v43, %s6487_s3  ;;  %v4180_v43 = vmul.f32 %v8125_v49, %v7965_v33 }
0x14ca   :  { %4419 = vrot.lane.b32.xlu1 %v5274_v10, %s6487_s3 }
0x1529   :  { %v4187_v57 = vpop.permute.xlu0 %4186 }
0x152a   :  { %v4412_v7 = vpop.permute.xlu1 %4411  ;;  %v4201_v13 = vmul.f32 %v8094_v56, %v4187_v57 }
0x152b   :  { %v4426_v17 = vmul.f32 %v8096_v11, %v4412_v7 }
0x152c   :  { %4211 = vrot.lane.b32.xlu0 %v4201_v13, %s6488_s18 }
0x152d   :  { %4436 = vrot.lane.b32.xlu1 %v4426_v17, %s6488_s18  ;;  %v4189_v25 = vpop.permute.xlu0 %4188 }
0x152e   :  { %v4414_v9 = vpop.permute.xlu1 %4413  ;;  %v4202_v36 = vmul.f32 %v8100_v28, %v4189_v25 }
0x152f   :  { %v4427_v30 = vmul.f32 %v8102_v39, %v4414_v9 }
0x1530   :  { %4213 = vrot.lane.b32.xlu0 %v4202_v36, %s6488_s18 }
0x1531   :  { %4438 = vrot.lane.b32.xlu1 %v4427_v30, %s6488_s18  ;;  %v4191_v21 = vpop.permute.xlu0 %4190 }
0x1532   :  { %v4416_v42 = vpop.permute.xlu1 %4415  ;;  %v4203_v29 = vmul.f32 %v8108_v59, %v4191_v21 }
0x1533   :  { %v4428_v37 = vmul.f32 %v8110_v1, %v4416_v42 }
0x1534   :  { %4215 = vrot.lane.b32.xlu0 %v4203_v29, %s6488_s18 }
0x1535   :  { %4440 = vrot.lane.b32.xlu1 %v4428_v37, %s6488_s18  ;;  %v4193_v26 = vpop.permute.xlu0 %4192 }
0x1536   :  { %v4418_v34 = vpop.permute.xlu1 %4417  ;;  %v4204_v50 = vmul.f32 %v8116_v12, %v4193_v26 }
0x1537   :  { %v4429_v8 = vmul.f32 %v8118_v31, %v4418_v34 }
0x1538   :  { %4217 = vrot.lane.b32.xlu0 %v4204_v50, %s6488_s18 }
0x1539   :  { %4442 = vrot.lane.b32.xlu1 %v4429_v8, %s6488_s18 }
0x153b   :  { %v4195_v46 = vpop.permute.xlu0 %4194 }
0x153c   :  { %v4420_v24 = vpop.permute.xlu1 %4419  ;;  %v4205_v61 = vmul.f32 %v8125_v49, %v4195_v46 }
0x153d   :  { %v4430_v18 = vmul.f32 %v8128_v60, %v4420_v24 }
0x153e   :  { %4219 = vrot.lane.b32.xlu0 %v4205_v61, %s6488_s18 }
0x153f   :  { %4444 = vrot.lane.b32.xlu1 %v4430_v18, %s6488_s18 }
0x159e   :  { %v4212_v22 = vpop.permute.xlu0 %4211 }
0x159f   :  { %v4437_v51 = vpop.permute.xlu1 %4436  ;;  %v8158_v54 = vadd.f32 %v4212_v22, %v4176_v48 }
0x15a0   :  { %v4451_v53 = vadd.f32 %v4437_v51, %v4401_v40 }
0x15a1   :  { %6414 = vtanh.f32 %v8158_v54 }
0x15a2   :  { %6416 = vtanh.f32 %v4451_v53  ;;  %v4214_v45 = vpop.permute.xlu0 %4213 }
0x15a3   :  { %v4439_v41 = vpop.permute.xlu1 %4438  ;;  %v8165_v35 = vadd.f32 %v4214_v45, %v4177_v27 }
0x15a4   :  { %v4452_v63 = vadd.f32 %v4439_v41, %v4402_v32 }
0x15a5   :  { %6418 = vtanh.f32 %v8165_v35 }
0x15a6   :  { %6420 = vtanh.f32 %v4452_v63  ;;  %v4216_v55 = vpop.permute.xlu0 %4215 }
0x15a7   :  { %v4441_v47 = vpop.permute.xlu1 %4440  ;;  %v8172_v5 = vadd.f32 %v4216_v55, %v4178_v20 }
0x15a8   :  { %v4453_v4 = vadd.f32 %v4441_v47, %v4403_v3 }
0x15a9   :  { %6422 = vtanh.f32 %v8172_v5 }
0x15aa   :  { %6424 = vtanh.f32 %v4453_v4  ;;  %v4218_v6 = vpop.permute.xlu0 %4217 }
0x15ab   :  { %v4443_v0 = vpop.permute.xlu1 %4442  ;;  %v8179_v44 = vadd.f32 %v4218_v6, %v4179_v19 }
0x15ac   :  { %v4454_v58 = vadd.f32 %v4443_v0, %v4404_v15 }
0x15ad   :  { %6426 = vtanh.f32 %v8179_v44 }
0x15ae   :  { %v6415_v62 = vpop.eup %6414  ;;  %6428 = vtanh.f32 %v4454_v58 }
0x15af   :  { %v6417_v16 = vpop.eup %6416  ;;  %4241 = vrot.lane.b32.xlu0 %v6415_v62, %s6489_s25 }
0x15b0   :  { %v4220_v10 = vpop.permute.xlu0 %4219  ;;  %4466 = vrot.lane.b32.xlu1 %v6417_v16, %s6489_s25 }
0x15b1   :  { %v4445_v23 = vpop.permute.xlu1 %4444  ;;  %v8188_v57 = vadd.f32 %v4220_v10, %v4180_v43 }
0x15b2   :  { %v6419_v7 = vpop.eup %6418  ;;  %v4455_v13 = vadd.f32 %v4445_v23, %v4405_v38 }
0x15b3   :  { %v6421_v17 = vpop.eup %6420  ;;  %6430 = vtanh.f32 %v8188_v57  ;;  %4243 = vrot.lane.b32.xlu0 %v6419_v7, %s6489_s25 }
0x15b4   :  { %6432 = vtanh.f32 %v4455_v13  ;;  %4468 = vrot.lane.b32.xlu1 %v6421_v17, %s6489_s25 }
0x15b6   :  { %v6423_v33 = vpop.eup %6422 }
0x15b7   :  { %v6425_v25 = vpop.eup %6424  ;;  %4245 = vrot.lane.b32.xlu0 %v6423_v33, %s6489_s25 }
0x15b8   :  { %4470 = vrot.lane.b32.xlu1 %v6425_v25, %s6489_s25 }
0x15ba   :  { %v6427_v14 = vpop.eup %6426 }
0x15bb   :  { %v6429_v9 = vpop.eup %6428  ;;  %4247 = vrot.lane.b32.xlu0 %v6427_v14, %s6489_s25 }
0x15bc   :  { %4472 = vrot.lane.b32.xlu1 %v6429_v9, %s6489_s25 }
0x15c0   :  { %v6431_v36 = vpop.eup %6430 }
0x15c1   :  { %v6433_v30 = vpop.eup %6432  ;;  %4249 = vrot.lane.b32.xlu0 %v6431_v36, %s6489_s25 }
0x15c2   :  { %4474 = vrot.lane.b32.xlu1 %v6433_v30, %s6489_s25 }
0x1621   :  { %v4242_v21 = vpop.permute.xlu0 %4241 }
0x1622   :  { %v4467_v42 = vpop.permute.xlu1 %4466  ;;  %v4256_v29 = vmul.f32 %v8094_v56, %v4242_v21 }
0x1623   :  { %v4481_v37 = vmul.f32 %v8096_v11, %v4467_v42 }
0x1624   :  { %4491 = vrot.lane.b32.xlu0 %v4256_v29, %s6490_s28 }
0x1625   :  { %4606 = vrot.lane.b32.xlu1 %v4481_v37, %s6490_s28  ;;  %v4244_v26 = vpop.permute.xlu0 %4243 }
0x1626   :  { %v4469_v34 = vpop.permute.xlu1 %4468  ;;  %v4257_v50 = vmul.f32 %v8100_v28, %v4244_v26 }
0x1627   :  { %v4482_v8 = vmul.f32 %v8102_v39, %v4469_v34 }
0x1628   :  { %4493 = vrot.lane.b32.xlu0 %v4257_v50, %s6490_s28 }
0x1629   :  { %4608 = vrot.lane.b32.xlu1 %v4482_v8, %s6490_s28  ;;  %v4246_v46 = vpop.permute.xlu0 %4245 }
0x162a   :  { %v4471_v24 = vpop.permute.xlu1 %4470  ;;  %v4258_v56 = vmul.f32 %v8108_v59, %v4246_v46 }
0x162b   :  { %v4483_v11 = vmul.f32 %v8110_v1, %v4471_v24 }
0x162c   :  { %4495 = vrot.lane.b32.xlu0 %v4258_v56, %s6490_s28 }
0x162d   :  { %4610 = vrot.lane.b32.xlu1 %v4483_v11, %s6490_s28  ;;  %v4248_v61 = vpop.permute.xlu0 %4247 }
0x162e   :  { %v4473_v18 = vpop.permute.xlu1 %4472  ;;  %v4259_v28 = vmul.f32 %v8116_v12, %v4248_v61 }
0x162f   :  { %v4484_v39 = vmul.f32 %v8118_v31, %v4473_v18 }
0x1630   :  { %4497 = vrot.lane.b32.xlu0 %v4259_v28, %s6490_s28 }
0x1631   :  { %4612 = vrot.lane.b32.xlu1 %v4484_v39, %s6490_s28 }
0x1633   :  { %v4250_v48 = vpop.permute.xlu0 %4249 }
0x1634   :  { %v4475_v40 = vpop.permute.xlu1 %4474  ;;  %v4260_v59 = vmul.f32 %v8125_v49, %v4250_v48 }
0x1635   :  { %v4485_v1 = vmul.f32 %v8128_v60, %v4475_v40 }
0x1636   :  { %4499 = vrot.lane.b32.xlu0 %v4260_v59, %s6490_s28 }
0x1637   :  { %4614 = vrot.lane.b32.xlu1 %v4485_v1, %s6490_s28 }
0x1696   :  { %v4492_v22 = vpop.permute.xlu0 %4491 }
0x1697   :  { %v4607_v51 = vpop.permute.xlu1 %4606  ;;  %5926 = vmatmul.mubr.msk.f32.vlgmr.msra.gmra.mxu1 %vm186_vm3, %v4492_v22 }
0x1698   :  { %5945 = vmatmul.mubr.msk.f32.vlgmr.msra.gmra.mxu0 %vm186_vm3, %v4607_v51  ;;  %5928 = vmatprep.mubr.msk.f32.mxu1 %vm6486_vm1, %v6485_v2 }
0x1699   :  { %5947 = vmatprep.mubr.msk.f32.mxu0 %vm6486_vm1, %v6485_v2 }
0x169a   :  { %v4494_v12 = vpop.permute.xlu0 %4493 }
0x169b   :  { %v4609_v31 = vpop.permute.xlu1 %4608  ;;  %5929 = vmatmul.mubr.msk.f32.gmra.mxu1 %vm186_vm3, %v4494_v12 }
0x169c   :  { %5948 = vmatmul.mubr.msk.f32.gmra.mxu0 %vm186_vm3, %v4609_v31  ;;  %5931 = vmatprep.mubr.msk.f32.mxu1 %vm6486_vm1, %v6485_v2 }
0x169d   :  { %5950 = vmatprep.mubr.msk.f32.mxu0 %vm6486_vm1, %v6485_v2 }
0x169e   :  { %v4496_v49 = vpop.permute.xlu0 %4495 }
0x169f   :  { %v4611_v60 = vpop.permute.xlu1 %4610  ;;  %5932 = vmatmul.mubr.msk.f32.gmra.mxu1 %vm186_vm3, %v4496_v49 }
0x16a0   :  { %5951 = vmatmul.mubr.msk.f32.gmra.mxu0 %vm186_vm3, %v4611_v60  ;;  %5934 = vmatprep.mubr.msk.f32.mxu1 %vm6486_vm1, %v6485_v2 }
0x16a1   :  { %5953 = vmatprep.mubr.msk.f32.mxu0 %vm6486_vm1, %v6485_v2 }
0x16a2   :  { %v4498_v53 = vpop.permute.xlu0 %4497 }
0x16a3   :  { %v4613_v27 = vpop.permute.xlu1 %4612  ;;  %5935 = vmatmul.mubr.msk.f32.gmra.mxu1 %vm186_vm3, %v4498_v53 }
0x16a4   :  { %5954 = vmatmul.mubr.msk.f32.gmra.mxu0 %vm186_vm3, %v4613_v27  ;;  %5937 = vmatprep.mubr.msk.f32.mxu1 %vm6486_vm1, %v6485_v2 }
0x16a5   :  { %5956 = vmatprep.mubr.msk.f32.mxu0 %vm6486_vm1, %v6485_v2 }
0x16a8   :  { %v4500_v32 = vpop.permute.xlu0 %4499 }
0x16a9   :  { %v4615_v45 = vpop.permute.xlu1 %4614  ;;  %5938 = vmatmul.mubr.msk.f32.gmra.mxu1 %vm186_vm3, %v4500_v32 }
0x16aa   :  { %5957 = vmatmul.mubr.msk.f32.gmra.mxu0 %vm186_vm3, %v4615_v45  ;;  %5963 = vmatprep.mubr.msk.f32.mxu1 %vm6486_vm1, %v6485_v2 }
0x1757   :  { %v4577_v41 = vpop.f32.mrf.mxu1 }
0x1758   :  { %v4692_v63 = vpop.f32.mrf.mxu0 }
0x1759   :  { %v4693_v20 = vadd.f32 %v4692_v63, %v4577_v41  ;;  %v5927_v3 = vpop.f32.mrf.mxu1 }
0x175a   :  { %v5946_v55 = vpop.f32.mrf.mxu0 }
0x175b   :  { %v4716_v47 = vadd.f32 %v8087_v52, %v4693_v20  ;;  %v4582_v4 = vpop.f32.mrf.mxu1 }
0x175c   :  { %v4697_v19 = vpop.f32.mrf.mxu0 }
0x175d   :  { %v5285_v15 = vmul.f32 -1.442695, %v4716_v47  ;;  %v4698_v6 = vadd.f32 %v4697_v19, %v4582_v4  ;;  %v5930_v0 = vpop.f32.mrf.mxu1 }
0x175e   :  { %v5949_v58 = vpop.f32.mrf.mxu0 }
0x175f   :  { %6434 = vpow2.f32 %v5285_v15  ;;  %v4717_v62 = vadd.f32 %v8087_v52, %v4698_v6  ;;  %v4587_v16 = vpop.f32.mrf.mxu1 }
0x1760   :  { %v4702_v43 = vpop.f32.mrf.mxu0 }
0x1761   :  { %v5286_v38 = vmul.f32 -1.442695, %v4717_v62  ;;  %v4703_v10 = vadd.f32 %v4702_v43, %v4587_v16  ;;  %v5933_v23 = vpop.f32.mrf.mxu1 }
0x1762   :  { %v5952_v7 = vpop.f32.mrf.mxu0 }
0x1763   :  { %6436 = vpow2.f32 %v5286_v38  ;;  %v4718_v13 = vadd.f32 %v8087_v52, %v4703_v10  ;;  %v4592_v17 = vpop.f32.mrf.mxu1 }
0x1764   :  { %v4707_v33 = vpop.f32.mrf.mxu0 }
0x1765   :  { %v5287_v25 = vmul.f32 -1.442695, %v4718_v13  ;;  %v4708_v14 = vadd.f32 %v4707_v33, %v4592_v17  ;;  %v5936_v9 = vpop.f32.mrf.mxu1 }
0x1766   :  { %v5955_v36 = vpop.f32.mrf.mxu0 }
0x1767   :  { %6438 = vpow2.f32 %v5287_v25  ;;  %v4719_v30 = vadd.f32 %v8087_v52, %v4708_v14 }
0x1769   :  { %v5288_v21 = vmul.f32 -1.442695, %v4719_v30  ;;  %v4597_v42 = vpop.f32.mrf.mxu1 }
0x176a   :  { %v4712_v29 = vpop.f32.mrf.mxu0 }
0x176b   :  { %6440 = vpow2.f32 %v5288_v21  ;;  %v4713_v37 = vadd.f32 %v4712_v29, %v4597_v42  ;;  %v5939_v26 = vpop.f32.mrf.mxu1  ;;  %v4846_v21 = vld [vmem:[%s8375_s7] sm:$0xff] }
0x176c   :  { %v6435_v34 = vpop.eup %6434  ;;  %v5958_v50 = vpop.f32.mrf.mxu0 }
0x176d   :  { %v4736_v8 = vadd.f32 1.0, %v6435_v34  ;;  %v4720_v46 = vadd.f32 %v8087_v52, %v4713_v37 }
0x176f   :  { %6442 = vrcp.f32 %v4736_v8  ;;  %v5289_v24 = vmul.f32 -1.442695, %v4720_v46 }
0x1770   :  { %v6437_v56 = vpop.eup %6436 }
0x1771   :  { %v4737_v11 = vadd.f32 1.0, %v6437_v56  ;;  %6444 = vpow2.f32 %v5289_v24 }
0x1773   :  { %6446 = vrcp.f32 %v4737_v11 }
0x1774   :  { %v6439_v61 = vpop.eup %6438 }
0x1775   :  { %v4738_v18 = vadd.f32 1.0, %v6439_v61 }
0x1777   :  { %6448 = vrcp.f32 %v4738_v18 }
0x1778   :  { %v6441_v28 = vpop.eup %6440 }
0x1779   :  { %v4739_v39 = vadd.f32 1.0, %v6441_v28 }
0x177b   :  { %6450 = vrcp.f32 %v4739_v39 }
0x177c   :  { %v8252_v48 = vpop.eup %6442 }
0x177d   :  { %v4751_v40 = vmul.f32 2.0, %v8252_v48  ;;  %v4761_v62 = vmul.f32 %v8252_v48, %v8158_v54 }
0x177e   :  { %v6445_v59 = vpop.eup %6444 }
0x177f   :  { %v4740_v1 = vadd.f32 1.0, %v6445_v59  ;;  %v5290_v22 = vadd.f32 -1.0, %v4751_v40  ;;  %v5300_v40 = vld [vmem:[%s8376_s8] ss:$0 sm:$0xff] }
0x1780   :  { %v8255_v52 = vpop.eup %6446 }
0x1781   :  { %6452 = vrcp.f32 %v4740_v1  ;;  %4771 = vrot.lane.b32.xlu0 %v5290_v22, %s6487_s3  ;;  %v4752_v51 = vmul.f32 2.0, %v8255_v52  ;;  %v4762_v38 = vmul.f32 %v8255_v52, %v8165_v35  ;;  %v4963_v1 = vld [vmem:[%s8369_s0 + $0x7] sm:$0xff] }
0x1783   :  { %v5291_v12 = vadd.f32 -1.0, %v4752_v51 }
0x1784   :  { %v8259_v31 = vpop.eup %6448 }
0x1785   :  { %4773 = vrot.lane.b32.xlu1 %v5291_v12, %s6487_s3  ;;  %v4753_v49 = vmul.f32 2.0, %v8259_v31  ;;  %v4763_v7 = vmul.f32 %v8259_v31, %v8172_v5 }
0x1787   :  { %v5292_v60 = vadd.f32 -1.0, %v4753_v49 }
0x1788   :  { %v8263_v53 = vpop.eup %6450 }
0x1789   :  { %4775 = vrot.lane.b32.xlu0 %v5292_v60, %s6487_s3  ;;  %v4754_v27 = vmul.f32 2.0, %v8263_v53  ;;  %v4764_v33 = vmul.f32 %v8263_v53, %v8179_v44  ;;  %v4847_v44 = vld [vmem:[%s8375_s7 + $0x8] sm:$0xff] }
0x178a   :  { %5960 = vmatpush3.msra.mxu1 %v4847_v44 }
0x178b   :  { %v5293_v32 = vadd.f32 -1.0, %v4754_v27  ;;  %5961 = vmatprep.subr.mxu1 %v6485_v2 }
0x178c   :  { %5962 = vmatpush3.msra.mxu1 %v4846_v21 }
0x178d   :  { %4777 = vrot.lane.b32.xlu1 %v5293_v32, %s6487_s3  ;;  %v4965_v32 = vld [vmem:[%s8369_s0 + $0x17] sm:$0xff] }
0x178e   :  { %v8268_v45 = vpop.eup %6452 }
0x178f   :  { %v4755_v41 = vmul.f32 2.0, %v8268_v45  ;;  %v4765_v9 = vmul.f32 %v8268_v45, %v8188_v57 }
0x1791   :  { %v5294_v63 = vadd.f32 -1.0, %v4755_v41 }
0x1793   :  { %4779 = vrot.lane.b32.xlu0 %v5294_v63, %s6487_s3 }
0x17f3   :  { %v4772_v20 = vpop.permute.xlu0 %4771 }
0x17f4   :  { %v4786_v3 = vmul.f32 %v8252_v48, %v4772_v20 }
0x17f6   :  { %4796 = vrot.lane.b32.xlu1 %v4786_v3, %s6488_s18 }
0x17f7   :  { %v4774_v55 = vpop.permute.xlu1 %4773 }
0x17f8   :  { %v4787_v47 = vmul.f32 %v8255_v52, %v4774_v55  ;;  %v4966_v55 = vld [vmem:[%s8369_s0 + $0x1f] sm:$0xff] }
0x17fa   :  { %4798 = vrot.lane.b32.xlu0 %v4787_v47, %s6488_s18 }
0x17fb   :  { %v4776_v4 = vpop.permute.xlu0 %4775 }
0x17fc   :  { %v4788_v19 = vmul.f32 %v8259_v31, %v4776_v4 }
0x17fe   :  { %4800 = vrot.lane.b32.xlu1 %v4788_v19, %s6488_s18 }
0x17ff   :  { %v4778_v15 = vpop.permute.xlu1 %4777 }
0x1800   :  { %v4789_v6 = vmul.f32 %v8263_v53, %v4778_v15 }
0x1802   :  { %4802 = vrot.lane.b32.xlu0 %v4789_v6, %s6488_s18 }
0x1805   :  { %v4780_v0 = vpop.permute.xlu0 %4779 }
0x1806   :  { %v4790_v58 = vmul.f32 %v8268_v45, %v4780_v0 }
0x1808   :  { %4804 = vrot.lane.b32.xlu1 %v4790_v58, %s6488_s18  ;;  %v4967_v58 = vld [vmem:[%s8369_s0 + $0x27] sm:$0xff] }
0x1868   :  { %v4797_v16 = vpop.permute.xlu1 %4796 }
0x1869   :  { %v4811_v43 = vadd.f32 %v4797_v16, %v4761_v62 }
0x186b   :  { %6454 = vtanh.f32 %v4811_v43 }
0x186c   :  { %v4799_v10 = vpop.permute.xlu0 %4798 }
0x186d   :  { %v4812_v23 = vadd.f32 %v4799_v10, %v4762_v38  ;;  %v5001_v10 = vstv %s8377_s9 }
0x186f   :  { %6456 = vtanh.f32 %v4812_v23 }
0x1870   :  { %v4801_v13 = vpop.permute.xlu1 %4800 }
0x1871   :  { %v4813_v17 = vadd.f32 %v4801_v13, %v4763_v7 }
0x1873   :  { %6458 = vtanh.f32 %v4813_v17 }
0x1874   :  { %v4803_v25 = vpop.permute.xlu0 %4802 }
0x1875   :  { %v4814_v54 = vadd.f32 %v4803_v25, %v4764_v33 }
0x1877   :  { %6460 = vtanh.f32 %v4814_v54 }
0x1878   :  { %v6455_v14 = vpop.eup %6454 }
0x1879   :  { %4826 = vrot.lane.b32.xlu0 %v6455_v14, %s6489_s25 }
0x187a   :  { %v4805_v35 = vpop.permute.xlu1 %4804 }
0x187b   :  { %v4815_v36 = vadd.f32 %v4805_v35, %v4765_v9 }
0x187c   :  { %v6457_v30 = vpop.eup %6456 }
0x187d   :  { %6462 = vtanh.f32 %v4815_v36  ;;  %4828 = vrot.lane.b32.xlu1 %v6457_v30, %s6489_s25 }
0x1880   :  { %v6459_v5 = vpop.eup %6458 }
0x1881   :  { %4830 = vrot.lane.b32.xlu0 %v6459_v5, %s6489_s25 }
0x1884   :  { %v6461_v57 = vpop.eup %6460 }
0x1885   :  { %4832 = vrot.lane.b32.xlu1 %v6461_v57, %s6489_s25 }
0x188a   :  { %v6463_v42 = vpop.eup %6462 }
0x188b   :  { %4834 = vrot.lane.b32.xlu0 %v6463_v42, %s6489_s25 }
0x18eb   :  { %v4827_v29 = vpop.permute.xlu0 %4826 }
0x18ec   :  { %v4841_v37 = vmul.f32 %v8252_v48, %v4827_v29 }
0x18ee   :  { %4853 = vrot.lane.b32.xlu1 %v4841_v37, %s6490_s28 }
0x18ef   :  { %v4829_v26 = vpop.permute.xlu1 %4828 }
0x18f0   :  { %v4842_v34 = vmul.f32 %v8255_v52, %v4829_v26 }
0x18f2   :  { %4855 = vrot.lane.b32.xlu0 %v4842_v34, %s6490_s28 }
0x18f3   :  { %v4831_v50 = vpop.permute.xlu0 %4830 }
0x18f4   :  { %v4843_v8 = vmul.f32 %v8259_v31, %v4831_v50 }
0x18f6   :  { %4857 = vrot.lane.b32.xlu1 %v4843_v8, %s6490_s28 }
0x18f7   :  { %v4833_v46 = vpop.permute.xlu1 %4832 }
0x18f8   :  { %v4844_v24 = vmul.f32 %v8263_v53, %v4833_v46 }
0x18fa   :  { %4859 = vrot.lane.b32.xlu0 %v4844_v24, %s6490_s28 }
0x18fd   :  { %v4835_v56 = vpop.permute.xlu0 %4834 }
0x18fe   :  { %v4845_v11 = vmul.f32 %v8268_v45, %v4835_v56 }
0x1900   :  { %4861 = vrot.lane.b32.xlu1 %v4845_v11, %s6490_s28 }
0x1960   :  { %v4854_v61 = vpop.permute.xlu1 %4853 }
0x1961   :  { %5964 = vmatmul.mubr.msk.f32.vlgmr.msra.gmra.mxu1 %vm186_vm3, %v4854_v61 }
0x1962   :  { %5966 = vmatprep.mubr.msk.f32.mxu1 %vm6486_vm1, %v6485_v2 }
0x1964   :  { %v4856_v18 = vpop.permute.xlu0 %4855 }
0x1965   :  { %5967 = vmatmul.mubr.msk.f32.gmra.mxu1 %vm186_vm3, %v4856_v18 }
0x1966   :  { %5969 = vmatprep.mubr.msk.f32.mxu1 %vm6486_vm1, %v6485_v2 }
0x1968   :  { %v4858_v28 = vpop.permute.xlu1 %4857 }
0x1969   :  { %5970 = vmatmul.mubr.msk.f32.gmra.mxu1 %vm186_vm3, %v4858_v28 }
0x196a   :  { %5972 = vmatprep.mubr.msk.f32.mxu1 %vm6486_vm1, %v6485_v2 }
0x196c   :  { %v4860_v39 = vpop.permute.xlu0 %4859 }
0x196d   :  { %5973 = vmatmul.mubr.msk.f32.gmra.mxu1 %vm186_vm3, %v4860_v39 }
0x196e   :  { %5975 = vmatprep.mubr.msk.f32.mxu1 %vm6486_vm1, %v6485_v2  ;;  %v4964_v2 = vld [vmem:[%s8369_s0 + $0xf] sm:$0xff] }
0x1972   :  { %v4862_v48 = vpop.permute.xlu1 %4861 }
0x1973   :  { %5976 = vmatmul.mubr.msk.f32.gmra.mxu1 %vm186_vm3, %v4862_v48 }
0x1a21   :  { %v4939_v59 = vpop.f32.mrf.mxu1 }
0x1a22   :  { %v4975_v22 = vmul.f32 %v5300_v40, %v4939_v59 }
0x1a23   :  { %v5965_v52 = vpop.f32.mrf.mxu1 }
0x1a24   :  { %v4980_v51 = vmul.f32 %v4975_v22, %v4963_v1 }
0x1a25   :  { %v4944_v12 = vpop.f32.mrf.mxu1 }
0x1a26   :  { %v4976_v31 = vmul.f32 %v5300_v40, %v4944_v12  ;;  %v4985_v49 = vsel %vm53_vm0, %v4980_v51, 0.0 }
0x1a27   :  { %4986 = vadd.xlane.f32.xlu0 %v4985_v49  ;;  %v5968_v60 = vpop.f32.mrf.mxu1 }
0x1a28   :  { %v4981_v53 = vmul.f32 %v4976_v31, %v4964_v2 }
0x1a29   :  { %v4949_v27 = vpop.f32.mrf.mxu1 }
0x1a2a   :  { %v4977_v45 = vmul.f32 %v5300_v40, %v4949_v27  ;;  %v4988_v41 = vsel %vm53_vm0, %v4981_v53, 0.0 }
0x1a2b   :  { %4989 = vadd.xlane.f32.xlu1 %v4988_v41  ;;  %v5971_v63 = vpop.f32.mrf.mxu1 }
0x1a2c   :  { %v4982_v20 = vmul.f32 %v4977_v45, %v4965_v32 }
0x1a2d   :  { %v4954_v3 = vpop.f32.mrf.mxu1 }
0x1a2e   :  { %v4978_v47 = vmul.f32 %v5300_v40, %v4954_v3  ;;  %v4991_v4 = vsel %vm53_vm0, %v4982_v20, 0.0 }
0x1a2f   :  { %4992 = vadd.xlane.f32.xlu0 %v4991_v4  ;;  %v5974_v19 = vpop.f32.mrf.mxu1 }
0x1a30   :  { %v4983_v15 = vmul.f32 %v4978_v47, %v4966_v55 }
0x1a32   :  { %v4994_v6 = vsel %vm53_vm0, %v4983_v15, 0.0 }
0x1a33   :  { %v4959_v0 = vpop.f32.mrf.mxu1  ;;  %4995 = vadd.xlane.f32.xlu0 %v4994_v6 }
0x1a34   :  { %v4979_v62 = vmul.f32 %v5300_v40, %v4959_v0 }
0x1a35   :  { %v5977_v16 = vpop.f32.mrf.mxu1 }
0x1a36   :  { %v4984_v43 = vmul.f32 %v4979_v62, %v4967_v58 }
0x1a38   :  { %v4997_v38 = vsel %vm53_vm0, %v4984_v43, 0.0 }
0x1a39   :  { %4998 = vadd.xlane.f32.xlu1 %v4997_v38 }
0x1ab0   :  { %v4987_v23 = vpop.xlane.xlu0 %4986 }
0x1ab1   :  { %v5002_v7 = vadd.f32 %v5001_v10, %v4987_v23 }
0x1ab3   :  { %5008 = vst.msk [vmem:[%s8378_s10] sm:$0xff] %vm5007_vm4, %v5002_v7 }
0x1ab4   :  { %v4990_v13 = vpop.xlane.xlu1 %4989 }
0x1ab5   :  { %v5003_v17 = vadd.f32 %v5001_v10, %v4990_v13 }
0x1ab7   :  { %5009 = vst.msk [vmem:[%s8378_s10 + $0x8] sm:$0xff] %vm5007_vm4, %v5003_v17 }
0x1ab8   :  { %v4993_v33 = vpop.xlane.xlu0 %4992 }
0x1ab9   :  { %v5004_v25 = vadd.f32 %v5001_v10, %v4993_v33 }
0x1abb   :  { %5010 = vst.msk [vmem:[%s8378_s10 + $0x10] sm:$0xff] %vm5007_vm4, %v5004_v25 }
0x1abc   :  { %v4996_v54 = vpop.xlane.xlu0 %4995 }
0x1abd   :  { %v5005_v14 = vadd.f32 %v5001_v10, %v4996_v54 }
0x1abf   :  { %5011 = vst.msk [vmem:[%s8378_s10 + $0x18] sm:$0xff] %vm5007_vm4, %v5005_v14 }
0x1ac2   :  { %v4999_v9 = vpop.xlane.xlu1 %4998 }
0x1ac3   :  { %v5006_v35 = vadd.f32 %v5001_v10, %v4999_v9 }
0x1ac5   :  { %5012 = vst.msk [vmem:[%s8378_s10 + $0x20] sm:$0xff] %vm5007_vm4, %v5006_v35 }

</bundles_post_ra>
